<compile_context>
chip_gen: v5e
topology: v5e:2x2
jax: 0.10.0
libtpu: 0.0.40
codegen_flags: <defaults>
</compile_context>

<pallas_src>
import jax
import jax.numpy as jnp
from jax.experimental import pallas as pl
from jax.experimental.pallas import tpu as pltpu

BN_EPS = 1e-5
POOL_K = 5  # cfg['pooling_size'] (kernel bodies hardcode the 5-tap / pad-2 windows)


# ---------------------------------------------------------------------------
# Pallas kernels
# ---------------------------------------------------------------------------

def _dual_pw_kernel(x_ref, w1_ref, s1_ref, b1_ref, w2_ref, s2_ref, b2_ref,
                    o1_ref, o2_ref):
    """Two 1x1 convs (+ folded BN + SiLU) sharing a single read of x.

    x_ref:(TM,Cin)  w*:(Cin,C*)  s*/b*:(1,C*)  o*:(TM,C*)
    """
    x = x_ref[...]
    y1 = jnp.dot(x, w1_ref[...], preferred_element_type=jnp.float32)
    y1 = y1 * s1_ref[...] + b1_ref[...]
    o1_ref[...] = (y1 * jax.nn.sigmoid(y1)).astype(o1_ref.dtype)
    y2 = jnp.dot(x, w2_ref[...], preferred_element_type=jnp.float32)
    y2 = y2 * s2_ref[...] + b2_ref[...]
    o2_ref[...] = (y2 * jax.nn.sigmoid(y2)).astype(o2_ref.dtype)


def _concat_pw_kernel(a_ref, b_ref, wa_ref, wb_ref, s_ref, bias_ref, o_ref):
    """1x1 conv over channel-concat [a, b] without materializing the concat."""
    y = jnp.dot(a_ref[...], wa_ref[...], preferred_element_type=jnp.float32)
    y = y + jnp.dot(b_ref[...], wb_ref[...], preferred_element_type=jnp.float32)
    y = y * s_ref[...] + bias_ref[...]
    o_ref[...] = (y * jax.nn.sigmoid(y)).astype(o_ref.dtype)


def _conv3x3_kernel(x_ref, w_ref, s_ref, b_ref, o_ref, xpad_ref):
    """3x3 stride-1 pad-1 conv + folded BN + SiLU, one image per grid step.

    Halo handled in VMEM: the input is copied into a zero-filled scratch whose
    interior starts at sublane offset 8 (tile-aligned store); the 9 taps are
    shifted *reads* from that scratch.  No HBM padding pass.

    x_ref:(1,H,W,Cin)  w_ref:(9,Cin,Cout)  s/b:(1,Cout)  xpad_ref:(H+2,W+16,Cin)
    """
    H, W, Cout = o_ref.shape[1], o_ref.shape[2], o_ref.shape[3]
    xpad_ref[...] = jnp.zeros(xpad_ref.shape, xpad_ref.dtype)
    xpad_ref[1:H + 1, 8:W + 8, :] = x_ref[0]
    acc = None
    for t in range(9):
        dy, dx = divmod(t, 3)
        patch = xpad_ref[dy:dy + H, 7 + dx:7 + dx + W, :]
        part = jax.lax.dot_general(
            patch, w_ref[t],
            dimension_numbers=(((2,), (0,)), ((), ())),
            preferred_element_type=jnp.float32)
        acc = part if acc is None else acc + part
    y = acc * s_ref[0] + b_ref[0]
    y = y * jax.nn.sigmoid(y)
    o_ref[...] = y[None].astype(o_ref.dtype)
    # TODO(synk): for very large feature maps (v7x 64 MiB VMEM) switch to row-strip grid tiling.


def _sppf_kernel(x_ref, w1_ref, s1_ref, b1_ref, w2_ref, s2_ref, b2_ref,
                 o_ref, rowpad_ref, colpad_ref):
    """Fused SPPF tail: 1x1 conv -> 3 cascaded 5x5/s1 maxpools -> 1x1 conv over the
    4-way channel concat, everything resident in VMEM (one HBM read, one write).

    x_ref:(1,H,W,C)  w1:(C,C)  w2:(4,C,C) (sppf cv2 weight split by source)
    rowpad_ref:(H,W+16,C) f32   colpad_ref:(H+4,W,C) f32
    """
    H, W, C = o_ref.shape[1], o_ref.shape[2], o_ref.shape[3]
    # -inf borders; interiors are overwritten by each pool pass.
    rowpad_ref[...] = jnp.full(rowpad_ref.shape, -jnp.inf, rowpad_ref.dtype)
    colpad_ref[...] = jnp.full(colpad_ref.shape, -jnp.inf, colpad_ref.dtype)

    def cdot(a, w):
        return jax.lax.dot_general(
            a, w, dimension_numbers=(((2,), (0,)), ((), ())),
            preferred_element_type=jnp.float32)

    def pool5(a):
        # Separable 5x5 max, stride 1, 'same' (-inf padding): 2*(5-1)=8 max ops.
        rowpad_ref[:, 8:W + 8, :] = a                 # tile-aligned interior store
        r = rowpad_ref[:, 6:6 + W, :]
        for d in range(1, 5):
            r = jnp.maximum(r, rowpad_ref[:, 6 + d:6 + d + W, :])
        colpad_ref[2:H + 2, :, :] = r                 # outer-dim offset store
        o = colpad_ref[0:H, :, :]
        for d in range(1, 5):
            o = jnp.maximum(o, colpad_ref[d:d + H, :, :])
        return o

    s = cdot(x_ref[0], w1_ref[...])
    s = s * s1_ref[0] + b1_ref[0]
    s = s * jax.nn.sigmoid(s)
    y1 = pool5(s)
    y2 = pool5(y1)
    y3 = pool5(y2)
    acc = (cdot(s, w2_ref[0]) + cdot(y1, w2_ref[1])
           + cdot(y2, w2_ref[2]) + cdot(y3, w2_ref[3]))
    y = acc * s2_ref[0] + b2_ref[0]
    y = y * jax.nn.sigmoid(y)
    o_ref[...] = y[None].astype(o_ref.dtype)


# ---------------------------------------------------------------------------
# Pallas wrappers
# ---------------------------------------------------------------------------

def _row_tile(M):
    # Large mem-bound-friendly tiles; last block may be partial (pl.cdiv grid).
    return 1024 if M > 1024 else M


def dual_pw_conv_bn_silu(x, p1, p2):
    """Two 1x1 conv+BN+SiLU sharing the same input. x:(B,H,W,Cin) -> (o1, o2)."""
    B, H, W, Cin = x.shape
    C1 = p1['w_mat'].shape[1]
    C2 = p2['w_mat'].shape[1]
    M = B * H * W
    tm = _row_tile(M)
    xm = x.reshape(M, Cin)
    o1, o2 = pl.pallas_call(
        _dual_pw_kernel,
        out_shape=(jax.ShapeDtypeStruct((M, C1), jnp.float32),
                   jax.ShapeDtypeStruct((M, C2), jnp.float32)),
        grid=(pl.cdiv(M, tm),),
        in_specs=[pl.BlockSpec((tm, Cin), lambda i: (i, 0)),
                  pl.BlockSpec((Cin, C1), lambda i: (0, 0)),
                  pl.BlockSpec((1, C1), lambda i: (0, 0)),
                  pl.BlockSpec((1, C1), lambda i: (0, 0)),
                  pl.BlockSpec((Cin, C2), lambda i: (0, 0)),
                  pl.BlockSpec((1, C2), lambda i: (0, 0)),
                  pl.BlockSpec((1, C2), lambda i: (0, 0))],
        out_specs=(pl.BlockSpec((tm, C1), lambda i: (i, 0)),
                   pl.BlockSpec((tm, C2), lambda i: (i, 0))),
        compiler_params=pltpu.CompilerParams(dimension_semantics=("parallel",)),
    )(xm, p1['w_mat'], p1['scale'], p1['bias'],
      p2['w_mat'], p2['scale'], p2['bias'])
    return o1.reshape(B, H, W, C1), o2.reshape(B, H, W, C2)


def concat_pw_conv_bn_silu(a, b, p):
    """1x1 conv+BN+SiLU applied to concat([a, b], channel) without building the concat."""
    B, H, W, Ca = a.shape
    Cb = b.shape[3]
    Cout = p['w_mat'].shape[1]
    M = B * H * W
    tm = _row_tile(M)
    am = a.reshape(M, Ca)
    bm = b.reshape(M, Cb)
    wa = p['w_mat'][:Ca]
    wb = p['w_mat'][Ca:]
    out = pl.pallas_call(
        _concat_pw_kernel,
        out_shape=jax.ShapeDtypeStruct((M, Cout), jnp.float32),
        grid=(pl.cdiv(M, tm),),
        in_specs=[pl.BlockSpec((tm, Ca), lambda i: (i, 0)),
                  pl.BlockSpec((tm, Cb), lambda i: (i, 0)),
                  pl.BlockSpec((Ca, Cout), lambda i: (0, 0)),
                  pl.BlockSpec((Cb, Cout), lambda i: (0, 0)),
                  pl.BlockSpec((1, Cout), lambda i: (0, 0)),
                  pl.BlockSpec((1, Cout), lambda i: (0, 0))],
        out_specs=pl.BlockSpec((tm, Cout), lambda i: (i, 0)),
        compiler_params=pltpu.CompilerParams(dimension_semantics=("parallel",)),
    )(am, bm, wa, wb, p['scale'], p['bias'])
    return out.reshape(B, H, W, Cout)


def conv3x3_bn_silu(x, p):
    """Dense 3x3, pad=1, stride=1, + BN + SiLU. x:(B,H,W,Cin) -> (B,H,W,Cout)."""
    B, H, W, Cin = x.shape
    Cout = p['w_taps'].shape[2]
    return pl.pallas_call(
        _conv3x3_kernel,
        out_shape=jax.ShapeDtypeStruct((B, H, W, Cout), jnp.float32),
        grid=(B,),
        in_specs=[pl.BlockSpec((1, H, W, Cin), lambda b: (b, 0, 0, 0)),
                  pl.BlockSpec((9, Cin, Cout), lambda b: (0, 0, 0)),
                  pl.BlockSpec((1, Cout), lambda b: (0, 0)),
                  pl.BlockSpec((1, Cout), lambda b: (0, 0))],
        out_specs=pl.BlockSpec((1, H, W, Cout), lambda b: (b, 0, 0, 0)),
        scratch_shapes=[pltpu.VMEM((H + 2, W + 16, Cin), jnp.float32)],
        compiler_params=pltpu.CompilerParams(dimension_semantics=("parallel",)),
    )(x, p['w_taps'], p['scale'], p['bias'])


def sppf_fused(x, p_cv1, p_cv2):
    """Fused SPPF(inter, inter, expand_ratio=1.0). x:(B,H,W,C) -> (B,H,W,C)."""
    B, H, W, C = x.shape
    w2 = p_cv2['w_mat'].reshape(4, C, C)   # (4C,C) -> per-source (C,C) slices
    return pl.pallas_call(
        _sppf_kernel,
        out_shape=jax.ShapeDtypeStruct((B, H, W, C), jnp.float32),
        grid=(B,),
        in_specs=[pl.BlockSpec((1, H, W, C), lambda b: (b, 0, 0, 0)),
                  pl.BlockSpec((C, C), lambda b: (0, 0)),
                  pl.BlockSpec((1, C), lambda b: (0, 0)),
                  pl.BlockSpec((1, C), lambda b: (0, 0)),
                  pl.BlockSpec((4, C, C), lambda b: (0, 0, 0)),
                  pl.BlockSpec((1, C), lambda b: (0, 0)),
                  pl.BlockSpec((1, C), lambda b: (0, 0))],
        out_specs=pl.BlockSpec((1, H, W, C), lambda b: (b, 0, 0, 0)),
        scratch_shapes=[pltpu.VMEM((H, W + 16, C), jnp.float32),
                        pltpu.VMEM((H + 4, W, C), jnp.float32)],
        compiler_params=pltpu.CompilerParams(dimension_semantics=("parallel",)),
    )(x, p_cv1['w_mat'], p_cv1['scale'], p_cv1['bias'],
      w2, p_cv2['scale'], p_cv2['bias'])


# ---------------------------------------------------------------------------
# Parameter init (deterministic, synthetic) — matches PyTorch layer shapes
# ---------------------------------------------------------------------------

def init_conv_params(key, cin, cout, k):
    kw, kg, kb, km, kv = jax.random.split(key, 5)
    w = 0.1 * jax.random.normal(kw, (cout, cin, k, k), jnp.float32)      # OIHW (torch)
    gamma = 1.0 + 0.1 * jax.random.normal(kg, (cout,), jnp.float32)
    beta = 0.1 * jax.random.normal(kb, (cout,), jnp.float32)
    mean = 0.1 * jax.random.normal(km, (cout,), jnp.float32)
    var = jnp.abs(jax.random.normal(kv, (cout,), jnp.float32)) + 0.5
    scale = gamma / jnp.sqrt(var + BN_EPS)
    bias = beta - mean * scale
    p = {'w_oihw': w, 'scale': scale[None, :], 'bias': bias[None, :], 'k': k}
    if k == 1:
        p['w_mat'] = jnp.transpose(w[:, :, 0, 0], (1, 0))                # (Cin, Cout)
    else:
        p['w_taps'] = jnp.transpose(w, (2, 3, 1, 0)).reshape(k * k, cin, cout)
    return p


def init_sppf_block_csp(key, in_dim, out_dim, expand_ratio):
    inter_dim = int(in_dim * expand_ratio)
    keys = jax.random.split(key, 7)
    return {
        'cv1': init_conv_params(keys[0], in_dim, inter_dim, 1),
        'cv2': init_conv_params(keys[1], in_dim, inter_dim, 1),
        'm0': init_conv_params(keys[2], inter_dim, inter_dim, 3),
        # SPPF(inter_dim, inter_dim, expand_ratio=1.0)
        'sppf_cv1': init_conv_params(keys[3], inter_dim, inter_dim, 1),
        'sppf_cv2': init_conv_params(keys[4], inter_dim * 4, inter_dim, 1),
        'm2': init_conv_params(keys[5], inter_dim, inter_dim, 3),
        'cv3': init_conv_params(keys[6], inter_dim * 2, out_dim, 1),
    }


# ---------------------------------------------------------------------------
# Forward pass (Pallas)
# ---------------------------------------------------------------------------

def sppf_block_csp_forward(x_nchw, params):
    x = jnp.transpose(x_nchw, (0, 2, 3, 1))                   # NCHW -> NHWC
    x1, x2 = dual_pw_conv_bn_silu(x, params['cv1'], params['cv2'])
    # self.m = [Conv3x3, SPPF, Conv3x3]
    t = conv3x3_bn_silu(x2, params['m0'])
    u = sppf_fused(t, params['sppf_cv1'], params['sppf_cv2'])
    x3 = conv3x3_bn_silu(u, params['m2'])
    y = concat_pw_conv_bn_silu(x1, x3, params['cv3'])
    return jnp.transpose(y, (0, 3, 1, 2))                      # NHWC -> NCHW


# ---------------------------------------------------------------------------
# Pure-JAX reference (for correctness check only)
# ---------------------------------------------------------------------------

def _ref_conv(x, p, pad):
    w_hwio = jnp.transpose(p['w_oihw'], (2, 3, 1, 0))
    y = jax.lax.conv_general_dilated(
        x, w_hwio, (1, 1), [(pad, pad), (pad, pad)],
        dimension_numbers=('NHWC', 'HWIO', 'NHWC'))
    y = y * p['scale'] + p['bias']
    return y * jax.nn.sigmoid(y)


def _ref_maxpool(x, k=POOL_K):
    pad = k // 2
    return jax.lax.reduce_window(
        x, -jnp.inf, jax.lax.max, (1, k, k, 1), (1, 1, 1, 1),
        [(0, 0), (pad, pad), (pad, pad), (0, 0)])


def sppf_block_csp_reference(x_nchw, params):
    x = jnp.transpose(x_nchw, (0, 2, 3, 1))
    x1 = _ref_conv(x, params['cv1'], 0)
    x2 = _ref_conv(x, params['cv2'], 0)
    t = _ref_conv(x2, params['m0'], 1)
    s = _ref_conv(t, params['sppf_cv1'], 0)
    y1 = _ref_maxpool(s)
    y2 = _ref_maxpool(y1)
    y3 = _ref_maxpool(y2)
    t = _ref_conv(jnp.concatenate([s, y1, y2, y3], axis=-1),
                  params['sppf_cv2'], 0)
    x3 = _ref_conv(t, params['m2'], 1)
    y = _ref_conv(jnp.concatenate([x1, x3], axis=-1), params['cv3'], 0)
    return jnp.transpose(y, (0, 3, 1, 2))


# ---------------------------------------------------------------------------

if __name__ == "__main__":
    B, IN_DIM, H, W = 2, 8, 16, 16
    OUT_DIM, EXPAND = 16, 0.5

    key = jax.random.PRNGKey(0)
    kx, kp = jax.random.split(key)
    x = jax.random.normal(kx, (B, IN_DIM, H, W), jnp.float32)   # NCHW like PyTorch
    params = init_sppf_block_csp(kp, IN_DIM, OUT_DIM, EXPAND)

    out = jax.block_until_ready(sppf_block_csp_forward(x, params))
    ref = jax.block_until_ready(sppf_block_csp_reference(x, params))

    assert out.shape == (B, OUT_DIM, H, W), out.shape
    assert jnp.allclose(out, ref, rtol=1e-3, atol=1e-3), \
        float(jnp.max(jnp.abs(out - ref)))

    print("KERNEL_OK")
</pallas_src>

<mosaic_0001>
module attributes {stable_mosaic.version = 11 : i64} {
  func.func @_dual_pw_kernel(%arg0: i32, %arg1: memref<512x8xf32, #tpu.memory_space<vmem>>, %arg2: memref<8x4xf32, #tpu.memory_space<vmem>>, %arg3: memref<1x4xf32, #tpu.memory_space<vmem>>, %arg4: memref<1x4xf32, #tpu.memory_space<vmem>>, %arg5: memref<8x4xf32, #tpu.memory_space<vmem>>, %arg6: memref<1x4xf32, #tpu.memory_space<vmem>>, %arg7: memref<1x4xf32, #tpu.memory_space<vmem>>, %arg8: memref<512x4xf32, #tpu.memory_space<vmem>>, %arg9: memref<512x4xf32, #tpu.memory_space<vmem>>) attributes {dimension_semantics = [#tpu.dimension_semantics<parallel>], iteration_bounds = array<i64: 1>, scalar_prefetch = 0 : i64, scratch_operands = 0 : i64, tpu.core_type = #tpu.core_type<tc>, window_params = [{transform_indices = @transform_0, window_bounds = array<i64: 512, 8>}, {pipeline_mode = #tpu.pipeline_mode<synchronous>, transform_indices = @transform_1, window_bounds = array<i64: 8, 4>}, {pipeline_mode = #tpu.pipeline_mode<synchronous>, transform_indices = @transform_2, window_bounds = array<i64: 1, 4>}, {pipeline_mode = #tpu.pipeline_mode<synchronous>, transform_indices = @transform_3, window_bounds = array<i64: 1, 4>}, {pipeline_mode = #tpu.pipeline_mode<synchronous>, transform_indices = @transform_4, window_bounds = array<i64: 8, 4>}, {pipeline_mode = #tpu.pipeline_mode<synchronous>, transform_indices = @transform_5, window_bounds = array<i64: 1, 4>}, {pipeline_mode = #tpu.pipeline_mode<synchronous>, transform_indices = @transform_6, window_bounds = array<i64: 1, 4>}, {transform_indices = @transform_7, window_bounds = array<i64: 512, 4>}, {transform_indices = @transform_8, window_bounds = array<i64: 512, 4>}]} {
    %c0 = arith.constant 0 : index
    %c0_0 = arith.constant 0 : index
    %0 = vector.load %arg1[%c0, %c0_0] : memref<512x8xf32, #tpu.memory_space<vmem>>, vector<512x8xf32>
    %c0_1 = arith.constant 0 : index
    %c0_2 = arith.constant 0 : index
    %1 = vector.load %arg2[%c0_1, %c0_2] : memref<8x4xf32, #tpu.memory_space<vmem>>, vector<8x4xf32>
    %cst = arith.constant dense<0.000000e+00> : vector<512x4xf32>
    %2 = tpu.matmul %0, %1, %cst {dimension_numbers = #tpu.dot_dimension_numbers<[1], [0], [0], [1], [0, 0, 1, 1], [], []>} : vector<512x8xf32>, vector<8x4xf32>, vector<512x4xf32> -> vector<512x4xf32>
    %c0_3 = arith.constant 0 : index
    %c0_4 = arith.constant 0 : index
    %3 = vector.load %arg3[%c0_3, %c0_4] : memref<1x4xf32, #tpu.memory_space<vmem>>, vector<1x4xf32>
    %4 = vector.broadcast %3 : vector<1x4xf32> to vector<512x4xf32>
    %5 = arith.mulf %2, %4 : vector<512x4xf32>
    %c0_5 = arith.constant 0 : index
    %c0_6 = arith.constant 0 : index
    %6 = vector.load %arg4[%c0_5, %c0_6] : memref<1x4xf32, #tpu.memory_space<vmem>>, vector<1x4xf32>
    %7 = vector.broadcast %6 : vector<1x4xf32> to vector<512x4xf32>
    %8 = arith.addf %5, %7 : vector<512x4xf32>
    %9 = arith.negf %8 : vector<512x4xf32>
    %10 = math.exp %9 : vector<512x4xf32>
    %cst_7 = arith.constant 1.000000e+00 : f32
    %11 = vector.broadcast %cst_7 : f32 to vector<512x4xf32>
    %12 = arith.addf %11, %10 : vector<512x4xf32>
    %13 = arith.divf %11, %12 : vector<512x4xf32>
    %14 = arith.mulf %8, %13 : vector<512x4xf32>
    %c0_8 = arith.constant 0 : index
    %c0_9 = arith.constant 0 : index
    %15 = vector.load %arg8[%c0_8, %c0_9] : memref<512x4xf32, #tpu.memory_space<vmem>>, vector<512x4xf32>
    tpu.vector_store %arg8[%c0_8, %c0_9], %14 {strides = array<i32>} : memref<512x4xf32, #tpu.memory_space<vmem>>, vector<512x4xf32>,
    %c0_10 = arith.constant 0 : index
    %c0_11 = arith.constant 0 : index
    %16 = vector.load %arg5[%c0_10, %c0_11] : memref<8x4xf32, #tpu.memory_space<vmem>>, vector<8x4xf32>
    %cst_12 = arith.constant dense<0.000000e+00> : vector<512x4xf32>
    %17 = tpu.matmul %0, %16, %cst_12 {dimension_numbers = #tpu.dot_dimension_numbers<[1], [0], [0], [1], [0, 0, 1, 1], [], []>} : vector<512x8xf32>, vector<8x4xf32>, vector<512x4xf32> -> vector<512x4xf32>
    %c0_13 = arith.constant 0 : index
    %c0_14 = arith.constant 0 : index
    %18 = vector.load %arg6[%c0_13, %c0_14] : memref<1x4xf32, #tpu.memory_space<vmem>>, vector<1x4xf32>
    %19 = vector.broadcast %18 : vector<1x4xf32> to vector<512x4xf32>
    %20 = arith.mulf %17, %19 : vector<512x4xf32>
    %c0_15 = arith.constant 0 : index
    %c0_16 = arith.constant 0 : index
    %21 = vector.load %arg7[%c0_15, %c0_16] : memref<1x4xf32, #tpu.memory_space<vmem>>, vector<1x4xf32>
    %22 = vector.broadcast %21 : vector<1x4xf32> to vector<512x4xf32>
    %23 = arith.addf %20, %22 : vector<512x4xf32>
    %24 = arith.negf %23 : vector<512x4xf32>
    %25 = math.exp %24 : vector<512x4xf32>
    %cst_17 = arith.constant 1.000000e+00 : f32
    %26 = vector.broadcast %cst_17 : f32 to vector<512x4xf32>
    %27 = arith.addf %26, %25 : vector<512x4xf32>
    %28 = arith.divf %26, %27 : vector<512x4xf32>
    %29 = arith.mulf %23, %28 : vector<512x4xf32>
    %c0_18 = arith.constant 0 : index
    %c0_19 = arith.constant 0 : index
    %30 = vector.load %arg9[%c0_18, %c0_19] : memref<512x4xf32, #tpu.memory_space<vmem>>, vector<512x4xf32>
    tpu.vector_store %arg9[%c0_18, %c0_19], %29 {strides = array<i32>} : memref<512x4xf32, #tpu.memory_space<vmem>>, vector<512x4xf32>,
    return
  }
  func.func @transform_0(%arg0: i32) -> (i32, i32) {
    %c0_i32 = arith.constant 0 : i32
    %c0_i32_0 = arith.constant 0 : i32
    return %arg0, %c0_i32 : i32, i32
  }
  func.func @transform_1(%arg0: i32) -> (i32, i32) {
    %c0_i32 = arith.constant 0 : i32
    %c0_i32_0 = arith.constant 0 : i32
    %c0_i32_1 = arith.constant 0 : i32
    return %c0_i32, %c0_i32_0 : i32, i32
  }
  func.func @transform_2(%arg0: i32) -> (i32, i32) {
    %c0_i32 = arith.constant 0 : i32
    %c0_i32_0 = arith.constant 0 : i32
    %c0_i32_1 = arith.constant 0 : i32
    return %c0_i32, %c0_i32_0 : i32, i32
  }
  func.func @transform_3(%arg0: i32) -> (i32, i32) {
    %c0_i32 = arith.constant 0 : i32
    %c0_i32_0 = arith.constant 0 : i32
    %c0_i32_1 = arith.constant 0 : i32
    return %c0_i32, %c0_i32_0 : i32, i32
  }
  func.func @transform_4(%arg0: i32) -> (i32, i32) {
    %c0_i32 = arith.constant 0 : i32
    %c0_i32_0 = arith.constant 0 : i32
    %c0_i32_1 = arith.constant 0 : i32
    return %c0_i32, %c0_i32_0 : i32, i32
  }
  func.func @transform_5(%arg0: i32) -> (i32, i32) {
    %c0_i32 = arith.constant 0 : i32
    %c0_i32_0 = arith.constant 0 : i32
    %c0_i32_1 = arith.constant 0 : i32
    return %c0_i32, %c0_i32_0 : i32, i32
  }
  func.func @transform_6(%arg0: i32) -> (i32, i32) {
    %c0_i32 = arith.constant 0 : i32
    %c0_i32_0 = arith.constant 0 : i32
    %c0_i32_1 = arith.constant 0 : i32
    return %c0_i32, %c0_i32_0 : i32, i32
  }
  func.func @transform_7(%arg0: i32) -> (i32, i32) {
    %c0_i32 = arith.constant 0 : i32
    %c0_i32_0 = arith.constant 0 : i32
    return %arg0, %c0_i32 : i32, i32
  }
  func.func @transform_8(%arg0: i32) -> (i32, i32) {
    %c0_i32 = arith.constant 0 : i32
    %c0_i32_0 = arith.constant 0 : i32
    return %arg0, %c0_i32 : i32, i32
  }
}

</mosaic_0001>

<bundles_post_ra>
// kernel: tpu_custom_call.1
= control target key start
LH: loop header
LB: loop body
LE: loop exit
PB: predicated region body
PF: predicated region fallthrough
CT: control target
= control target key end

     0   :  { %vm93_vm0 = vcmask 64512   ;;  %vm1911_vm4 = vcmask 31744   ;;  %s8263_s1 = inlined_call_operand.vmem [shape: f32[8,4], index: 1, kind: input, shape index: {}]   ;;  %s8264_s4 = inlined_call_operand.vmem [shape: f32[8,4], index: 4, kind: input, shape index: {}]   ;;  %s8265_s0 = inlined_call_operand.vmem [shape: f32[512,8], index: 0, kind: input, shape index: {}]   ;;  %s8266_s2 = inlined_call_operand.vmem [shape: f32[1,4], index: 2, kind: input, shape index: {}]   ;;  %s8267_s3 = inlined_call_operand.vmem [shape: f32[1,4], index: 3, kind: input, shape index: {}]   ;;  %s8268_s5 = inlined_call_operand.vmem [shape: f32[1,4], index: 5, kind: input, shape index: {}]   ;;  %s8269_s6 = inlined_call_operand.vmem [shape: f32[1,4], index: 6, kind: input, shape index: {}]   ;;  %s8270_s7 = inlined_call_operand.vmem [shape: f32[512,4], index: 7, kind: output, shape index: {0}]   ;;  %s8271_s8 = inlined_call_operand.vmem [shape: f32[512,4], index: 8, kind: output, shape index: {1}]  }
   0x1   :  { %v92_v0 = vld [vmem:[%s8263_s1] sm:$0xff]  ;;  %v29_v4 = vld [vmem:[%s8265_s0 + $0x8] sm:$0xff]  ;;  %v30_v6 = vld [vmem:[%s8265_s0 + $0x10] sm:$0xff] }
   0x2   :  { %v1976_v1 = vld [vmem:[%s8264_s4] sm:$0xff]  ;;  %301 = vmatpush.msra.mxu0 %v92_v0  ;;  %3930 = vmatpush.msra.mxu2 %v92_v0  ;;  %v61_v5 = vld [vmem:[%s8265_s0 + $0x108] sm:$0xff]  ;;  %v62_v7 = vld [vmem:[%s8265_s0 + $0x110] sm:$0xff] }
   0x3   :  { %v28_v2 = vld [vmem:[%s8265_s0] sm:$0xff]  ;;  %1992 = vmatpush.msra.mxu1 %v1976_v1  ;;  %3931 = vmatpush.msra.mxu3 %v1976_v1  ;;  %v31_v8 = vld [vmem:[%s8265_s0 + $0x18] sm:$0xff]  ;;  %v33_v12 = vld [vmem:[%s8265_s0 + $0x28] sm:$0xff] }
   0x4   :  { %v60_v3 = vld [vmem:[%s8265_s0 + $0x100] sm:$0xff]  ;;  %3674 = vmatmul.msk.f32.vlgmr.msra.gmra.mxu0 %vm93_vm0, %v28_v2  ;;  %3802 = vmatmul.msk.f32.vlgmr.msra.gmra.mxu1 %vm93_vm0, %v28_v2  ;;  %v63_v9 = vld [vmem:[%s8265_s0 + $0x118] sm:$0xff]  ;;  %v65_v13 = vld [vmem:[%s8265_s0 + $0x128] sm:$0xff] }
   0x5   :  { %3706 = vmatmul.msk.f32.vlgmr.msra.gmra.mxu2 %vm93_vm0, %v60_v3  ;;  %3834 = vmatmul.msk.f32.vlgmr.msra.gmra.mxu3 %vm93_vm0, %v60_v3  ;;  %v32_v10 = vld [vmem:[%s8265_s0 + $0x20] sm:$0xff]  ;;  %v34_v14 = vld [vmem:[%s8265_s0 + $0x30] sm:$0xff]  ;;  %v35_v16 = vld [vmem:[%s8265_s0 + $0x38] sm:$0xff] }
   0x6   :  { %v64_v11 = vld [vmem:[%s8265_s0 + $0x120] sm:$0xff]  ;;  %v66_v15 = vld [vmem:[%s8265_s0 + $0x130] sm:$0xff]  ;;  %v67_v17 = vld [vmem:[%s8265_s0 + $0x138] sm:$0xff] }
   0x7   :  { %v36_v18 = vld [vmem:[%s8265_s0 + $0x40] sm:$0xff]  ;;  %v37_v20 = vld [vmem:[%s8265_s0 + $0x48] sm:$0xff]  ;;  %v38_v22 = vld [vmem:[%s8265_s0 + $0x50] sm:$0xff] }
   0x8   :  { %v68_v19 = vld [vmem:[%s8265_s0 + $0x140] sm:$0xff]  ;;  %v69_v21 = vld [vmem:[%s8265_s0 + $0x148] sm:$0xff]  ;;  %v70_v23 = vld [vmem:[%s8265_s0 + $0x150] sm:$0xff] }
   0x9   :  { %v39_v24 = vld [vmem:[%s8265_s0 + $0x58] sm:$0xff]  ;;  %v40_v26 = vld [vmem:[%s8265_s0 + $0x60] sm:$0xff]  ;;  %v41_v28 = vld [vmem:[%s8265_s0 + $0x68] sm:$0xff] }
   0xa   :  { %v71_v25 = vld [vmem:[%s8265_s0 + $0x158] sm:$0xff]  ;;  %v72_v27 = vld [vmem:[%s8265_s0 + $0x160] sm:$0xff]  ;;  %v73_v29 = vld [vmem:[%s8265_s0 + $0x168] sm:$0xff] }
   0xb   :  { %v42_v30 = vld [vmem:[%s8265_s0 + $0x70] sm:$0xff]  ;;  %v43_v32 = vld [vmem:[%s8265_s0 + $0x78] sm:$0xff]  ;;  %v4682_v34 = vld [vmem:[%s8266_s2] ss:$0 sm:$0xff] }
   0xc   :  { %3675 = vmatmul.msk.f32.gmra.mxu0 %vm93_vm0, %v29_v4  ;;  %3803 = vmatmul.msk.f32.gmra.mxu1 %vm93_vm0, %v29_v4  ;;  %v74_v31 = vld [vmem:[%s8265_s0 + $0x170] sm:$0xff]  ;;  %v75_v33 = vld [vmem:[%s8265_s0 + $0x178] sm:$0xff]  ;;  %v4687_v35 = vld [vmem:[%s8268_s5] ss:$0 sm:$0xff] }
   0xd   :  { %3707 = vmatmul.msk.f32.gmra.mxu2 %vm93_vm0, %v61_v5  ;;  %3835 = vmatmul.msk.f32.gmra.mxu3 %vm93_vm0, %v61_v5  ;;  %v4692_v36 = vld [vmem:[%s8267_s3] ss:$0 sm:$0xff]  ;;  %v45_v53 = vld [vmem:[%s8265_s0 + $0x88] sm:$0xff] }
   0xe   :  { %v4697_v38 = vld [vmem:[%s8269_s6] ss:$0 sm:$0xff]  ;;  %v77_v54 = vld [vmem:[%s8265_s0 + $0x188] sm:$0xff] }
   0xf   :  { %v44_v39 = vld [vmem:[%s8265_s0 + $0x80] sm:$0xff] }
  0x10   :  { %v76_v40 = vld [vmem:[%s8265_s0 + $0x180] sm:$0xff] }
  0x14   :  { %3676 = vmatmul.msk.f32.gmra.mxu0 %vm93_vm0, %v30_v6  ;;  %3804 = vmatmul.msk.f32.gmra.mxu1 %vm93_vm0, %v30_v6 }
  0x15   :  { %3708 = vmatmul.msk.f32.gmra.mxu2 %vm93_vm0, %v62_v7  ;;  %3836 = vmatmul.msk.f32.gmra.mxu3 %vm93_vm0, %v62_v7 }
  0x1c   :  { %3677 = vmatmul.msk.f32.gmra.mxu0 %vm93_vm0, %v31_v8  ;;  %3805 = vmatmul.msk.f32.gmra.mxu1 %vm93_vm0, %v31_v8  ;;  %v46_v8 = vld [vmem:[%s8265_s0 + $0x90] sm:$0xff] }
  0x1d   :  { %3709 = vmatmul.msk.f32.gmra.mxu2 %vm93_vm0, %v63_v9  ;;  %3837 = vmatmul.msk.f32.gmra.mxu3 %vm93_vm0, %v63_v9  ;;  %v78_v9 = vld [vmem:[%s8265_s0 + $0x190] sm:$0xff] }
  0x24   :  { %3678 = vmatmul.msk.f32.gmra.mxu0 %vm93_vm0, %v32_v10  ;;  %3806 = vmatmul.msk.f32.gmra.mxu1 %vm93_vm0, %v32_v10 }
  0x25   :  { %3710 = vmatmul.msk.f32.gmra.mxu2 %vm93_vm0, %v64_v11  ;;  %3838 = vmatmul.msk.f32.gmra.mxu3 %vm93_vm0, %v64_v11 }
  0x2c   :  { %3679 = vmatmul.msk.f32.gmra.mxu0 %vm93_vm0, %v33_v12  ;;  %3807 = vmatmul.msk.f32.gmra.mxu1 %vm93_vm0, %v33_v12 }
  0x2d   :  { %3711 = vmatmul.msk.f32.gmra.mxu2 %vm93_vm0, %v65_v13  ;;  %3839 = vmatmul.msk.f32.gmra.mxu3 %vm93_vm0, %v65_v13 }
  0x34   :  { %3680 = vmatmul.msk.f32.gmra.mxu0 %vm93_vm0, %v34_v14  ;;  %3808 = vmatmul.msk.f32.gmra.mxu1 %vm93_vm0, %v34_v14 }
  0x35   :  { %3712 = vmatmul.msk.f32.gmra.mxu2 %vm93_vm0, %v66_v15  ;;  %3840 = vmatmul.msk.f32.gmra.mxu3 %vm93_vm0, %v66_v15 }
  0x3c   :  { %3681 = vmatmul.msk.f32.gmra.mxu0 %vm93_vm0, %v35_v16  ;;  %3809 = vmatmul.msk.f32.gmra.mxu1 %vm93_vm0, %v35_v16 }
  0x3d   :  { %3713 = vmatmul.msk.f32.gmra.mxu2 %vm93_vm0, %v67_v17  ;;  %3841 = vmatmul.msk.f32.gmra.mxu3 %vm93_vm0, %v67_v17 }
  0x44   :  { %3682 = vmatmul.msk.f32.gmra.mxu0 %vm93_vm0, %v36_v18  ;;  %3810 = vmatmul.msk.f32.gmra.mxu1 %vm93_vm0, %v36_v18 }
  0x45   :  { %3714 = vmatmul.msk.f32.gmra.mxu2 %vm93_vm0, %v68_v19  ;;  %3842 = vmatmul.msk.f32.gmra.mxu3 %vm93_vm0, %v68_v19 }
  0x4c   :  { %3683 = vmatmul.msk.f32.gmra.mxu0 %vm93_vm0, %v37_v20  ;;  %3811 = vmatmul.msk.f32.gmra.mxu1 %vm93_vm0, %v37_v20 }
  0x4d   :  { %3715 = vmatmul.msk.f32.gmra.mxu2 %vm93_vm0, %v69_v21  ;;  %3843 = vmatmul.msk.f32.gmra.mxu3 %vm93_vm0, %v69_v21 }
  0x54   :  { %3684 = vmatmul.msk.f32.gmra.mxu0 %vm93_vm0, %v38_v22  ;;  %3812 = vmatmul.msk.f32.gmra.mxu1 %vm93_vm0, %v38_v22 }
  0x55   :  { %3716 = vmatmul.msk.f32.gmra.mxu2 %vm93_vm0, %v70_v23  ;;  %3844 = vmatmul.msk.f32.gmra.mxu3 %vm93_vm0, %v70_v23 }
  0x5c   :  { %3685 = vmatmul.msk.f32.gmra.mxu0 %vm93_vm0, %v39_v24  ;;  %3813 = vmatmul.msk.f32.gmra.mxu1 %vm93_vm0, %v39_v24 }
  0x5d   :  { %3717 = vmatmul.msk.f32.gmra.mxu2 %vm93_vm0, %v71_v25  ;;  %3845 = vmatmul.msk.f32.gmra.mxu3 %vm93_vm0, %v71_v25 }
  0x64   :  { %3686 = vmatmul.msk.f32.gmra.mxu0 %vm93_vm0, %v40_v26  ;;  %3814 = vmatmul.msk.f32.gmra.mxu1 %vm93_vm0, %v40_v26 }
  0x65   :  { %3718 = vmatmul.msk.f32.gmra.mxu2 %vm93_vm0, %v72_v27  ;;  %3846 = vmatmul.msk.f32.gmra.mxu3 %vm93_vm0, %v72_v27 }
  0x6c   :  { %3687 = vmatmul.msk.f32.gmra.mxu0 %vm93_vm0, %v41_v28  ;;  %3815 = vmatmul.msk.f32.gmra.mxu1 %vm93_vm0, %v41_v28 }
  0x6d   :  { %3719 = vmatmul.msk.f32.gmra.mxu2 %vm93_vm0, %v73_v29  ;;  %3847 = vmatmul.msk.f32.gmra.mxu3 %vm93_vm0, %v73_v29 }
  0x74   :  { %3688 = vmatmul.msk.f32.gmra.mxu0 %vm93_vm0, %v42_v30  ;;  %3816 = vmatmul.msk.f32.gmra.mxu1 %vm93_vm0, %v42_v30 }
  0x75   :  { %3720 = vmatmul.msk.f32.gmra.mxu2 %vm93_vm0, %v74_v31  ;;  %3848 = vmatmul.msk.f32.gmra.mxu3 %vm93_vm0, %v74_v31 }
  0x7c   :  { %3689 = vmatmul.msk.f32.gmra.mxu0 %vm93_vm0, %v43_v32  ;;  %3817 = vmatmul.msk.f32.gmra.mxu1 %vm93_vm0, %v43_v32 }
  0x7d   :  { %3721 = vmatmul.msk.f32.gmra.mxu2 %vm93_vm0, %v75_v33  ;;  %3849 = vmatmul.msk.f32.gmra.mxu3 %vm93_vm0, %v75_v33 }
  0x81   :  { %v303_v37 = vpop.f32.mrf.mxu0  ;;  %v1994_v42 = vpop.f32.mrf.mxu1 }
  0x82   :  { %v499_v41 = vmul.f32 %v4682_v34, %v303_v37  ;;  %v2190_v43 = vmul.f32 %v4687_v35, %v1994_v42 }
  0x84   :  { %v4708_v44 = vadd.f32 %v4692_v36, %v499_v41  ;;  %3690 = vmatmul.msk.f32.gmra.mxu0 %vm93_vm0, %v44_v39  ;;  %v4713_v45 = vadd.f32 %v4697_v38, %v2190_v43  ;;  %3818 = vmatmul.msk.f32.gmra.mxu1 %vm93_vm0, %v44_v39  ;;  %v47_v43 = vld [vmem:[%s8265_s0 + $0x98] sm:$0xff] }
  0x85   :  { %3722 = vmatmul.msk.f32.gmra.mxu2 %vm93_vm0, %v76_v40  ;;  %3850 = vmatmul.msk.f32.gmra.mxu3 %vm93_vm0, %v76_v40 }
  0x86   :  { %v3738_v46 = vmul.f32 -1.442695, %v4708_v44  ;;  %v3866_v47 = vmul.f32 -1.442695, %v4713_v45 }
  0x88   :  { %v399_v48 = vpop.f32.mrf.mxu2  ;;  %3936 = vpow2.f32 %v3738_v46  ;;  %v2090_v50 = vpop.f32.mrf.mxu3  ;;  %v79_v46 = vld [vmem:[%s8265_s0 + $0x198] sm:$0xff] }
  0x89   :  { %v531_v49 = vmul.f32 %v4682_v34, %v399_v48  ;;  %3938 = vpow2.f32 %v3866_v47  ;;  %v2222_v51 = vmul.f32 %v4687_v35, %v2090_v50  ;;  %v306_v52 = vpop.f32.mrf.mxu0  ;;  %v1997_v57 = vpop.f32.mrf.mxu1 }
  0x8a   :  { %v500_v56 = vmul.f32 %v4682_v34, %v306_v52  ;;  %v2191_v59 = vmul.f32 %v4687_v35, %v1997_v57 }
  0x8b   :  { %v4728_v55 = vadd.f32 %v4692_v36, %v531_v49  ;;  %v4732_v58 = vadd.f32 %v4697_v38, %v2222_v51 }
  0x8c   :  { %v4737_v61 = vadd.f32 %v4692_v36, %v500_v56  ;;  %3691 = vmatmul.msk.f32.gmra.mxu0 %vm93_vm0, %v45_v53  ;;  %v4743_v63 = vadd.f32 %v4697_v38, %v2191_v59  ;;  %3819 = vmatmul.msk.f32.gmra.mxu1 %vm93_vm0, %v45_v53 }
  0x8d   :  { %v3770_v60 = vmul.f32 -1.442695, %v4728_v55  ;;  %3723 = vmatmul.msk.f32.gmra.mxu2 %vm93_vm0, %v77_v54  ;;  %v3898_v62 = vmul.f32 -1.442695, %v4732_v58  ;;  %3851 = vmatmul.msk.f32.gmra.mxu3 %vm93_vm0, %v77_v54 }
  0x8e   :  { %v3937_v0 = vpop.eup %3936  ;;  %v3739_v1 = vmul.f32 -1.442695, %v4737_v61  ;;  %v3867_v4 = vmul.f32 -1.442695, %v4743_v63 }
  0x8f   :  { %3940 = vpow2.f32 %v3770_v60  ;;  %v3939_v2 = vpop.eup %3938  ;;  %v4748_v3 = vadd.f32 1.0, %v3937_v0 }
  0x90   :  { %3942 = vpow2.f32 %v3898_v62  ;;  %v402_v5 = vpop.f32.mrf.mxu2  ;;  %v4751_v6 = vadd.f32 1.0, %v3939_v2  ;;  %v2093_v10 = vpop.f32.mrf.mxu3 }
  0x91   :  { %3944 = vpow2.f32 %v3739_v1  ;;  %v532_v7 = vmul.f32 %v4682_v34, %v402_v5  ;;  %v309_v11 = vpop.f32.mrf.mxu0  ;;  %v898_v12 = vand.u32 2147483648, %v4748_v3  ;;  %v896_v15 = vand.u32 2147483647, %v4748_v3  ;;  %v2000_v22 = vpop.f32.mrf.mxu1 }
  0x92   :  { %3946 = vrcp.f32 %v4748_v3  ;;  %v2589_v16 = vand.u32 2147483648, %v4751_v6  ;;  %v2587_v18 = vand.u32 2147483647, %v4751_v6  ;;  %v2223_v20 = vmul.f32 %v4687_v35, %v2093_v10 }
  0x93   :  { %3948 = vrcp.f32 %v4751_v6  ;;  %v4764_v13 = vadd.f32 %v4692_v36, %v532_v7  ;;  %v501_v21 = vmul.f32 %v4682_v34, %v309_v11  ;;  %vm892_vm1 = vweird.f32 %v4748_v3 }
  0x94   :  { %3950 = vpow2.f32 %v3867_v4  ;;  %3692 = vmatmul.msk.f32.gmra.mxu0 %vm93_vm0, %v46_v8  ;;  %3820 = vmatmul.msk.f32.gmra.mxu1 %vm93_vm0, %v46_v8  ;;  %v899_v26 = vor.u32 1.1754944e-38, %v898_v12  ;;  %vm2583_vm2 = vweird.f32 %v4751_v6  ;;  %vm4786_vm3 = vcmp.eq.f32.partialorder %v896_v15, 8.507059e+37 }
  0x95   :  { %v3941_v14 = vpop.eup %3940  ;;  %3724 = vmatmul.msk.f32.gmra.mxu2 %vm93_vm0, %v78_v9  ;;  %3852 = vmatmul.msk.f32.gmra.mxu3 %vm93_vm0, %v78_v9  ;;  %v3771_v27 = vmul.f32 -1.442695, %v4764_v13  ;;  %v2590_v31 = vor.u32 1.1754944e-38, %v2589_v16  ;;  %v4792_v32 = vmul.f32 %v4687_v35, %v2000_v22  ;;  %vm4796_vm5 = vcmp.eq.f32.partialorder %v2587_v18, 8.507059e+37 }
  0x96   :  { %v3943_v17 = vpop.eup %3942  ;;  %v4771_v19 = vadd.f32 1.0, %v3941_v14  ;;  %v4802_v41 = vadd.f32 %v4697_v38, %v2223_v20  ;;  %v4805_v42 = vadd.f32 %v4692_v36, %v501_v21 }
  0x97   :  { %v3945_v23 = vpop.eup %3944  ;;  %v4778_v24 = vadd.f32 1.0, %v3943_v17 }
  0x98   :  { %v3947_v25 = vpop.eup %3946  ;;  %3952 = vrcp.f32 %v4771_v19  ;;  %v1378_v40 = vand.u32 2147483648, %v4771_v19  ;;  %v1376_v48 = vand.u32 2147483647, %v4771_v19  ;;  %v4815_v50 = vadd.f32 1.0, %v3945_v23 }
  0x99   :  { %v4783_v28 = vpop.eup %3948  ;;  %v888_v29 = vmul.f32 %v3947_v25, %v4748_v3  ;;  %3954 = vrcp.f32 %v4778_v24  ;;  %v3067_v49 = vand.u32 2147483647, %v4778_v24  ;;  %v3069_v52 = vand.u32 2147483648, %v4778_v24 }
  0x9a   :  { %v3951_v33 = vpop.eup %3950  ;;  %v2579_v37 = vmul.f32 %v4783_v28, %v4751_v6  ;;  %3956 = vpow2.f32 %v3771_v27  ;;  %vm893_vm6 = vweird.f32 %v3947_v25  ;;  %vm1372_vm7 = vweird.f32 %v4771_v19 }
  0x9b   :  { %v889_v47 = vsub.f32 1.0, %v888_v29  ;;  %v4818_v53 = vadd.f32 1.0, %v3951_v33  ;;  %3958 = vrcp.f32 %v4815_v50  ;;  %vm2584_vm8 = vweird.f32 %v4783_v28  ;;  %vm894_vm11 = vmor %vm892_vm1, %vm893_vm6 }
  0x9c   :  { %v2580_v51 = vsub.f32 1.0, %v2579_v37  ;;  %3693 = vmatmul.msk.f32.gmra.mxu0 %vm93_vm0, %v47_v43  ;;  %v1379_v59 = vor.u32 1.1754944e-38, %v1378_v40  ;;  %vm3063_vm9 = vweird.f32 %v4778_v24  ;;  %3821 = vmatmul.msk.f32.gmra.mxu1 %vm93_vm0, %v47_v43  ;;  %vm4830_vm10 = vcmp.eq.f32.partialorder %v1376_v48, 8.507059e+37  ;;  %vm2585_vm13 = vmor %vm2583_vm2, %vm2584_vm8 }
  0x9d   :  { %v890_v54 = vmul.f32 %v3947_v25, %v889_v47  ;;  %3725 = vmatmul.msk.f32.gmra.mxu2 %vm93_vm0, %v79_v46  ;;  %3853 = vmatmul.msk.f32.gmra.mxu3 %vm93_vm0, %v79_v46  ;;  %3960 = vrcp.f32 %v4818_v53  ;;  %v3899_v2 = vmul.f32 -1.442695, %v4802_v41  ;;  %vm4841_vm12 = vcmp.eq.f32.partialorder %v3067_v49, 8.507059e+37  ;;  %v405_v46 = vpop.f32.mrf.mxu2  ;;  %v2096_v49 = vpop.f32.mrf.mxu3 }
  0x9e   :  { %v3953_v56 = vpop.eup %3952  ;;  %v2581_v57 = vmul.f32 %v4783_v28, %v2580_v51  ;;  %v3070_v8 = vor.u32 1.1754944e-38, %v3069_v52  ;;  %v911_v9 = vand.u32 2147483647, %v4815_v50  ;;  %vm907_vm14 = vweird.f32 %v4815_v50  ;;  %v312_v51 = vpop.f32.mrf.mxu0 }
  0x9f   :  { %v3955_v60 = vpop.eup %3954  ;;  %v891_v62 = vadd.f32 %v3947_v25, %v890_v54  ;;  %v1368_v0 = vmul.f32 %v3953_v56, %v4771_v19  ;;  %v913_v3 = vand.u32 2147483648, %v4815_v50  ;;  %vm1373_vm15 = vweird.f32 %v3953_v56 }
  0xa0   :  { %v2582_v4 = vadd.f32 %v4783_v28, %v2581_v57  ;;  %v3059_v5 = vmul.f32 %v3955_v60, %v4778_v24  ;;  %v3957_v12 = vpop.eup %3956  ;;  %vm3064_vm1 = vweird.f32 %v3955_v60  ;;  %vm4860_vm2 = vcmp.eq.f32.partialorder %v911_v9, 8.507059e+37 }
  0xa1   :  { %v895_v10 = vsel %vm894_vm11, %v3947_v25, %v891_v62  ;;  %v1369_v11 = vsub.f32 1.0, %v1368_v0  ;;  %v3959_v17 = vpop.eup %3958  ;;  %v914_v27 = vor.u32 1.1754944e-38, %v913_v3  ;;  %v4869_v29 = vadd.f32 1.0, %v3957_v12  ;;  %vm3065_vm6 = vmor %vm3063_vm9, %vm3064_vm1 }
  0xa2   :  { %v900_v14 = vsel %vm4786_vm3, %v899_v26, %v895_v10  ;;  %v2586_v15 = vsel %vm2585_vm13, %v4783_v28, %v2582_v4  ;;  %v3060_v16 = vsub.f32 1.0, %v3059_v5  ;;  %v903_v23 = vmul.f32 %v3959_v17, %v4815_v50  ;;  %vm1374_vm3 = vmor %vm1372_vm7, %vm1373_vm15  ;;  %v2003_v5 = vpop.f32.mrf.mxu1 }
  0xa3   :  { %v1847_v18 = vmul.f32 %v900_v14, %v4708_v44  ;;  %v2591_v6 = vsel %vm4796_vm5, %v2590_v31, %v2586_v15  ;;  %v1370_v20 = vmul.f32 %v3953_v56, %v1369_v11  ;;  %v3961_v26 = vpop.eup %3960  ;;  %v2602_v28 = vand.u32 2147483647, %v4818_v53 }
  0xa4   :  { %v3538_v21 = vmul.f32 %v2591_v6, %v4713_v45  ;;  %v3061_v22 = vmul.f32 %v3955_v60, %v3060_v16  ;;  %v904_v30 = vsub.f32 1.0, %v903_v23  ;;  %v2594_v31 = vmul.f32 %v3961_v26, %v4818_v53 }
  0xa5   :  { %1912 = vst.msk [vmem:[%s8270_s7] sm:$0xff] %vm1911_vm4, %v1847_v18  ;;  %v1371_v44 = vadd.f32 %v3953_v56, %v1370_v20  ;;  %vm2598_vm5 = vweird.f32 %v4818_v53  ;;  %vm908_vm8 = vweird.f32 %v3959_v17  ;;  %v2604_v37 = vand.u32 2147483648, %v4818_v53  ;;  %v80_v18 = vld [vmem:[%s8265_s0 + $0x1a0] sm:$0xff]  ;;  %v408_v25 = vpop.f32.mrf.mxu2 }
  0xa6   :  { %3602 = vst.msk [vmem:[%s8271_s8] sm:$0xff] %vm1911_vm4, %v3538_v21  ;;  %v3062_v45 = vadd.f32 %v3955_v60, %v3061_v22  ;;  %3962 = vrcp.f32 %v4869_v29  ;;  %v905_v40 = vmul.f32 %v3959_v17, %v904_v30  ;;  %v2595_v43 = vsub.f32 1.0, %v2594_v31  ;;  %vm909_vm9 = vmor %vm907_vm14, %vm908_vm8  ;;  %3726 = vmatmul.msk.f32.gmra.mxu2 %vm93_vm0, %v80_v18  ;;  %3854 = vmatmul.msk.f32.gmra.mxu3 %vm93_vm0, %v80_v18 }
  0xa7   :  { %v1375_v33 = vsel %vm1374_vm3, %v3953_v56, %v1371_v44  ;;  %vm2599_vm7 = vweird.f32 %v3961_v26  ;;  %vm4890_vm11 = vcmp.eq.f32.partialorder %v2602_v28, 8.507059e+37  ;;  %3964 = vpow2.f32 %v3899_v2 }
  0xa8   :  { %v1380_v19 = vsel %vm4830_vm10, %v1379_v59, %v1375_v33  ;;  %v3066_v39 = vsel %vm3065_vm6, %v3955_v60, %v3062_v45  ;;  %v906_v54 = vadd.f32 %v3959_v17, %v905_v40  ;;  %v2596_v56 = vmul.f32 %v3961_v26, %v2595_v43  ;;  %vm2600_vm10 = vmor %vm2598_vm5, %vm2599_vm7  ;;  %v2099_v33 = vpop.f32.mrf.mxu3 }
  0xa9   :  { %v1879_v47 = vmul.f32 %v1380_v19, %v4728_v55  ;;  %v3071_v48 = vsel %vm4841_vm12, %v3070_v8, %v3066_v39  ;;  %v2605_v55 = vor.u32 1.1754944e-38, %v2604_v37  ;;  %v3740_v57 = vmul.f32 -1.442695, %v4805_v42 }
  0xaa   :  { %v3570_v52 = vmul.f32 %v3071_v48, %v4732_v58  ;;  %v4905_v59 = vadd.f32 %v4697_v38, %v4792_v32  ;;  %v533_v58 = vmul.f32 %v4682_v34, %v405_v46  ;;  %v910_v60 = vsel %vm909_vm9, %v3959_v17, %v906_v54  ;;  %v48_v17 = vld [vmem:[%s8265_s0 + $0xa0] sm:$0xff] }
  0xab   :  { %1944 = vst.msk [vmem:[%s8270_s7 + $0x100] sm:$0xff] %vm1911_vm4, %v1879_v47  ;;  %v2597_v62 = vadd.f32 %v3961_v26, %v2596_v56  ;;  %v2224_v0 = vmul.f32 %v4687_v35, %v2096_v49  ;;  %v502_v50 = vmul.f32 %v4682_v34, %v312_v51  ;;  %v915_v2 = vsel %vm4860_vm2, %v914_v27, %v910_v60 }
  0xac   :  { %3634 = vst.msk [vmem:[%s8271_s8 + $0x100] sm:$0xff] %vm1911_vm4, %v3570_v52  ;;  %v3963_v1 = vpop.eup %3962  ;;  %3966 = vpow2.f32 %v3740_v57  ;;  %v3868_v32 = vmul.f32 -1.442695, %v4905_v59  ;;  %v4921_v4 = vadd.f32 %v4692_v36, %v533_v58  ;;  %v1848_v7 = vmul.f32 %v915_v2, %v4737_v61  ;;  %3694 = vmatmul.msk.f32.gmra.mxu0 %vm93_vm0, %v48_v17  ;;  %3822 = vmatmul.msk.f32.gmra.mxu1 %vm93_vm0, %v48_v17 }
  0xad   :  { %v2601_v8 = vsel %vm2600_vm10, %v3961_v26, %v2597_v62  ;;  %v1383_v9 = vmul.f32 %v3963_v1, %v4869_v29  ;;  %v1391_v10 = vand.u32 2147483647, %v4869_v29  ;;  %v4930_v3 = vadd.f32 %v4697_v38, %v2224_v0  ;;  %v3965_v12 = vpop.eup %3964 }
  0xae   :  { %v2606_v11 = vsel %vm4890_vm11, %v2605_v55, %v2601_v8  ;;  %3968 = vpow2.f32 %v3868_v32  ;;  %v3772_v53 = vmul.f32 -1.442695, %v4921_v4  ;;  %1913 = vst.msk [vmem:[%s8270_s7 + $0x8] sm:$0xff] %vm1911_vm4, %v1848_v7  ;;  %v4938_v15 = vadd.f32 %v4692_v36, %v502_v50 }
  0xaf   :  { %v3539_v61 = vmul.f32 %v2606_v11, %v4743_v63  ;;  %v1384_v14 = vsub.f32 1.0, %v1383_v9  ;;  %v2193_v16 = vmul.f32 %v4687_v35, %v2003_v5  ;;  %v1393_v6 = vand.u32 2147483648, %v4869_v29 }
  0xb0   :  { %v4948_v20 = vadd.f32 1.0, %v3965_v12  ;;  %3970 = vpow2.f32 %v3772_v53  ;;  %v3900_v63 = vmul.f32 -1.442695, %v4930_v3  ;;  %vm1388_vm12 = vweird.f32 %v3963_v1 }
  0xb1   :  { %3603 = vst.msk [vmem:[%s8271_s8 + $0x8] sm:$0xff] %vm1911_vm4, %v3539_v61  ;;  %v1385_v21 = vmul.f32 %v3963_v1, %v1384_v14  ;;  %v3741_v22 = vmul.f32 -1.442695, %v4938_v15  ;;  %v4959_v23 = vadd.f32 %v4697_v38, %v2193_v16  ;;  %vm1387_vm13 = vweird.f32 %v4869_v29 }
  0xb2   :  { %v3967_v26 = vpop.eup %3966  ;;  %3972 = vrcp.f32 %v4948_v20  ;;  %vm1389_vm14 = vmor %vm1387_vm13, %vm1388_vm12  ;;  %v1394_v30 = vor.u32 1.1754944e-38, %v1393_v6  ;;  %v534_v31 = vmul.f32 %v4682_v34, %v408_v25  ;;  %vm1392_vm15 = vcmp.eq.f32.partialorder %v1391_v10, 8.507059e+37 }
  0xb3   :  { %v1386_v44 = vadd.f32 %v3963_v1, %v1385_v21  ;;  %v4965_v27 = vadd.f32 1.0, %v3967_v26  ;;  %3974 = vpow2.f32 %v3900_v63  ;;  %v3869_v28 = vmul.f32 -1.442695, %v4959_v23  ;;  %v5032_v63 = vpop.f32.mrf.mxu0 }
  0xb4   :  { %v3969_v45 = vpop.eup %3968  ;;  %3976 = vpow2.f32 %v3741_v22  ;;  %v3082_v29 = vand.u32 2147483647, %v4948_v20  ;;  %v3084_v40 = vand.u32 2147483648, %v4948_v20  ;;  %v4978_v48 = vmul.f32 %v4687_v35, %v2099_v33 }
  0xb5   :  { %v1390_v37 = vsel %vm1389_vm14, %v3963_v1, %v1386_v44  ;;  %3978 = vrcp.f32 %v4965_v27  ;;  %v4972_v43 = vadd.f32 1.0, %v3969_v45  ;;  %v926_v49 = vand.u32 2147483647, %v4965_v27 }
  0xb6   :  { %v3971_v19 = vpop.eup %3970  ;;  %v1395_v39 = vsel %vm1392_vm15, %v1394_v30, %v1390_v37  ;;  %3980 = vpow2.f32 %v3869_v28  ;;  %v928_v51 = vand.u32 2147483648, %v4965_v27  ;;  %v4984_v52 = vadd.f32 %v4692_v36, %v534_v31  ;;  %v49_v30 = vld [vmem:[%s8265_s0 + $0xa8] sm:$0xff] }
  0xb7   :  { %v1880_v46 = vmul.f32 %v1395_v39, %v4764_v13  ;;  %v4975_v47 = vadd.f32 1.0, %v3971_v19  ;;  %3982 = vrcp.f32 %v4972_v43  ;;  %vm3078_vm1 = vweird.f32 %v4948_v20  ;;  %v81_v31 = vld [vmem:[%s8265_s0 + $0x1a8] sm:$0xff]  ;;  %3695 = vmatmul.msk.f32.gmra.mxu0 %vm93_vm0, %v49_v30  ;;  %3823 = vmatmul.msk.f32.gmra.mxu1 %vm93_vm0, %v49_v30 }
  0xb8   :  { %v3973_v24 = vpop.eup %3972  ;;  %vm4992_vm2 = vcmp.eq.f32.partialorder %v3082_v29, 8.507059e+37  ;;  %v3085_v57 = vor.u32 1.1754944e-38, %v3084_v40  ;;  %vm922_vm3 = vweird.f32 %v4965_v27  ;;  %v2617_v58 = vand.u32 2147483647, %v4972_v43  ;;  %3727 = vmatmul.msk.f32.gmra.mxu2 %vm93_vm0, %v81_v31  ;;  %3855 = vmatmul.msk.f32.gmra.mxu3 %vm93_vm0, %v81_v31 }
  0xb9   :  { %v3975_v54 = vpop.eup %3974  ;;  %1945 = vst.msk [vmem:[%s8270_s7 + $0x108] sm:$0xff] %vm1911_vm4, %v1880_v46  ;;  %v3074_v13 = vmul.f32 %v3973_v24, %v4948_v20  ;;  %3984 = vrcp.f32 %v4975_v47  ;;  %v2619_v60 = vand.u32 2147483648, %v4972_v43  ;;  %v1408_v50 = vand.u32 2147483648, %v4975_v47 }
  0xba   :  { %v3977_v55 = vpop.eup %3976  ;;  %v5003_v1 = vadd.f32 1.0, %v3975_v54  ;;  %vm5009_vm5 = vcmp.eq.f32.partialorder %v926_v49, 8.507059e+37  ;;  %v929_v7 = vor.u32 1.1754944e-38, %v928_v51  ;;  %v1406_v8 = vand.u32 2147483647, %v4975_v47 }
  0xbb   :  { %v5000_v62 = vpop.eup %3978  ;;  %v3075_v0 = vsub.f32 1.0, %v3074_v13  ;;  %v5005_v2 = vadd.f32 1.0, %v3977_v55  ;;  %v5015_v9 = vmul.f32 -1.442695, %v4984_v52  ;;  %vm3079_vm6 = vweird.f32 %v3973_v24 }
  0xbc   :  { %v918_v32 = vmul.f32 %v5000_v62, %v4965_v27  ;;  %v3981_v10 = vpop.eup %3980  ;;  %vm2613_vm8 = vweird.f32 %v4972_v43  ;;  %3986 = vrcp.f32 %v5003_v1  ;;  %v2620_v61 = vor.u32 1.1754944e-38, %v2619_v60  ;;  %vm3080_vm10 = vmor %vm3078_vm1, %vm3079_vm6  ;;  %v2006_v60 = vpop.f32.mrf.mxu1 }
  0xbd   :  { %v3076_v11 = vmul.f32 %v3973_v24, %v3075_v0  ;;  %v5019_v53 = vpop.eup %3982  ;;  %vm1402_vm7 = vweird.f32 %v4975_v47  ;;  %3988 = vrcp.f32 %v5005_v2  ;;  %vm923_vm11 = vweird.f32 %v5000_v62 }
  0xbe   :  { %v919_v12 = vsub.f32 1.0, %v918_v32  ;;  %v2609_v17 = vmul.f32 %v5019_v53, %v4972_v43  ;;  %vm5028_vm9 = vcmp.eq.f32.partialorder %v2617_v58, 8.507059e+37  ;;  %v1409_v6 = vor.u32 1.1754944e-38, %v1408_v50  ;;  %vm924_vm1 = vmor %vm922_vm3, %vm923_vm11 }
  0xbf   :  { %v5023_v14 = vpop.eup %3984  ;;  %v3077_v16 = vadd.f32 %v3973_v24, %v3076_v11  ;;  %vm5040_vm12 = vcmp.eq.f32.partialorder %v1406_v8, 8.507059e+37  ;;  %v3097_v26 = vand.u32 2147483647, %v5003_v1  ;;  %v3099_v44 = vand.u32 2147483648, %v5003_v1 }
  0xc0   :  { %v920_v21 = vmul.f32 %v5000_v62, %v919_v12  ;;  %v1398_v22 = vmul.f32 %v5023_v14, %v4975_v47  ;;  %v2610_v45 = vsub.f32 1.0, %v2609_v17  ;;  %vm2614_vm13 = vweird.f32 %v5019_v53  ;;  %v318_v17 = vpop.f32.mrf.mxu0 }
  0xc1   :  { %v3081_v28 = vsel %vm3080_vm10, %v3973_v24, %v3077_v16  ;;  %vm937_vm14 = vweird.f32 %v5005_v2  ;;  %v941_v20 = vand.u32 2147483647, %v5005_v2  ;;  %vm3093_vm15 = vweird.f32 %v5003_v1  ;;  %vm2615_vm11 = vmor %vm2613_vm8, %vm2614_vm13  ;;  %v2102_v16 = vpop.f32.mrf.mxu3 }
  0xc2   :  { %v3086_v33 = vsel %vm4992_vm2, %v3085_v57, %v3081_v28  ;;  %v921_v37 = vadd.f32 %v5000_v62, %v920_v21  ;;  %v1399_v29 = vsub.f32 1.0, %v1398_v22  ;;  %v5059_v19 = vadd.f32 1.0, %v3981_v10  ;;  %v3987_v39 = vpop.eup %3986  ;;  %v411_v10 = vpop.f32.mrf.mxu2 }
  0xc3   :  { %v3571_v40 = vmul.f32 %v3086_v33, %v4802_v41  ;;  %v2611_v46 = vmul.f32 %v5019_v53, %v2610_v45  ;;  %vm1403_vm2 = vweird.f32 %v5023_v14  ;;  %v943_v24 = vand.u32 2147483648, %v5005_v2  ;;  %v3989_v49 = vpop.eup %3988 }
  0xc4   :  { %v925_v51 = vsel %vm924_vm1, %v5000_v62, %v921_v37  ;;  %v1400_v41 = vmul.f32 %v5023_v14, %v1399_v29  ;;  %v3089_v54 = vmul.f32 %v3987_v39, %v5003_v1  ;;  %vm5076_vm6 = vcmp.eq.f32.partialorder %v3097_v26, 8.507059e+37  ;;  %v2009_v29 = vpop.f32.mrf.mxu1 }
  0xc5   :  { %v3100_v13 = vor.u32 1.1754944e-38, %v3099_v44  ;;  %3635 = vst.msk [vmem:[%s8271_s8 + $0x108] sm:$0xff] %vm1911_vm4, %v3571_v40  ;;  %v930_v56 = vsel %vm5009_vm5, %v929_v7, %v925_v51  ;;  %v2612_v55 = vadd.f32 %v5019_v53, %v2611_v46  ;;  %v933_v57 = vmul.f32 %v3989_v49, %v5005_v2  ;;  %vm1404_vm5 = vmor %vm1402_vm7, %vm1403_vm2 }
  0xc6   :  { %vm5088_vm3 = vcmp.eq.f32.partialorder %v941_v20, 8.507059e+37  ;;  %v1849_v62 = vmul.f32 %v930_v56, %v4805_v42  ;;  %v1401_v0 = vadd.f32 %v5023_v14, %v1400_v41  ;;  %v3090_v50 = vsub.f32 1.0, %v3089_v54 }
  0xc7   :  { %3990 = vrcp.f32 %v5059_v19  ;;  %v2616_v32 = vsel %vm2615_vm11, %v5019_v53, %v2612_v55  ;;  %vm3094_vm10 = vweird.f32 %v3987_v39  ;;  %v934_v5 = vsub.f32 1.0, %v933_v57 }
  0xc8   :  { %v944_v42 = vor.u32 1.1754944e-38, %v943_v24  ;;  %1914 = vst.msk [vmem:[%s8270_s7 + $0x10] sm:$0xff] %vm1911_vm4, %v1849_v62  ;;  %v2621_v43 = vsel %vm5028_vm9, %v2620_v61, %v2616_v32  ;;  %v1405_v7 = vsel %vm1404_vm5, %v5023_v14, %v1401_v0  ;;  %v3091_v8 = vmul.f32 %v3987_v39, %v3090_v50  ;;  %vm3095_vm9 = vmor %vm3093_vm15, %vm3094_vm10  ;;  %v82_v32 = vld [vmem:[%s8265_s0 + $0x1b0] sm:$0xff] }
  0xc9   :  { %vm938_vm8 = vweird.f32 %v3989_v49  ;;  %v3540_v11 = vmul.f32 %v2621_v43, %v4905_v59  ;;  %v1410_v47 = vsel %vm5040_vm12, %v1409_v6, %v1405_v7  ;;  %v935_v53 = vmul.f32 %v3989_v49, %v934_v5  ;;  %v2105_v58 = vpop.f32.mrf.mxu3  ;;  %3728 = vmatmul.msk.f32.gmra.mxu2 %vm93_vm0, %v82_v32  ;;  %3856 = vmatmul.msk.f32.gmra.mxu3 %vm93_vm0, %v82_v32 }
  0xca   :  { %vm2628_vm7 = vweird.f32 %v5059_v19  ;;  %v2632_v12 = vand.u32 2147483647, %v5059_v19  ;;  %v1881_v18 = vmul.f32 %v1410_v47, %v4921_v4  ;;  %v3092_v61 = vadd.f32 %v3987_v39, %v3091_v8  ;;  %vm939_vm12 = vmor %vm937_vm14, %vm938_vm8 }
  0xcb   :  { %v2634_v14 = vand.u32 2147483648, %v5059_v19  ;;  %3992 = vpow2.f32 %v5015_v9  ;;  %3604 = vst.msk [vmem:[%s8271_s8 + $0x10] sm:$0xff] %vm1911_vm4, %v3540_v11  ;;  %v936_v59 = vadd.f32 %v3989_v49, %v935_v53  ;;  %v5128_v6 = vadd.f32 %v4697_v38, %v4978_v48 }
  0xcc   :  { %v503_v4 = vmul.f32 %v4682_v34, %v5032_v63  ;;  %v2194_v21 = vmul.f32 %v4687_v35, %v2006_v60  ;;  %1946 = vst.msk [vmem:[%s8270_s7 + $0x110] sm:$0xff] %vm1911_vm4, %v1881_v18  ;;  %v3096_v22 = vsel %vm3095_vm9, %v3987_v39, %v3092_v61  ;;  %v535_v1 = vmul.f32 %v4682_v34, %v411_v10  ;;  %v2012_v18 = vpop.f32.mrf.mxu1 }
  0xcd   :  { %v3991_v9 = vpop.eup %3990  ;;  %v2226_v48 = vmul.f32 %v4687_v35, %v2102_v16  ;;  %v504_v25 = vmul.f32 %v4682_v34, %v318_v17  ;;  %v3101_v63 = vsel %vm5076_vm6, %v3100_v13, %v3096_v22  ;;  %v940_v26 = vsel %vm939_vm12, %v3989_v49, %v936_v59  ;;  %v414_v13 = vpop.f32.mrf.mxu2 }
  0xce   :  { %v2624_v44 = vmul.f32 %v3991_v9, %v5059_v19  ;;  %vm2629_vm13 = vweird.f32 %v3991_v9  ;;  %v3572_v28 = vmul.f32 %v3101_v63, %v4930_v3  ;;  %v945_v45 = vsel %vm5088_vm3, %v944_v42, %v940_v26  ;;  %v50_v19 = vld [vmem:[%s8265_s0 + $0xb0] sm:$0xff]  ;;  %v321_v17 = vpop.f32.mrf.mxu0 }
  0xcf   :  { %v3901_v2 = vmul.f32 -1.442695, %v5128_v6  ;;  %v5151_v20 = vadd.f32 %v4692_v36, %v503_v4  ;;  %v1850_v30 = vmul.f32 %v945_v45, %v4938_v15  ;;  %v5155_v33 = vadd.f32 %v4697_v38, %v2194_v21  ;;  %vm2630_vm14 = vmor %vm2628_vm7, %vm2629_vm13  ;;  %3696 = vmatmul.msk.f32.gmra.mxu0 %vm93_vm0, %v50_v19  ;;  %3824 = vmatmul.msk.f32.gmra.mxu1 %vm93_vm0, %v50_v19 }
  0xd0   :  { %v2625_v31 = vsub.f32 1.0, %v2624_v44  ;;  %v5158_v37 = vadd.f32 %v4692_v36, %v535_v1  ;;  %3636 = vst.msk [vmem:[%s8271_s8 + $0x110] sm:$0xff] %vm1911_vm4, %v3572_v28  ;;  %v5166_v40 = vadd.f32 %v4697_v38, %v2226_v48  ;;  %v5169_v15 = vadd.f32 %v4692_v36, %v504_v25 }
  0xd1   :  { %v3993_v39 = vpop.eup %3992  ;;  %3994 = vpow2.f32 %v3901_v2  ;;  %v3742_v3 = vmul.f32 -1.442695, %v5151_v20  ;;  %1915 = vst.msk [vmem:[%s8270_s7 + $0x18] sm:$0xff] %vm1911_vm4, %v1850_v30  ;;  %v3870_v49 = vmul.f32 -1.442695, %v5155_v33  ;;  %v2195_v54 = vmul.f32 %v4687_v35, %v2009_v29 }
  0xd2   :  { %v2626_v46 = vmul.f32 %v3991_v9, %v2625_v31  ;;  %v5175_v24 = vadd.f32 1.0, %v3993_v39  ;;  %v3774_v51 = vmul.f32 -1.442695, %v5158_v37  ;;  %v3902_v41 = vmul.f32 -1.442695, %v5166_v40 }
  0xd3   :  { %3996 = vpow2.f32 %v3742_v3  ;;  %v2635_v56 = vor.u32 1.1754944e-38, %v2634_v14  ;;  %v3743_v55 = vmul.f32 -1.442695, %v5169_v15  ;;  %v5187_v57 = vadd.f32 %v4697_v38, %v2195_v54 }
  0xd4   :  { %v2627_v27 = vadd.f32 %v3991_v9, %v2626_v46  ;;  %3998 = vrcp.f32 %v5175_v24  ;;  %vm2633_vm15 = vcmp.eq.f32.partialorder %v2632_v12, 8.507059e+37  ;;  %v536_v50 = vmul.f32 %v4682_v34, %v414_v13  ;;  %v83_v13 = vld [vmem:[%s8265_s0 + $0x1b8] sm:$0xff] }
  0xd5   :  { %4000 = vpow2.f32 %v3870_v49  ;;  %v3871_v43 = vmul.f32 -1.442695, %v5187_v57  ;;  %v2227_v7 = vmul.f32 %v4687_v35, %v2105_v58  ;;  %v1421_v10 = vand.u32 2147483647, %v5175_v24  ;;  %3729 = vmatmul.msk.f32.gmra.mxu2 %vm93_vm0, %v83_v13  ;;  %3857 = vmatmul.msk.f32.gmra.mxu3 %vm93_vm0, %v83_v13 }
  0xd6   :  { %v2631_v60 = vsel %vm2630_vm14, %v3991_v9, %v2627_v27  ;;  %4002 = vpow2.f32 %v3774_v51  ;;  %vm1417_vm1 = vweird.f32 %v5175_v24  ;;  %v5217_v16 = vadd.f32 %v4692_v36, %v536_v50 }
  0xd7   :  { %v3995_v62 = vpop.eup %3994  ;;  %v2636_v0 = vsel %vm2633_vm15, %v2635_v56, %v2631_v60  ;;  %4004 = vpow2.f32 %v3902_v41  ;;  %v5223_v4 = vadd.f32 %v4697_v38, %v2227_v7  ;;  %vm5225_vm2 = vcmp.eq.f32.partialorder %v1421_v10, 8.507059e+37 }
  0xd8   :  { %v3541_v5 = vmul.f32 %v2636_v0, %v4959_v23  ;;  %v5197_v42 = vadd.f32 1.0, %v3995_v62  ;;  %4006 = vpow2.f32 %v3743_v55  ;;  %v1423_v23 = vand.u32 2147483648, %v5175_v24 }
  0xd9   :  { %v3997_v8 = vpop.eup %3996  ;;  %v5233_v48 = vmul.f32 %v4682_v34, %v321_v17  ;;  %v5236_v25 = vmul.f32 %v4687_v35, %v2012_v18  ;;  %v5242_v44 = vmul.f32 -1.442695, %v5217_v16  ;;  %v5248_v34 = vmul.f32 -1.442695, %v5223_v4 }
  0xda   :  { %v3999_v11 = vpop.eup %3998  ;;  %3605 = vst.msk [vmem:[%s8271_s8 + $0x18] sm:$0xff] %vm1911_vm4, %v3541_v5  ;;  %4008 = vrcp.f32 %v5197_v42  ;;  %v5214_v12 = vadd.f32 1.0, %v3997_v8  ;;  %v3114_v14 = vand.u32 2147483648, %v5197_v42  ;;  %v3112_v36 = vand.u32 2147483647, %v5197_v42 }
  0xdb   :  { %v4001_v47 = vpop.eup %4000  ;;  %v1413_v53 = vmul.f32 %v3999_v11, %v5175_v24  ;;  %4010 = vpow2.f32 %v3871_v43  ;;  %v1424_v1 = vor.u32 1.1754944e-38, %v1423_v23  ;;  %vm1418_vm6 = vweird.f32 %v3999_v11  ;;  %v51_v24 = vld [vmem:[%s8265_s0 + $0xb8] sm:$0xff] }
  0xdc   :  { %v4003_v61 = vpop.eup %4002  ;;  %v5220_v59 = vadd.f32 1.0, %v4001_v47  ;;  %4012 = vrcp.f32 %v5214_v12  ;;  %vm3108_vm3 = vweird.f32 %v5197_v42  ;;  %v3115_v45 = vor.u32 1.1754944e-38, %v3114_v14  ;;  %vm1419_vm10 = vmor %vm1417_vm1, %vm1418_vm6  ;;  %3697 = vmatmul.msk.f32.gmra.mxu0 %vm93_vm0, %v51_v24  ;;  %3825 = vmatmul.msk.f32.gmra.mxu1 %vm93_vm0, %v51_v24 }
  0xdd   :  { %v4005_v21 = vpop.eup %4004  ;;  %v1414_v9 = vsub.f32 1.0, %v1413_v53  ;;  %v5239_v26 = vadd.f32 1.0, %v4003_v61  ;;  %v956_v2 = vand.u32 2147483647, %v5214_v12  ;;  %vm5251_vm11 = vcmp.eq.f32.partialorder %v3112_v36, 8.507059e+37 }
  0xde   :  { %4014 = vrcp.f32 %v5220_v59  ;;  %v4007_v38 = vpop.eup %4006  ;;  %v5245_v30 = vadd.f32 1.0, %v4005_v21  ;;  %vm952_vm5 = vweird.f32 %v5214_v12  ;;  %v958_v39 = vand.u32 2147483648, %v5214_v12 }
  0xdf   :  { %v1415_v63 = vmul.f32 %v3999_v11, %v1414_v9  ;;  %vm2643_vm8 = vweird.f32 %v5220_v59  ;;  %v2647_v46 = vand.u32 2147483647, %v5220_v59  ;;  %v2649_v49 = vand.u32 2147483648, %v5220_v59 }
  0xe0   :  { %v4009_v28 = vpop.eup %4008  ;;  %4016 = vrcp.f32 %v5239_v26  ;;  %v5265_v27 = vadd.f32 1.0, %v4007_v38  ;;  %vm5276_vm9 = vcmp.eq.f32.partialorder %v956_v2, 8.507059e+37  ;;  %v1438_v62 = vand.u32 2147483648, %v5239_v26 }
  0xe1   :  { %v1416_v35 = vadd.f32 %v3999_v11, %v1415_v63  ;;  %v3104_v31 = vmul.f32 %v4009_v28, %v5197_v42  ;;  %v4011_v3 = vpop.eup %4010  ;;  %4018 = vrcp.f32 %v5245_v30  ;;  %vm3109_vm7 = vweird.f32 %v4009_v28 }
  0xe2   :  { %v4013_v51 = vpop.eup %4012  ;;  %v1436_v32 = vand.u32 2147483647, %v5239_v26  ;;  %v959_v43 = vor.u32 1.1754944e-38, %v958_v39  ;;  %vm5288_vm12 = vcmp.eq.f32.partialorder %v2647_v46, 8.507059e+37  ;;  %v2650_v8 = vor.u32 1.1754944e-38, %v2649_v49  ;;  %vm3110_vm15 = vmor %vm3108_vm3, %vm3109_vm7 }
  0xe3   :  { %v1420_v41 = vsel %vm1419_vm10, %v3999_v11, %v1416_v35  ;;  %v3105_v54 = vsub.f32 1.0, %v3104_v31  ;;  %v948_v58 = vmul.f32 %v4013_v51, %v5214_v12  ;;  %vm953_vm13 = vweird.f32 %v4013_v51 }
  0xe4   :  { %v4015_v56 = vpop.eup %4014  ;;  %v1425_v55 = vsel %vm5225_vm2, %v1424_v1, %v1420_v41  ;;  %vm1432_vm14 = vweird.f32 %v5239_v26  ;;  %4020 = vrcp.f32 %v5265_v27  ;;  %v1439_v47 = vor.u32 1.1754944e-38, %v1438_v62  ;;  %vm954_vm10 = vmor %vm952_vm5, %vm953_vm13 }
  0xe5   :  { %v1882_v0 = vmul.f32 %v1425_v55, %v4984_v52  ;;  %v3106_v50 = vmul.f32 %v4009_v28, %v3105_v54  ;;  %v2639_v19 = vmul.f32 %v4015_v56, %v5220_v59  ;;  %v949_v5 = vsub.f32 1.0, %v948_v58  ;;  %v5361_v55 = vld [vmem:[%s8267_s3] ss:$0 sm:$0xff] }
  0xe6   :  { %v4017_v11 = vpop.eup %4016  ;;  %vm2644_vm1 = vweird.f32 %v4015_v56  ;;  %vm3123_vm2 = vweird.f32 %v5245_v30  ;;  %v3127_v53 = vand.u32 2147483647, %v5245_v30  ;;  %vm5304_vm6 = vcmp.eq.f32.partialorder %v1436_v32, 8.507059e+37 }
  0xe7   :  { %1947 = vst.msk [vmem:[%s8270_s7 + $0x118] sm:$0xff] %vm1911_vm4, %v1882_v0  ;;  %v3107_v52 = vadd.f32 %v4009_v28, %v3106_v50  ;;  %v2640_v10 = vsub.f32 1.0, %v2639_v19  ;;  %v950_v23 = vmul.f32 %v4013_v51, %v949_v5  ;;  %v4019_v17 = vpop.eup %4018  ;;  %v1428_v14 = vmul.f32 %v4017_v11, %v5239_v26  ;;  %v2108_v5 = vpop.f32.mrf.mxu3 }
  0xe8   :  { %v3129_v9 = vand.u32 2147483648, %v5245_v30  ;;  %v3119_v36 = vmul.f32 %v4019_v17, %v5245_v30  ;;  %vm967_vm3 = vweird.f32 %v5265_v27  ;;  %vm1433_vm7 = vweird.f32 %v4017_v11  ;;  %v417_v30 = vpop.f32.mrf.mxu2 }
  0xe9   :  { %v3111_v18 = vsel %vm3110_vm15, %v4009_v28, %v3107_v52  ;;  %v2641_v61 = vmul.f32 %v4015_v56, %v2640_v10  ;;  %v951_v22 = vadd.f32 %v4013_v51, %v950_v23  ;;  %v1429_v63 = vsub.f32 1.0, %v1428_v14  ;;  %vm2645_vm15 = vmor %vm2643_vm8, %vm2644_vm1 }
  0xea   :  { %v3116_v42 = vsel %vm5251_vm11, %v3115_v45, %v3111_v18  ;;  %v3120_v45 = vsub.f32 1.0, %v3119_v36  ;;  %vm3124_vm11 = vweird.f32 %v4019_v17  ;;  %v5320_v2 = vadd.f32 1.0, %v4011_v3  ;;  %v4021_v35 = vpop.eup %4020  ;;  %vm1434_vm8 = vmor %vm1432_vm14, %vm1433_vm7 }
  0xeb   :  { %v3573_v1 = vmul.f32 %v3116_v42, %v5128_v6  ;;  %v2642_v38 = vadd.f32 %v4015_v56, %v2641_v61  ;;  %v955_v28 = vsel %vm954_vm10, %v4013_v51, %v951_v22  ;;  %v1430_v31 = vmul.f32 %v4017_v11, %v1429_v63  ;;  %v2015_v22 = vpop.f32.mrf.mxu1 }
  0xec   :  { %v960_v6 = vsel %vm5276_vm9, %v959_v43, %v955_v28  ;;  %4022 = vpow2.f32 %v5242_v44  ;;  %v3121_v39 = vmul.f32 %v4019_v17, %v3120_v45  ;;  %v963_v3 = vmul.f32 %v4021_v35, %v5265_v27  ;;  %vm3125_vm9 = vmor %vm3123_vm2, %vm3124_vm11  ;;  %v5393_v43 = vld [vmem:[%s8266_s2] ss:$0 sm:$0xff] }
  0xed   :  { %3637 = vst.msk [vmem:[%s8271_s8 + $0x118] sm:$0xff] %vm1911_vm4, %v3573_v1  ;;  %v2646_v12 = vsel %vm2645_vm15, %v4015_v56, %v2642_v38  ;;  %v1851_v59 = vmul.f32 %v960_v6, %v5151_v20  ;;  %v1431_v49 = vadd.f32 %v4017_v11, %v1430_v31  ;;  %vm5334_vm5 = vcmp.eq.f32.partialorder %v3127_v53, 8.507059e+37  ;;  %v5407_v53 = vld [vmem:[%s8268_s5] ss:$0 sm:$0xff] }
  0xee   :  { %v2651_v29 = vsel %vm5288_vm12, %v2650_v8, %v2646_v12  ;;  %v3130_v41 = vor.u32 1.1754944e-38, %v3129_v9  ;;  %v3122_v20 = vadd.f32 %v4019_v17, %v3121_v39  ;;  %v964_v44 = vsub.f32 1.0, %v963_v3  ;;  %v324_v8 = vpop.f32.mrf.mxu0  ;;  %v52_v1 = vld [vmem:[%s8265_s0 + $0xc0] sm:$0xff] }
  0xef   :  { %v3542_v46 = vmul.f32 %v2651_v29, %v5155_v33  ;;  %1916 = vst.msk [vmem:[%s8270_s7 + $0x20] sm:$0xff] %vm1911_vm4, %v1851_v59  ;;  %v971_v54 = vand.u32 2147483647, %v5265_v27  ;;  %4024 = vrcp.f32 %v5320_v2  ;;  %v1435_v33 = vsel %vm1434_vm8, %v4017_v11, %v1431_v49  ;;  %v84_v38 = vld [vmem:[%s8265_s0 + $0x1c0] sm:$0xff]  ;;  %3698 = vmatmul.msk.f32.gmra.mxu0 %vm93_vm0, %v52_v1  ;;  %3826 = vmatmul.msk.f32.gmra.mxu1 %vm93_vm0, %v52_v1 }
  0xf0   :  { %vm968_vm12 = vweird.f32 %v4021_v35  ;;  %v973_v26 = vand.u32 2147483648, %v5265_v27  ;;  %4026 = vpow2.f32 %v5248_v34  ;;  %v1440_v24 = vsel %vm5304_vm6, %v1439_v47, %v1435_v33  ;;  %3730 = vmatmul.msk.f32.gmra.mxu2 %vm93_vm0, %v84_v38  ;;  %3858 = vmatmul.msk.f32.gmra.mxu3 %vm93_vm0, %v84_v38 }
  0xf1   :  { %3606 = vst.msk [vmem:[%s8271_s8 + $0x20] sm:$0xff] %vm1911_vm4, %v3542_v46  ;;  %v3126_v13 = vsel %vm3125_vm9, %v4019_v17, %v3122_v20  ;;  %v965_v56 = vmul.f32 %v4021_v35, %v964_v44  ;;  %v5365_v58 = vadd.f32 %v5361_v55, %v5233_v48  ;;  %v1883_v62 = vmul.f32 %v1440_v24, %v5158_v37  ;;  %vm969_vm13 = vmor %vm967_vm3, %vm968_vm12 }
  0xf2   :  { %v4023_v60 = vpop.eup %4022  ;;  %v3131_v34 = vsel %vm5334_vm5, %v3130_v41, %v3126_v13  ;;  %v974_v37 = vor.u32 1.1754944e-38, %v973_v26  ;;  %v537_v7 = vmul.f32 %v5393_v43, %v417_v30  ;;  %vm972_vm14 = vcmp.eq.f32.partialorder %v971_v54, 8.507059e+37  ;;  %v420_v26 = vpop.f32.mrf.mxu2 }
  0xf3   :  { %v3574_v0 = vmul.f32 %v3131_v34, %v5166_v40  ;;  %v966_v50 = vadd.f32 %v4021_v35, %v965_v56  ;;  %v5371_v19 = vadd.f32 1.0, %v4023_v60  ;;  %v3744_v32 = vmul.f32 -1.442695, %v5365_v58  ;;  %1948 = vst.msk [vmem:[%s8270_s7 + $0x120] sm:$0xff] %vm1911_vm4, %v1883_v62  ;;  %v5384_v40 = vld [vmem:[%s8269_s6] ss:$0 sm:$0xff] }
  0xf4   :  { %v5388_v48 = vadd.f32 %v5384_v40, %v5236_v25  ;;  %v2662_v10 = vand.u32 2147483647, %v5320_v2  ;;  %v2664_v47 = vand.u32 2147483648, %v5320_v2  ;;  %v2228_v17 = vmul.f32 %v5407_v53, %v2108_v5 }
  0xf5   :  { %v4025_v27 = vpop.eup %4024  ;;  %3638 = vst.msk [vmem:[%s8271_s8 + $0x120] sm:$0xff] %vm1911_vm4, %v3574_v0  ;;  %v970_v52 = vsel %vm969_vm13, %v4021_v35, %v966_v50  ;;  %4028 = vrcp.f32 %v5371_v19  ;;  %v506_v14 = vmul.f32 %v5393_v43, %v324_v8  ;;  %vm2658_vm1 = vweird.f32 %v5320_v2 }
  0xf6   :  { %v4027_v25 = vpop.eup %4026  ;;  %v975_v11 = vsel %vm972_vm14, %v974_v37, %v970_v52  ;;  %v2654_v23 = vmul.f32 %v4025_v27, %v5320_v2  ;;  %4030 = vpow2.f32 %v3744_v32  ;;  %v3872_v9 = vmul.f32 -1.442695, %v5388_v48 }
  0xf7   :  { %v1852_v18 = vmul.f32 %v975_v11, %v5169_v15  ;;  %v5411_v61 = vadd.f32 1.0, %v4027_v25  ;;  %v5417_v42 = vadd.f32 %v5361_v55, %v537_v7  ;;  %vm2659_vm2 = vweird.f32 %v4025_v27 }
  0xf8   :  { %v2655_v21 = vsub.f32 1.0, %v2654_v23  ;;  %v1451_v15 = vand.u32 2147483647, %v5371_v19  ;;  %v1453_v36 = vand.u32 2147483648, %v5371_v19  ;;  %v5434_v45 = vadd.f32 %v5384_v40, %v2228_v17  ;;  %vm2660_vm10 = vmor %vm2658_vm1, %vm2659_vm2 }
  0xf9   :  { %1917 = vst.msk [vmem:[%s8270_s7 + $0x28] sm:$0xff] %vm1911_vm4, %v1852_v18  ;;  %4032 = vrcp.f32 %v5411_v61  ;;  %v3776_v28 = vmul.f32 -1.442695, %v5417_v42  ;;  %vm5438_vm6 = vcmp.eq.f32.partialorder %v2662_v10, 8.507059e+37  ;;  %v2665_v12 = vor.u32 1.1754944e-38, %v2664_v47 }
  0xfa   :  { %v2656_v63 = vmul.f32 %v4025_v27, %v2655_v21  ;;  %4034 = vpow2.f32 %v3872_v9  ;;  %v5443_v31 = vadd.f32 %v5361_v55, %v506_v14  ;;  %v2197_v59 = vmul.f32 %v5407_v53, %v2015_v22 }
  0xfb   :  { %v4029_v35 = vpop.eup %4028  ;;  %vm1447_vm3 = vweird.f32 %v5371_v19  ;;  %4036 = vpow2.f32 %v3776_v28  ;;  %vm5453_vm7 = vcmp.eq.f32.partialorder %v1451_v15, 8.507059e+37  ;;  %v1454_v49 = vor.u32 1.1754944e-38, %v1453_v36 }
  0xfc   :  { %v2657_v29 = vadd.f32 %v4025_v27, %v2656_v63  ;;  %v1443_v39 = vmul.f32 %v4029_v35, %v5371_v19  ;;  %v4031_v3 = vpop.eup %4030  ;;  %v3904_v51 = vmul.f32 -1.442695, %v5434_v45  ;;  %v5459_v41 = vadd.f32 %v5384_v40, %v2197_v59 }
  0xfd   :  { %v5461_v54 = vadd.f32 1.0, %v4031_v3  ;;  %v3745_v33 = vmul.f32 -1.442695, %v5443_v31  ;;  %vm3138_vm15 = vweird.f32 %v5411_v61  ;;  %vm1448_vm11 = vweird.f32 %v4029_v35 }
  0xfe   :  { %v2661_v20 = vsel %vm2660_vm10, %v4025_v27, %v2657_v29  ;;  %v1444_v44 = vsub.f32 1.0, %v1443_v39  ;;  %4038 = vpow2.f32 %v3904_v51  ;;  %v3873_v13 = vmul.f32 -1.442695, %v5459_v41  ;;  %vm1449_vm5 = vmor %vm1447_vm3, %vm1448_vm11  ;;  %v2111_v27 = vpop.f32.mrf.mxu3 }
  0xff   :  { %v4033_v24 = vpop.eup %4032  ;;  %v2666_v2 = vsel %vm5438_vm6, %v2665_v12, %v2661_v20  ;;  %v3142_v34 = vand.u32 2147483647, %v5411_v61  ;;  %v3144_v0 = vand.u32 2147483648, %v5411_v61  ;;  %4040 = vrcp.f32 %v5461_v54 }
 0x100   :  { %v4035_v56 = vpop.eup %4034  ;;  %v3543_v30 = vmul.f32 %v2666_v2, %v5187_v57  ;;  %v1445_v60 = vmul.f32 %v4029_v35, %v1444_v44  ;;  %v3134_v62 = vmul.f32 %v4033_v24, %v5411_v61  ;;  %v538_v50 = vmul.f32 %v5393_v43, %v420_v26 }
 0x101   :  { %v4037_v32 = vpop.eup %4036  ;;  %v5478_v37 = vadd.f32 1.0, %v4035_v56  ;;  %4042 = vpow2.f32 %v3745_v33  ;;  %vm3139_vm8 = vweird.f32 %v4033_v24  ;;  %v986_v7 = vand.u32 2147483647, %v5461_v54 }
 0x102   :  { %3607 = vst.msk [vmem:[%s8271_s8 + $0x28] sm:$0xff] %vm1911_vm4, %v3543_v30  ;;  %v1446_v5 = vadd.f32 %v4029_v35, %v1445_v60  ;;  %v3135_v57 = vsub.f32 1.0, %v3134_v62  ;;  %v5483_v8 = vadd.f32 1.0, %v4037_v32  ;;  %4044 = vpow2.f32 %v3873_v13  ;;  %vm3140_vm12 = vmor %vm3138_vm15, %vm3139_vm8  ;;  %v327_v62 = vpop.f32.mrf.mxu0 }
 0x103   :  { %v988_v25 = vand.u32 2147483648, %v5461_v54  ;;  %4046 = vrcp.f32 %v5478_v37  ;;  %vm5489_vm9 = vcmp.eq.f32.partialorder %v3142_v34, 8.507059e+37  ;;  %v3145_v47 = vor.u32 1.1754944e-38, %v3144_v0 }
 0x104   :  { %v1450_v52 = vsel %vm1449_vm5, %v4029_v35, %v1446_v5  ;;  %v3136_v10 = vmul.f32 %v4033_v24, %v3135_v57  ;;  %v4039_v11 = vpop.eup %4038  ;;  %4048 = vrcp.f32 %v5483_v8  ;;  %v2679_v14 = vand.u32 2147483648, %v5478_v37 }
 0x105   :  { %v1455_v23 = vsel %vm5453_vm7, %v1454_v49, %v1450_v52  ;;  %v5497_v21 = vmul.f32 %v5407_v53, %v2111_v27  ;;  %v4041_v9 = vpop.eup %4040  ;;  %vm982_vm13 = vweird.f32 %v5461_v54  ;;  %v2677_v22 = vand.u32 2147483647, %v5478_v37 }
 0x106   :  { %v1884_v17 = vmul.f32 %v1455_v23, %v5217_v16  ;;  %v3137_v18 = vadd.f32 %v4033_v24, %v3136_v10  ;;  %v5504_v15 = vadd.f32 1.0, %v4039_v11  ;;  %v5507_v36 = vadd.f32 %v5361_v55, %v538_v50 }
 0x107   :  { %v4043_v16 = vpop.eup %4042  ;;  %v978_v38 = vmul.f32 %v4041_v9, %v5461_v54  ;;  %vm5514_vm14 = vcmp.eq.f32.partialorder %v986_v7, 8.507059e+37  ;;  %v989_v63 = vor.u32 1.1754944e-38, %v988_v25  ;;  %vm2673_vm1 = vweird.f32 %v5478_v37 }
 0x108   :  { %1949 = vst.msk [vmem:[%s8270_s7 + $0x128] sm:$0xff] %vm1911_vm4, %v1884_v17  ;;  %v3141_v1 = vsel %vm3140_vm12, %v4033_v24, %v3137_v18  ;;  %v4045_v28 = vpop.eup %4044  ;;  %v1466_v6 = vand.u32 2147483647, %v5483_v8  ;;  %v1468_v12 = vand.u32 2147483648, %v5483_v8  ;;  %4050 = vrcp.f32 %v5504_v15 }
 0x109   :  { %v3146_v35 = vsel %vm5489_vm9, %v3145_v47, %v3141_v1  ;;  %v4047_v59 = vpop.eup %4046  ;;  %v979_v39 = vsub.f32 1.0, %v978_v38  ;;  %v2680_v3 = vor.u32 1.1754944e-38, %v2679_v14  ;;  %vm1462_vm2 = vweird.f32 %v5483_v8 }
 0x10a   :  { %v3575_v29 = vmul.f32 %v3146_v35, %v5223_v4  ;;  %v4049_v46 = vpop.eup %4048  ;;  %v2669_v49 = vmul.f32 %v4047_v59, %v5478_v37  ;;  %vm5527_vm6 = vcmp.eq.f32.partialorder %v2677_v22, 8.507059e+37  ;;  %v3159_v20 = vand.u32 2147483648, %v5504_v15  ;;  %v2018_v22 = vpop.f32.mrf.mxu1 }
 0x10b   :  { %v5532_v44 = vadd.f32 1.0, %v4043_v16  ;;  %v5534_v33 = vadd.f32 1.0, %v4045_v28  ;;  %v980_v4 = vmul.f32 %v4041_v9, %v979_v39  ;;  %vm983_vm3 = vweird.f32 %v4041_v9  ;;  %v53_v16 = vld [vmem:[%s8265_s0 + $0xc8] sm:$0xff] }
 0x10c   :  { %3639 = vst.msk [vmem:[%s8271_s8 + $0x128] sm:$0xff] %vm1911_vm4, %v3575_v29  ;;  %v1458_v26 = vmul.f32 %v4049_v46, %v5483_v8  ;;  %v3157_v24 = vand.u32 2147483647, %v5504_v15  ;;  %v2670_v2 = vsub.f32 1.0, %v2669_v49  ;;  %vm5542_vm10 = vcmp.eq.f32.partialorder %v1466_v6, 8.507059e+37  ;;  %vm984_vm5 = vmor %vm982_vm13, %vm983_vm3  ;;  %v85_v8 = vld [vmem:[%s8265_s0 + $0x1c8] sm:$0xff]  ;;  %3699 = vmatmul.msk.f32.gmra.mxu0 %vm93_vm0, %v53_v16  ;;  %3827 = vmatmul.msk.f32.gmra.mxu1 %vm93_vm0, %v53_v16 }
 0x10d   :  { %v1469_v56 = vor.u32 1.1754944e-38, %v1468_v12  ;;  %4052 = vrcp.f32 %v5532_v44  ;;  %v981_v30 = vadd.f32 %v4041_v9, %v980_v4  ;;  %vm2674_vm7 = vweird.f32 %v4047_v59  ;;  %3731 = vmatmul.msk.f32.gmra.mxu2 %vm93_vm0, %v85_v8  ;;  %3859 = vmatmul.msk.f32.gmra.mxu3 %vm93_vm0, %v85_v8 }
 0x10e   :  { %v1459_v60 = vsub.f32 1.0, %v1458_v26  ;;  %vm1463_vm15 = vweird.f32 %v4049_v46  ;;  %vm3153_vm11 = vweird.f32 %v5504_v15  ;;  %v5548_v34 = vpop.eup %4050  ;;  %v2671_v0 = vmul.f32 %v4047_v59, %v2670_v2  ;;  %vm5569_vm12 = vmor %vm2673_vm1, %vm2674_vm7 }
 0x10f   :  { %v3160_v50 = vor.u32 1.1754944e-38, %v3159_v20  ;;  %v1003_v32 = vand.u32 2147483648, %v5532_v44  ;;  %4054 = vrcp.f32 %v5534_v33  ;;  %v985_v5 = vsel %vm984_vm5, %v4041_v9, %v981_v30  ;;  %vm5582_vm3 = vmor %vm1462_vm2, %vm1463_vm15 }
 0x110   :  { %v1460_v57 = vmul.f32 %v4049_v46, %v1459_v60  ;;  %v3149_v7 = vmul.f32 %v5548_v34, %v5504_v15  ;;  %vm5556_vm8 = vcmp.eq.f32.partialorder %v3157_v24, 8.507059e+37  ;;  %v1001_v52 = vand.u32 2147483647, %v5532_v44  ;;  %v2114_v15 = vpop.f32.mrf.mxu3  ;;  %v330_v24 = vpop.f32.mrf.mxu0 }
 0x111   :  { %v990_v54 = vsel %vm5514_vm14, %v989_v63, %v985_v5  ;;  %v2672_v10 = vadd.f32 %v4047_v59, %v2671_v0  ;;  %vm997_vm9 = vweird.f32 %v5532_v44  ;;  %v2692_v25 = vand.u32 2147483647, %v5534_v33 }
 0x112   :  { %v1853_v11 = vmul.f32 %v990_v54, %v5365_v58  ;;  %v1461_v19 = vadd.f32 %v4049_v46, %v1460_v57  ;;  %v3150_v47 = vsub.f32 1.0, %v3149_v7  ;;  %vm3154_vm13 = vweird.f32 %v5548_v34  ;;  %v54_v58 = vld [vmem:[%s8265_s0 + $0xd0] sm:$0xff] }
 0x113   :  { %vm2688_vm14 = vweird.f32 %v5534_v33  ;;  %v5575_v17 = vpop.eup %4052  ;;  %v2676_v18 = vsel %vm5569_vm12, %v4047_v59, %v2672_v10  ;;  %v1004_v37 = vor.u32 1.1754944e-38, %v1003_v32  ;;  %v3777_v14 = vmul.f32 -1.442695, %v5507_v36 }
 0x114   :  { %v5589_v9 = vadd.f32 %v5384_v40, %v5497_v21  ;;  %1918 = vst.msk [vmem:[%s8270_s7 + $0x30] sm:$0xff] %vm1911_vm4, %v1853_v11  ;;  %v2681_v1 = vsel %vm5527_vm6, %v2680_v3, %v2676_v18  ;;  %v1465_v21 = vsel %vm5582_vm3, %v4049_v46, %v1461_v19  ;;  %v3151_v38 = vmul.f32 %v5548_v34, %v3150_v47  ;;  %v423_v46 = vpop.f32.mrf.mxu2 }
 0x115   :  { %v993_v61 = vmul.f32 %v5575_v17, %v5532_v44  ;;  %vm5608_vm1 = vcmp.eq.f32.partialorder %v1001_v52, 8.507059e+37  ;;  %v4055_v28 = vpop.eup %4054  ;;  %v3544_v35 = vmul.f32 %v2681_v1, %v5388_v48  ;;  %v1470_v6 = vsel %vm5542_vm10, %v1469_v56, %v1465_v21  ;;  %vm3155_vm10 = vmor %vm3153_vm11, %vm3154_vm13  ;;  %3700 = vmatmul.msk.f32.gmra.mxu0 %vm93_vm0, %v54_v58  ;;  %3828 = vmatmul.msk.f32.gmra.mxu1 %vm93_vm0, %v54_v58 }
 0x116   :  { %vm998_vm2 = vweird.f32 %v5575_v17  ;;  %v2694_v12 = vand.u32 2147483648, %v5534_v33  ;;  %v1885_v59 = vmul.f32 %v1470_v6, %v5417_v42  ;;  %v3152_v29 = vadd.f32 %v5548_v34, %v3151_v38 }
 0x117   :  { %v994_v39 = vsub.f32 1.0, %v993_v61  ;;  %v2684_v3 = vmul.f32 %v4055_v28, %v5534_v33  ;;  %vm5622_vm6 = vcmp.eq.f32.partialorder %v2692_v25, 8.507059e+37  ;;  %3608 = vst.msk [vmem:[%s8271_s8 + $0x30] sm:$0xff] %vm1911_vm4, %v3544_v35  ;;  %vm2689_vm7 = vweird.f32 %v4055_v28  ;;  %vm999_vm15 = vmor %vm997_vm9, %vm998_vm2  ;;  %v2021_v25 = vpop.f32.mrf.mxu1 }
 0x118   :  { %4056 = vpow2.f32 %v3777_v14  ;;  %v3905_v42 = vmul.f32 -1.442695, %v5589_v9  ;;  %v507_v49 = vmul.f32 %v5393_v43, %v327_v62  ;;  %1950 = vst.msk [vmem:[%s8270_s7 + $0x130] sm:$0xff] %vm1911_vm4, %v1885_v59  ;;  %v3156_v51 = vsel %vm3155_vm10, %v5548_v34, %v3152_v29  ;;  %vm2690_vm11 = vmor %vm2688_vm14, %vm2689_vm7  ;;  %v2117_v38 = vpop.f32.mrf.mxu3 }
 0x119   :  { %v995_v20 = vmul.f32 %v5575_v17, %v994_v39  ;;  %v2685_v4 = vsub.f32 1.0, %v2684_v3  ;;  %v2198_v26 = vmul.f32 %v5407_v53, %v2018_v22  ;;  %v3161_v2 = vsel %vm5556_vm8, %v3160_v50, %v3156_v51 }
 0x11a   :  { %4058 = vpow2.f32 %v3905_v42  ;;  %v5648_v13 = vadd.f32 %v5361_v55, %v507_v49  ;;  %v539_v56 = vmul.f32 %v5393_v43, %v423_v46  ;;  %v3576_v30 = vmul.f32 %v3161_v2, %v5434_v45 }
 0x11b   :  { %v996_v60 = vadd.f32 %v5575_v17, %v995_v20  ;;  %v2686_v62 = vmul.f32 %v4055_v28, %v2685_v4  ;;  %v5654_v34 = vadd.f32 %v5384_v40, %v2198_v26  ;;  %v2230_v32 = vmul.f32 %v5407_v53, %v2114_v15 }
 0x11c   :  { %v3746_v0 = vmul.f32 -1.442695, %v5648_v13  ;;  %v5662_v50 = vadd.f32 %v5361_v55, %v539_v56  ;;  %v508_v45 = vmul.f32 %v5393_v43, %v330_v24  ;;  %3640 = vst.msk [vmem:[%s8271_s8 + $0x130] sm:$0xff] %vm1911_vm4, %v3576_v30  ;;  %v2695_v7 = vor.u32 1.1754944e-38, %v2694_v12  ;;  %v426_v8 = vpop.f32.mrf.mxu2 }
 0x11d   :  { %v1000_v5 = vsel %vm999_vm15, %v5575_v17, %v996_v60  ;;  %v2687_v57 = vadd.f32 %v4055_v28, %v2686_v62  ;;  %v3874_v44 = vmul.f32 -1.442695, %v5654_v34  ;;  %v5679_v10 = vadd.f32 %v5384_v40, %v2230_v32 }
 0x11e   :  { %v4057_v27 = vpop.eup %4056  ;;  %v1005_v52 = vsel %vm5608_vm1, %v1004_v37, %v1000_v5  ;;  %4060 = vpow2.f32 %v3746_v0  ;;  %v3778_v54 = vmul.f32 -1.442695, %v5662_v50  ;;  %v5688_v18 = vadd.f32 %v5361_v55, %v508_v45 }
 0x11f   :  { %v1854_v11 = vmul.f32 %v1005_v52, %v5443_v31  ;;  %v2691_v23 = vsel %vm2690_vm11, %v4055_v28, %v2687_v57  ;;  %v5682_v19 = vadd.f32 1.0, %v4057_v27  ;;  %4062 = vpow2.f32 %v3874_v44  ;;  %v86_v31 = vld [vmem:[%s8265_s0 + $0x1d0] sm:$0xff] }
 0x120   :  { %v4059_v47 = vpop.eup %4058  ;;  %v2696_v17 = vsel %vm5622_vm6, %v2695_v7, %v2691_v23  ;;  %4064 = vpow2.f32 %v3778_v54  ;;  %v3906_v33 = vmul.f32 -1.442695, %v5679_v10  ;;  %v2199_v14 = vmul.f32 %v5407_v53, %v2021_v25  ;;  %3732 = vmatmul.msk.f32.gmra.mxu2 %vm93_vm0, %v86_v31  ;;  %3860 = vmatmul.msk.f32.gmra.mxu3 %vm93_vm0, %v86_v31 }
 0x121   :  { %1919 = vst.msk [vmem:[%s8270_s7 + $0x38] sm:$0xff] %vm1911_vm4, %v1854_v11  ;;  %v3545_v37 = vmul.f32 %v2696_v17, %v5459_v41  ;;  %4066 = vrcp.f32 %v5682_v19  ;;  %v5705_v22 = vadd.f32 1.0, %v4059_v47  ;;  %v3747_v16 = vmul.f32 -1.442695, %v5688_v18 }
 0x122   :  { %4068 = vpow2.f32 %v3906_v33  ;;  %v1481_v1 = vand.u32 2147483647, %v5682_v19  ;;  %v1483_v21 = vand.u32 2147483648, %v5682_v19  ;;  %v5720_v28 = vadd.f32 %v5384_v40, %v2199_v14 }
 0x123   :  { %3609 = vst.msk [vmem:[%s8271_s8 + $0x38] sm:$0xff] %vm1911_vm4, %v3545_v37  ;;  %4070 = vrcp.f32 %v5705_v22  ;;  %v540_v35 = vmul.f32 %v5393_v43, %v426_v8  ;;  %vm1477_vm5 = vweird.f32 %v5682_v19  ;;  %v3172_v29 = vand.u32 2147483647, %v5705_v22 }
 0x124   :  { %v4061_v41 = vpop.eup %4060  ;;  %4072 = vpow2.f32 %v3747_v16  ;;  %v3174_v39 = vand.u32 2147483648, %v5705_v22  ;;  %v2231_v3 = vmul.f32 %v5407_v53, %v2117_v38  ;;  %vm5731_vm8 = vcmp.eq.f32.partialorder %v1481_v1, 8.507059e+37 }
 0x125   :  { %v4063_v61 = vpop.eup %4062  ;;  %v5717_v63 = vadd.f32 1.0, %v4061_v41  ;;  %v1484_v49 = vor.u32 1.1754944e-38, %v1483_v21  ;;  %vm3168_vm9 = vweird.f32 %v5705_v22  ;;  %v5740_v4 = vmul.f32 -1.442695, %v5720_v28 }
 0x126   :  { %v4065_v6 = vpop.eup %4064  ;;  %v5724_v12 = vadd.f32 1.0, %v4063_v61  ;;  %v5743_v26 = vadd.f32 %v5361_v55, %v540_v35  ;;  %vm5751_vm12 = vcmp.eq.f32.partialorder %v3172_v29, 8.507059e+37  ;;  %v3175_v0 = vor.u32 1.1754944e-38, %v3174_v39 }
 0x127   :  { %v4067_v59 = vpop.eup %4066  ;;  %4074 = vrcp.f32 %v5717_v63  ;;  %v1016_v51 = vand.u32 2147483647, %v5717_v63  ;;  %v1018_v20 = vand.u32 2147483648, %v5717_v63  ;;  %v5746_v56 = vadd.f32 1.0, %v4065_v6 }
 0x128   :  { %v4069_v48 = vpop.eup %4068  ;;  %v1473_v46 = vmul.f32 %v4067_v59, %v5682_v19  ;;  %4076 = vrcp.f32 %v5724_v12  ;;  %v2709_v2 = vand.u32 2147483648, %v5724_v12  ;;  %v2707_v32 = vand.u32 2147483647, %v5724_v12 }
 0x129   :  { %v4071_v15 = vpop.eup %4070  ;;  %v5748_v30 = vadd.f32 1.0, %v4069_v48  ;;  %v5757_v45 = vadd.f32 %v5384_v40, %v2231_v3  ;;  %vm1478_vm13 = vweird.f32 %v4067_v59  ;;  %vm1012_vm14 = vweird.f32 %v5717_v63  ;;  %v333_v3 = vpop.f32.mrf.mxu0 }
 0x12a   :  { %v1474_v24 = vsub.f32 1.0, %v1473_v46  ;;  %v3164_v60 = vmul.f32 %v4071_v15, %v5705_v22  ;;  %v4073_v5 = vpop.eup %4072  ;;  %4078 = vrcp.f32 %v5746_v56  ;;  %v1019_v27 = vor.u32 1.1754944e-38, %v1018_v20  ;;  %vm1479_vm6 = vmor %vm1477_vm5, %vm1478_vm13 }
 0x12b   :  { %vm2703_vm3 = vweird.f32 %v5724_v12  ;;  %4080 = vrcp.f32 %v5748_v30  ;;  %vm3169_vm1 = vweird.f32 %v4071_v15  ;;  %vm5766_vm2 = vcmp.eq.f32.partialorder %v1016_v51, 8.507059e+37 }
 0x12c   :  { %v1475_v57 = vmul.f32 %v4067_v59, %v1474_v24  ;;  %v3165_v44 = vsub.f32 1.0, %v3164_v60  ;;  %v2710_v23 = vor.u32 1.1754944e-38, %v2709_v2  ;;  %vm5774_vm10 = vcmp.eq.f32.partialorder %v2707_v32, 8.507059e+37  ;;  %vm3170_vm11 = vmor %vm3168_vm9, %vm3169_vm1  ;;  %v55_v24 = vld [vmem:[%s8265_s0 + $0xd8] sm:$0xff]  ;;  %v2024_v32 = vpop.f32.mrf.mxu1 }
 0x12d   :  { %v4075_v7 = vpop.eup %4074  ;;  %v1496_v58 = vand.u32 2147483647, %v5746_v56  ;;  %v1498_v31 = vand.u32 2147483648, %v5746_v56  ;;  %v3187_v16 = vand.u32 2147483647, %v5748_v30  ;;  %vm1492_vm15 = vweird.f32 %v5746_v56  ;;  %v87_v2 = vld [vmem:[%s8265_s0 + $0x1d8] sm:$0xff]  ;;  %3701 = vmatmul.msk.f32.gmra.mxu0 %vm93_vm0, %v55_v24  ;;  %3829 = vmatmul.msk.f32.gmra.mxu1 %vm93_vm0, %v55_v24 }
 0x12e   :  { %v5763_v52 = vpop.eup %4076  ;;  %v1476_v54 = vadd.f32 %v4067_v59, %v1475_v57  ;;  %v1008_v25 = vmul.f32 %v4075_v7, %v5717_v63  ;;  %v3166_v47 = vmul.f32 %v4071_v15, %v3165_v44  ;;  %vm1013_vm7 = vweird.f32 %v4075_v7  ;;  %3733 = vmatmul.msk.f32.gmra.mxu2 %vm93_vm0, %v87_v2  ;;  %v429_v44 = vpop.f32.mrf.mxu2  ;;  %3861 = vmatmul.msk.f32.gmra.mxu3 %vm93_vm0, %v87_v2 }
 0x12f   :  { %v2699_v17 = vmul.f32 %v5763_v52, %v5724_v12  ;;  %v5784_v1 = vadd.f32 1.0, %v4073_v5  ;;  %vm2704_vm5 = vweird.f32 %v5763_v52  ;;  %vm3183_vm13 = vweird.f32 %v5748_v30  ;;  %vm1014_vm1 = vmor %vm1012_vm14, %vm1013_vm7 }
 0x130   :  { %v1480_v37 = vsel %vm1479_vm6, %v4067_v59, %v1476_v54  ;;  %v1009_v14 = vsub.f32 1.0, %v1008_v25  ;;  %v3167_v8 = vadd.f32 %v4071_v15, %v3166_v47  ;;  %v5786_v21 = vpop.eup %4078  ;;  %v3189_v35 = vand.u32 2147483648, %v5748_v30 }
 0x131   :  { %v1485_v19 = vsel %vm5731_vm8, %v1484_v49, %v1480_v37  ;;  %v2700_v41 = vsub.f32 1.0, %v2699_v17  ;;  %v5795_v6 = vpop.eup %4080  ;;  %v1488_v39 = vmul.f32 %v5786_v21, %v5746_v56  ;;  %vm5800_vm8 = vcmp.eq.f32.partialorder %v1496_v58, 8.507059e+37 }
 0x132   :  { %v1886_v38 = vmul.f32 %v1485_v19, %v5507_v36  ;;  %v1010_v61 = vmul.f32 %v4075_v7, %v1009_v14  ;;  %v3171_v59 = vsel %vm3170_vm11, %v4071_v15, %v3167_v8  ;;  %v1499_v22 = vor.u32 1.1754944e-38, %v1498_v31  ;;  %v336_v8 = vpop.f32.mrf.mxu0 }
 0x133   :  { %v2701_v29 = vmul.f32 %v5763_v52, %v2700_v41  ;;  %v3176_v48 = vsel %vm5751_vm12, %v3175_v0, %v3171_v59  ;;  %v3179_v42 = vmul.f32 %v5795_v6, %v5748_v30  ;;  %vm5812_vm9 = vcmp.eq.f32.partialorder %v3187_v16, 8.507059e+37  ;;  %vm2705_vm12 = vmor %vm2703_vm3, %vm2704_vm5 }
 0x134   :  { %1951 = vst.msk [vmem:[%s8270_s7 + $0x138] sm:$0xff] %vm1911_vm4, %v1886_v38  ;;  %v1011_v46 = vadd.f32 %v4075_v7, %v1010_v61  ;;  %v3577_v51 = vmul.f32 %v3176_v48, %v5589_v9  ;;  %v1489_v15 = vsub.f32 1.0, %v1488_v39  ;;  %4082 = vrcp.f32 %v5784_v1 }
 0x135   :  { %v2702_v20 = vadd.f32 %v5763_v52, %v2701_v29  ;;  %vm1493_vm14 = vweird.f32 %v5786_v21  ;;  %v3180_v9 = vsub.f32 1.0, %v3179_v42  ;;  %v3190_v63 = vor.u32 1.1754944e-38, %v3189_v35  ;;  %v2027_v42 = vpop.f32.mrf.mxu1 }
 0x136   :  { %v1015_v60 = vsel %vm1014_vm1, %v4075_v7, %v1011_v46  ;;  %3641 = vst.msk [vmem:[%s8271_s8 + $0x138] sm:$0xff] %vm1911_vm4, %v3577_v51  ;;  %v1490_v12 = vmul.f32 %v5786_v21, %v1489_v15  ;;  %vm3184_vm3 = vweird.f32 %v5795_v6  ;;  %vm1027_vm6 = vweird.f32 %v5784_v1 }
 0x137   :  { %v1020_v62 = vsel %vm5766_vm2, %v1019_v27, %v1015_v60  ;;  %v2706_v0 = vsel %vm2705_vm12, %v5763_v52, %v2702_v20  ;;  %v3181_v7 = vmul.f32 %v5795_v6, %v3180_v9  ;;  %v2120_v27 = vpop.f32.mrf.mxu3  ;;  %v1031_v25 = vand.u32 2147483647, %v5784_v1  ;;  %vm1494_vm2 = vmor %vm1492_vm15, %vm1493_vm14 }
 0x138   :  { %v1855_v5 = vmul.f32 %v1020_v62, %v5648_v13  ;;  %v2711_v57 = vsel %vm5774_vm10, %v2710_v23, %v2706_v0  ;;  %v1491_v54 = vadd.f32 %v5786_v21, %v1490_v12  ;;  %4084 = vpow2.f32 %v5740_v4  ;;  %vm3185_vm10 = vmor %vm3183_vm13, %vm3184_vm3 }
 0x139   :  { %v3546_v52 = vmul.f32 %v2711_v57, %v5654_v34  ;;  %v3182_v13 = vadd.f32 %v5795_v6, %v3181_v7  ;;  %v3779_v34 = vmul.f32 -1.442695, %v5743_v26  ;;  %v3907_v11 = vmul.f32 -1.442695, %v5757_v45 }
 0x13a   :  { %1920 = vst.msk [vmem:[%s8270_s7 + $0x40] sm:$0xff] %vm1911_vm4, %v1855_v5  ;;  %v509_v23 = vmul.f32 %v5393_v43, %v333_v3  ;;  %v4083_v47 = vpop.eup %4082  ;;  %v1495_v4 = vsel %vm1494_vm2, %v5786_v21, %v1491_v54  ;;  %v2200_v56 = vmul.f32 %v5407_v53, %v2024_v32  ;;  %v541_v17 = vmul.f32 %v5393_v43, %v429_v44 }
 0x13b   :  { %3610 = vst.msk [vmem:[%s8271_s8 + $0x40] sm:$0xff] %vm1911_vm4, %v3546_v52  ;;  %v2232_v33 = vmul.f32 %v5407_v53, %v2120_v27  ;;  %v1500_v58 = vsel %vm5800_vm8, %v1499_v22, %v1495_v4  ;;  %v3186_v31 = vsel %vm3185_vm10, %v5795_v6, %v3182_v13  ;;  %v1023_v37 = vmul.f32 %v4083_v47, %v5784_v1 }
 0x13c   :  { %v1033_v14 = vand.u32 2147483648, %v5784_v1  ;;  %v1887_v16 = vmul.f32 %v1500_v58, %v5662_v50  ;;  %v3191_v30 = vsel %vm5812_vm9, %v3190_v63, %v3186_v31  ;;  %4086 = vpow2.f32 %v3779_v34  ;;  %v56_v63 = vld [vmem:[%s8265_s0 + $0xe0] sm:$0xff] }
 0x13d   :  { %v5888_v19 = vadd.f32 %v5361_v55, %v509_v23  ;;  %v3578_v41 = vmul.f32 %v3191_v30, %v5679_v10  ;;  %v1024_v21 = vsub.f32 1.0, %v1023_v37  ;;  %4088 = vpow2.f32 %v3907_v11  ;;  %3702 = vmatmul.msk.f32.gmra.mxu0 %vm93_vm0, %v56_v63  ;;  %3830 = vmatmul.msk.f32.gmra.mxu1 %vm93_vm0, %v56_v63 }
 0x13e   :  { %v5892_v38 = vadd.f32 %v5384_v40, %v2200_v56  ;;  %v4085_v61 = vpop.eup %4084  ;;  %1952 = vst.msk [vmem:[%s8270_s7 + $0x140] sm:$0xff] %vm1911_vm4, %v1887_v16  ;;  %vm1028_vm7 = vweird.f32 %v4083_v47  ;;  %v5900_v35 = vadd.f32 %v5361_v55, %v541_v17  ;;  %v5903_v6 = vadd.f32 %v5384_v40, %v2232_v33 }
 0x13f   :  { %v3748_v50 = vmul.f32 -1.442695, %v5888_v19  ;;  %3642 = vst.msk [vmem:[%s8271_s8 + $0x140] sm:$0xff] %vm1911_vm4, %v3578_v41  ;;  %v1025_v10 = vmul.f32 %v4083_v47, %v1024_v21  ;;  %v5909_v59 = vadd.f32 1.0, %v4085_v61  ;;  %v510_v39 = vmul.f32 %v5393_v43, %v336_v8  ;;  %vm1029_vm15 = vmor %vm1027_vm6, %vm1028_vm7 }
 0x140   :  { %v3876_v29 = vmul.f32 -1.442695, %v5892_v38  ;;  %v3780_v36 = vmul.f32 -1.442695, %v5900_v35  ;;  %v3908_v22 = vmul.f32 -1.442695, %v5903_v6  ;;  %v2201_v9 = vmul.f32 %v5407_v53, %v2027_v42 }
 0x141   :  { %4090 = vpow2.f32 %v3748_v50  ;;  %v1026_v3 = vadd.f32 %v4083_v47, %v1025_v10  ;;  %vm1032_vm11 = vcmp.eq.f32.partialorder %v1031_v25, 8.507059e+37  ;;  %v1034_v46 = vor.u32 1.1754944e-38, %v1033_v14  ;;  %v432_v14 = vpop.f32.mrf.mxu2 }
 0x142   :  { %4092 = vrcp.f32 %v5909_v59  ;;  %v4087_v48 = vpop.eup %4086  ;;  %v5922_v15 = vadd.f32 %v5361_v55, %v510_v39  ;;  %v2722_v1 = vand.u32 2147483647, %v5909_v59  ;;  %v88_v55 = vld [vmem:[%s8265_s0 + $0x1e0] sm:$0xff]  ;;  %v2724_v0 = vand.u32 2147483648, %v5909_v59 }
 0x143   :  { %4094 = vpow2.f32 %v3876_v29  ;;  %v4089_v49 = vpop.eup %4088  ;;  %v1030_v51 = vsel %vm1029_vm15, %v4083_v47, %v1026_v3  ;;  %v5919_v20 = vadd.f32 1.0, %v4087_v48  ;;  %3734 = vmatmul.msk.f32.gmra.mxu2 %vm93_vm0, %v88_v55  ;;  %3862 = vmatmul.msk.f32.gmra.mxu3 %vm93_vm0, %v88_v55  ;;  %vm2718_vm5 = vweird.f32 %v5909_v59 }
 0x144   :  { %4096 = vpow2.f32 %v3780_v36  ;;  %v1035_v24 = vsel %vm1032_vm11, %v1034_v46, %v1030_v51  ;;  %v5924_v2 = vadd.f32 1.0, %v4089_v49  ;;  %v3749_v32 = vmul.f32 -1.442695, %v5922_v15 }
 0x145   :  { %4098 = vpow2.f32 %v3908_v22  ;;  %v1856_v60 = vmul.f32 %v1035_v24, %v5688_v18  ;;  %v1513_v53 = vand.u32 2147483648, %v5919_v20  ;;  %v1511_v7 = vand.u32 2147483647, %v5919_v20 }
 0x146   :  { %4100 = vrcp.f32 %v5919_v20  ;;  %v3204_v44 = vand.u32 2147483648, %v5924_v2  ;;  %vm5954_vm13 = vcmp.eq.f32.partialorder %v2722_v1, 8.507059e+37  ;;  %v3202_v54 = vand.u32 2147483647, %v5924_v2 }
 0x147   :  { %v4091_v62 = vpop.eup %4090  ;;  %4102 = vrcp.f32 %v5924_v2  ;;  %1921 = vst.msk [vmem:[%s8270_s7 + $0x48] sm:$0xff] %vm1911_vm4, %v1856_v60  ;;  %v5961_v25 = vadd.f32 %v5384_v40, %v2201_v9  ;;  %v2725_v11 = vor.u32 1.1754944e-38, %v2724_v0  ;;  %vm1507_vm8 = vweird.f32 %v5919_v20 }
 0x148   :  { %v4093_v18 = vpop.eup %4092  ;;  %v5945_v12 = vadd.f32 1.0, %v4091_v62  ;;  %v1514_v4 = vor.u32 1.1754944e-38, %v1513_v53  ;;  %vm3198_vm1 = vweird.f32 %v5924_v2  ;;  %vm5970_vm12 = vcmp.eq.f32.partialorder %v1511_v7, 8.507059e+37 }
 0x149   :  { %v4095_v5 = vpop.eup %4094  ;;  %v2714_v57 = vmul.f32 %v4093_v18, %v5909_v59  ;;  %vm2719_vm9 = vweird.f32 %v4093_v18  ;;  %v3205_v31 = vor.u32 1.1754944e-38, %v3204_v44  ;;  %vm5976_vm14 = vcmp.eq.f32.partialorder %v3202_v54, 8.507059e+37 }
 0x14a   :  { %v4097_v27 = vpop.eup %4096  ;;  %4104 = vrcp.f32 %v5945_v12  ;;  %v5964_v23 = vadd.f32 1.0, %v4095_v5  ;;  %v1046_v37 = vand.u32 2147483647, %v5945_v12  ;;  %vm1042_vm3 = vweird.f32 %v5945_v12  ;;  %vm2720_vm6 = vmor %vm2718_vm5, %vm2719_vm9 }
 0x14b   :  { %v4099_v13 = vpop.eup %4098  ;;  %v2715_v34 = vsub.f32 1.0, %v2714_v57  ;;  %v5967_v56 = vadd.f32 1.0, %v4097_v27  ;;  %4106 = vpow2.f32 %v3749_v32  ;;  %v1048_v8 = vand.u32 2147483648, %v5945_v12 }
 0x14c   :  { %v4101_v47 = vpop.eup %4100  ;;  %4108 = vrcp.f32 %v5964_v23  ;;  %v5983_v61 = vadd.f32 1.0, %v4099_v13  ;;  %v3877_v50 = vmul.f32 -1.442695, %v5961_v25  ;;  %v542_v39 = vmul.f32 %v5393_v43, %v432_v14 }
 0x14d   :  { %v4103_v17 = vpop.eup %4102  ;;  %v2716_v33 = vmul.f32 %v4093_v18, %v2715_v34  ;;  %v1503_v40 = vmul.f32 %v4101_v47, %v5919_v20  ;;  %vm1508_vm2 = vweird.f32 %v4101_v47  ;;  %4110 = vrcp.f32 %v5967_v56 }
 0x14e   :  { %v3194_v16 = vmul.f32 %v4103_v17, %v5924_v2  ;;  %vm3199_vm10 = vweird.f32 %v4103_v17  ;;  %vm5992_vm7 = vcmp.eq.f32.partialorder %v1046_v37, 8.507059e+37  ;;  %v2737_v49 = vand.u32 2147483647, %v5964_v23  ;;  %vm1509_vm15 = vmor %vm1507_vm8, %vm1508_vm2 }
 0x14f   :  { %v2717_v41 = vadd.f32 %v4093_v18, %v2716_v33  ;;  %v1504_v21 = vsub.f32 1.0, %v1503_v40  ;;  %v2739_v51 = vand.u32 2147483648, %v5964_v23  ;;  %v1049_v1 = vor.u32 1.1754944e-38, %v1048_v8  ;;  %vm3200_vm5 = vmor %vm3198_vm1, %vm3199_vm10  ;;  %v2123_v33 = vpop.f32.mrf.mxu3 }
 0x150   :  { %v4105_v10 = vpop.eup %4104  ;;  %v3195_v29 = vsub.f32 1.0, %v3194_v16  ;;  %vm2733_vm11 = vweird.f32 %v5964_v23  ;;  %v1526_v55 = vand.u32 2147483647, %v5967_v56  ;;  %4112 = vrcp.f32 %v5983_v61  ;;  %v339_v16 = vpop.f32.mrf.mxu0 }
 0x151   :  { %v2721_v36 = vsel %vm2720_vm6, %v4093_v18, %v2717_v41  ;;  %v1505_v22 = vmul.f32 %v4101_v47, %v1504_v21  ;;  %v1038_v3 = vmul.f32 %v4105_v10, %v5945_v12  ;;  %v4107_v46 = vpop.eup %4106  ;;  %vm6019_vm8 = vcmp.eq.f32.partialorder %v2737_v49, 8.507059e+37  ;;  %v57_v41 = vld [vmem:[%s8265_s0 + $0xe8] sm:$0xff] }
 0x152   :  { %v2726_v59 = vsel %vm5954_vm13, %v2725_v11, %v2721_v36  ;;  %v3196_v42 = vmul.f32 %v4103_v17, %v3195_v29  ;;  %v4109_v9 = vpop.eup %4108  ;;  %vm1043_vm13 = vweird.f32 %v4105_v10  ;;  %v2740_v5 = vor.u32 1.1754944e-38, %v2739_v51  ;;  %v6084_v29 = vld [vmem:[%s8268_s5] ss:$0 sm:$0xff]  ;;  %v2030_v36 = vpop.f32.mrf.mxu1  ;;  %3703 = vmatmul.msk.f32.gmra.mxu0 %vm93_vm0, %v57_v41  ;;  %3831 = vmatmul.msk.f32.gmra.mxu1 %vm93_vm0, %v57_v41 }
 0x153   :  { %v3547_v43 = vmul.f32 %v2726_v59, %v5720_v28  ;;  %v1506_v24 = vadd.f32 %v4101_v47, %v1505_v22  ;;  %v1039_v60 = vsub.f32 1.0, %v1038_v3  ;;  %v2729_v20 = vmul.f32 %v4109_v9, %v5964_v23  ;;  %v6015_v0 = vpop.eup %4110  ;;  %vm1044_vm1 = vmor %vm1042_vm3, %vm1043_vm13  ;;  %v89_v22 = vld [vmem:[%s8265_s0 + $0x1e8] sm:$0xff] }
 0x154   :  { %v3197_v63 = vadd.f32 %v4103_v17, %v3196_v42  ;;  %vm1522_vm9 = vweird.f32 %v5967_v56  ;;  %v1518_v52 = vmul.f32 %v6015_v0, %v5967_v56  ;;  %v1528_v13 = vand.u32 2147483648, %v5967_v56  ;;  %v435_v42 = vpop.f32.mrf.mxu2  ;;  %3735 = vmatmul.msk.f32.gmra.mxu2 %vm93_vm0, %v89_v22  ;;  %3863 = vmatmul.msk.f32.gmra.mxu3 %vm93_vm0, %v89_v22  ;;  %v6111_v56 = vld [vmem:[%s8269_s6] ss:$0 sm:$0xff] }
 0x155   :  { %3611 = vst.msk [vmem:[%s8271_s8 + $0x48] sm:$0xff] %vm1911_vm4, %v3547_v43  ;;  %v1510_v28 = vsel %vm1509_vm15, %v4101_v47, %v1506_v24  ;;  %v1040_v62 = vmul.f32 %v4105_v10, %v1039_v60  ;;  %v2730_v44 = vsub.f32 1.0, %v2729_v20  ;;  %4114 = vpow2.f32 %v3877_v50  ;;  %v6119_v43 = vld [vmem:[%s8266_s2] ss:$0 sm:$0xff] }
 0x156   :  { %v1515_v18 = vsel %vm5970_vm12, %v1514_v4, %v1510_v28  ;;  %v3201_v53 = vsel %vm3200_vm5, %v4103_v17, %v3197_v63  ;;  %vm6032_vm12 = vcmp.eq.f32.partialorder %v1526_v55, 8.507059e+37  ;;  %v6043_v12 = vpop.eup %4112  ;;  %v1519_v47 = vsub.f32 1.0, %v1518_v52  ;;  %v6054_v4 = vld [vmem:[%s8267_s3] ss:$0 sm:$0xff] }
 0x157   :  { %v1888_v2 = vmul.f32 %v1515_v18, %v5743_v26  ;;  %v3206_v57 = vsel %vm5976_vm14, %v3205_v31, %v3201_v53  ;;  %v1041_v7 = vadd.f32 %v4105_v10, %v1040_v62  ;;  %v2731_v34 = vmul.f32 %v4109_v9, %v2730_v44  ;;  %v2126_v32 = vpop.f32.mrf.mxu3 }
 0x158   :  { %v3579_v27 = vmul.f32 %v3206_v57, %v5757_v45  ;;  %vm2734_vm14 = vweird.f32 %v4109_v9  ;;  %v6041_v45 = vadd.f32 1.0, %v4107_v46  ;;  %v6057_v17 = vadd.f32 %v6054_v4, %v542_v39  ;;  %v342_v54 = vpop.f32.mrf.mxu0 }
 0x159   :  { %1953 = vst.msk [vmem:[%s8270_s7 + $0x148] sm:$0xff] %vm1911_vm4, %v1888_v2  ;;  %v1045_v26 = vsel %vm1044_vm1, %v4105_v10, %v1041_v7  ;;  %v2732_v58 = vadd.f32 %v4109_v9, %v2731_v34  ;;  %v3209_v31 = vmul.f32 %v6043_v12, %v5983_v61  ;;  %v3219_v37 = vand.u32 2147483648, %v5983_v61  ;;  %vm2735_vm3 = vmor %vm2733_vm11, %vm2734_vm14 }
 0x15a   :  { %3643 = vst.msk [vmem:[%s8271_s8 + $0x148] sm:$0xff] %vm1911_vm4, %v3579_v27  ;;  %v1050_v11 = vsel %vm5992_vm7, %v1049_v1, %v1045_v26  ;;  %v1520_v14 = vmul.f32 %v6015_v0, %v1519_v47  ;;  %vm1523_vm6 = vweird.f32 %v6015_v0  ;;  %vm3213_vm2 = vweird.f32 %v5983_v61 }
 0x15b   :  { %v1857_v40 = vmul.f32 %v1050_v11, %v5888_v19  ;;  %4116 = vrcp.f32 %v6041_v45  ;;  %v2736_v19 = vsel %vm2735_vm3, %v4109_v9, %v2732_v58  ;;  %v1529_v30 = vor.u32 1.1754944e-38, %v1528_v13  ;;  %vm6097_vm10 = vmor %vm1522_vm9, %vm1523_vm6  ;;  %v4115_v49 = vpop.eup %4114 }
 0x15c   :  { %v3210_v8 = vsub.f32 1.0, %v3209_v31  ;;  %v3217_v23 = vand.u32 2147483647, %v5983_v61  ;;  %v2741_v21 = vsel %vm6019_vm8, %v2740_v5, %v2736_v19  ;;  %v1521_v50 = vadd.f32 %v6015_v0, %v1520_v14 }
 0x15d   :  { %1922 = vst.msk [vmem:[%s8270_s7 + $0x50] sm:$0xff] %vm1911_vm4, %v1857_v40  ;;  %v3781_v10 = vmul.f32 -1.442695, %v6057_v17  ;;  %v2233_v39 = vmul.f32 %v6084_v29, %v2123_v33  ;;  %v3548_v3 = vmul.f32 %v2741_v21, %v5892_v38  ;;  %vm3214_vm7 = vweird.f32 %v6043_v12  ;;  %v2033_v21 = vpop.f32.mrf.mxu1 }
 0x15e   :  { %v3211_v46 = vmul.f32 %v6043_v12, %v3210_v8  ;;  %v3220_v59 = vor.u32 1.1754944e-38, %v3219_v37  ;;  %v1525_v38 = vsel %vm6097_vm10, %v6015_v0, %v1521_v50  ;;  %v511_v24 = vmul.f32 %v6119_v43, %v339_v16  ;;  %vm3215_vm15 = vmor %vm3213_vm2, %vm3214_vm7 }
 0x15f   :  { %4118 = vpow2.f32 %v3781_v10  ;;  %v6114_v51 = vadd.f32 %v6111_v56, %v2233_v39  ;;  %3612 = vst.msk [vmem:[%s8271_s8 + $0x50] sm:$0xff] %vm1911_vm4, %v3548_v3  ;;  %v1530_v60 = vsel %vm6032_vm12, %v1529_v30, %v1525_v38  ;;  %v6129_v9 = vadd.f32 1.0, %v4115_v49  ;;  %v58_v30 = vld [vmem:[%s8265_s0 + $0xf0] sm:$0xff] }
 0x160   :  { %v3212_v1 = vadd.f32 %v6043_v12, %v3211_v46  ;;  %v2202_v63 = vmul.f32 %v6084_v29, %v2030_v36  ;;  %v1889_v28 = vmul.f32 %v1530_v60, %v5900_v35  ;;  %v6139_v20 = vadd.f32 %v6054_v4, %v511_v24  ;;  %3704 = vmatmul.msk.f32.gmra.mxu0 %vm93_vm0, %v58_v30 }
 0x161   :  { %v4117_v55 = vpop.eup %4116  ;;  %v3909_v62 = vmul.f32 -1.442695, %v6114_v51  ;;  %v543_v0 = vmul.f32 %v6119_v43, %v435_v42  ;;  %vm3218_vm11 = vcmp.eq.f32.partialorder %v3217_v23, 8.507059e+37  ;;  %4120 = vrcp.f32 %v6129_v9  ;;  %3832 = vmatmul.msk.f32.gmra.mxu1 %vm93_vm0, %v58_v30 }
 0x162   :  { %v3216_v18 = vsel %vm3215_vm15, %v6043_v12, %v3212_v1  ;;  %v1053_v53 = vmul.f32 %v4117_v55, %v6041_v45  ;;  %1954 = vst.msk [vmem:[%s8270_s7 + $0x150] sm:$0xff] %vm1911_vm4, %v1889_v28  ;;  %vm1057_vm5 = vweird.f32 %v6041_v45  ;;  %v1061_v61 = vand.u32 2147483647, %v6041_v45 }
 0x163   :  { %v3221_v35 = vsel %vm3218_vm11, %v3220_v59, %v3216_v18  ;;  %4122 = vpow2.f32 %v3909_v62  ;;  %v3750_v57 = vmul.f32 -1.442695, %v6139_v20  ;;  %vm1058_vm13 = vweird.f32 %v4117_v55 }
 0x164   :  { %v3580_v5 = vmul.f32 %v3221_v35, %v5903_v6  ;;  %v1054_v2 = vsub.f32 1.0, %v1053_v53  ;;  %v1063_v44 = vand.u32 2147483648, %v6041_v45  ;;  %v6155_v27 = vadd.f32 %v6111_v56, %v2202_v63  ;;  %vm1059_vm8 = vmor %vm1057_vm5, %vm1058_vm13  ;;  %v90_v45 = vld [vmem:[%s8265_s0 + $0x1f0] sm:$0xff] }
 0x165   :  { %v4119_v7 = vpop.eup %4118  ;;  %v6158_v52 = vadd.f32 %v6054_v4, %v543_v0  ;;  %4124 = vpow2.f32 %v3750_v57  ;;  %v2234_v26 = vmul.f32 %v6084_v29, %v2126_v32  ;;  %v2752_v33 = vand.u32 2147483647, %v6129_v9  ;;  %3736 = vmatmul.msk.f32.gmra.mxu2 %vm93_vm0, %v90_v45  ;;  %3864 = vmatmul.msk.f32.gmra.mxu3 %vm93_vm0, %v90_v45 }
 0x166   :  { %3644 = vst.msk [vmem:[%s8271_s8 + $0x150] sm:$0xff] %vm1911_vm4, %v3580_v5  ;;  %v1055_v6 = vmul.f32 %v4117_v55, %v1054_v2  ;;  %v6164_v13 = vadd.f32 1.0, %v4119_v7  ;;  %v3878_v34 = vmul.f32 -1.442695, %v6155_v27  ;;  %v512_v40 = vmul.f32 %v6119_v43, %v342_v54 }
 0x167   :  { %v3782_v12 = vmul.f32 -1.442695, %v6158_v52  ;;  %v4121_v11 = vpop.eup %4120  ;;  %v1064_v58 = vor.u32 1.1754944e-38, %v1063_v44  ;;  %v2754_v37 = vand.u32 2147483648, %v6129_v9  ;;  %vm1062_vm9 = vcmp.eq.f32.partialorder %v1061_v61, 8.507059e+37 }
 0x168   :  { %v1056_v47 = vadd.f32 %v4117_v55, %v1055_v6  ;;  %4126 = vrcp.f32 %v6164_v13  ;;  %v2744_v31 = vmul.f32 %v4121_v11, %v6129_v9  ;;  %v6178_v19 = vadd.f32 %v6111_v56, %v2234_v26 }
 0x169   :  { %4128 = vpow2.f32 %v3878_v34  ;;  %v4123_v14 = vpop.eup %4122  ;;  %vm2748_vm1 = vweird.f32 %v6129_v9  ;;  %vm6192_vm12 = vcmp.eq.f32.partialorder %v2752_v33, 8.507059e+37  ;;  %v6198_v22 = vadd.f32 %v6054_v4, %v512_v40 }
 0x16a   :  { %v1060_v16 = vsel %vm1059_vm8, %v4117_v55, %v1056_v47  ;;  %4130 = vpow2.f32 %v3782_v12  ;;  %v2745_v23 = vsub.f32 1.0, %v2744_v31  ;;  %v6187_v41 = vadd.f32 1.0, %v4123_v14 }
 0x16b   :  { %v1065_v8 = vsel %vm1062_vm9, %v1064_v58, %v1060_v16  ;;  %v4125_v50 = vpop.eup %4124  ;;  %v3910_v36 = vmul.f32 -1.442695, %v6178_v19  ;;  %vm2749_vm14 = vweird.f32 %v4121_v11  ;;  %v2755_v48 = vor.u32 1.1754944e-38, %v2754_v37 }
 0x16c   :  { %v1858_v10 = vmul.f32 %v1065_v8, %v5922_v15  ;;  %v2746_v3 = vmul.f32 %v4121_v11, %v2745_v23  ;;  %4132 = vrcp.f32 %v6187_v41  ;;  %vm1537_vm3 = vweird.f32 %v6164_v13  ;;  %vm2750_vm6 = vmor %vm2748_vm1, %vm2749_vm14 }
 0x16d   :  { %v6208_v15 = vadd.f32 1.0, %v4125_v50  ;;  %v3751_v59 = vmul.f32 -1.442695, %v6198_v22  ;;  %v2203_v42 = vmul.f32 %v6084_v29, %v2033_v21  ;;  %v1541_v60 = vand.u32 2147483647, %v6164_v13 }
 0x16e   :  { %v4127_v46 = vpop.eup %4126  ;;  %1923 = vst.msk [vmem:[%s8270_s7 + $0x58] sm:$0xff] %vm1911_vm4, %v1858_v10  ;;  %v2747_v38 = vadd.f32 %v4121_v11, %v2746_v3  ;;  %4134 = vpow2.f32 %v3910_v36  ;;  %v1543_v63 = vand.u32 2147483648, %v6164_v13  ;;  %v3232_v55 = vand.u32 2147483647, %v6187_v41 }
 0x16f   :  { %v4129_v49 = vpop.eup %4128  ;;  %v1533_v24 = vmul.f32 %v4127_v46, %v6164_v13  ;;  %v3234_v28 = vand.u32 2147483648, %v6187_v41  ;;  %4136 = vrcp.f32 %v6208_v15  ;;  %vm1538_vm2 = vweird.f32 %v4127_v46 }
 0x170   :  { %v4131_v1 = vpop.eup %4130  ;;  %v2751_v62 = vsel %vm2750_vm6, %v4121_v11, %v2747_v38  ;;  %v6221_v18 = vadd.f32 1.0, %v4129_v49  ;;  %v1076_v35 = vand.u32 2147483647, %v6208_v15  ;;  %4138 = vpow2.f32 %v3751_v59  ;;  %vm1539_vm11 = vmor %vm1537_vm3, %vm1538_vm2 }
 0x171   :  { %v1534_v0 = vsub.f32 1.0, %v1533_v24  ;;  %v2756_v53 = vsel %vm6192_vm12, %v2755_v48, %v2751_v62  ;;  %v6226_v9 = vadd.f32 1.0, %v4131_v1  ;;  %v1078_v2 = vand.u32 2147483648, %v6208_v15  ;;  %v438_v48 = vpop.f32.mrf.mxu2 }
 0x172   :  { %v4133_v61 = vpop.eup %4132  ;;  %v3549_v32 = vmul.f32 %v2756_v53, %v5961_v25  ;;  %4140 = vrcp.f32 %v6221_v18  ;;  %vm6231_vm10 = vcmp.eq.f32.partialorder %v1541_v60, 8.507059e+37  ;;  %v1544_v7 = vor.u32 1.1754944e-38, %v1543_v63  ;;  %v2129_v60 = vpop.f32.mrf.mxu3 }
 0x173   :  { %v1535_v5 = vmul.f32 %v4127_v46, %v1534_v0  ;;  %v3224_v44 = vmul.f32 %v4133_v61, %v6187_v41  ;;  %v6237_v54 = vadd.f32 %v6111_v56, %v2203_v42  ;;  %vm3228_vm7 = vweird.f32 %v6187_v41 }
 0x174   :  { %v4135_v6 = vpop.eup %4134  ;;  %3613 = vst.msk [vmem:[%s8271_s8 + $0x58] sm:$0xff] %vm1911_vm4, %v3549_v32  ;;  %vm6244_vm15 = vcmp.eq.f32.partialorder %v3232_v55, 8.507059e+37  ;;  %4142 = vrcp.f32 %v6226_v9  ;;  %v3235_v11 = vor.u32 1.1754944e-38, %v3234_v28  ;;  %vm1072_vm5 = vweird.f32 %v6208_v15 }
 0x175   :  { %v1536_v25 = vadd.f32 %v4127_v46, %v1535_v5  ;;  %v4137_v34 = vpop.eup %4136  ;;  %v3225_v12 = vsub.f32 1.0, %v3224_v44  ;;  %v2767_v47 = vand.u32 2147483647, %v6221_v18  ;;  %vm6255_vm13 = vcmp.eq.f32.partialorder %v1076_v35, 8.507059e+37 }
 0x176   :  { %v1068_v40 = vmul.f32 %v4137_v34, %v6208_v15  ;;  %v1079_v31 = vor.u32 1.1754944e-38, %v1078_v2  ;;  %v2769_v37 = vand.u32 2147483648, %v6221_v18  ;;  %v4139_v14 = vpop.eup %4138  ;;  %vm3229_vm8 = vweird.f32 %v4133_v61 }
 0x177   :  { %v1540_v33 = vsel %vm1539_vm11, %v4127_v46, %v1536_v25  ;;  %v3226_v16 = vmul.f32 %v4133_v61, %v3225_v12  ;;  %v1556_v30 = vand.u32 2147483647, %v6226_v9  ;;  %vm2763_vm9 = vweird.f32 %v6221_v18  ;;  %vm3230_vm14 = vmor %vm3228_vm7, %vm3229_vm8 }
 0x178   :  { %v1545_v13 = vsel %vm6231_vm10, %v1544_v7, %v1540_v33  ;;  %v4141_v45 = vpop.eup %4140  ;;  %v1069_v23 = vsub.f32 1.0, %v1068_v40  ;;  %v6265_v21 = vadd.f32 1.0, %v4135_v6  ;;  %vm6268_vm1 = vcmp.eq.f32.partialorder %v2767_v47, 8.507059e+37  ;;  %v345_v6 = vpop.f32.mrf.mxu0  ;;  %v59_v33 = vld [vmem:[%s8265_s0 + $0xf8] sm:$0xff] }
 0x179   :  { %v1890_v8 = vmul.f32 %v1545_v13, %v6057_v17  ;;  %v3227_v50 = vadd.f32 %v4133_v61, %v3226_v16  ;;  %v2759_v10 = vmul.f32 %v4141_v45, %v6221_v18  ;;  %vm1552_vm12 = vweird.f32 %v6226_v9  ;;  %v91_v40 = vld [vmem:[%s8265_s0 + $0x1f8] sm:$0xff]  ;;  %v2036_v13 = vpop.f32.mrf.mxu1  ;;  %v441_v16 = vpop.f32.mrf.mxu2  ;;  %3705 = vmatmul.msk.f32.gmra.mxu0 %vm93_vm0, %v59_v33  ;;  %3833 = vmatmul.msk.f32.gmra.mxu1 %vm93_vm0, %v59_v33 }
 0x17a   :  { %v1558_v36 = vand.u32 2147483648, %v6226_v9  ;;  %v6274_v3 = vadd.f32 1.0, %v4139_v14  ;;  %v6276_v17 = vpop.eup %4142  ;;  %v1070_v46 = vmul.f32 %v4137_v34, %v1069_v23  ;;  %vm1073_vm3 = vweird.f32 %v4137_v34  ;;  %3737 = vmatmul.msk.f32.gmra.mxu2 %vm93_vm0, %v91_v40  ;;  %3865 = vmatmul.msk.f32.gmra.mxu3 %vm93_vm0, %v91_v40  ;;  %v2132_v39 = vpop.f32.mrf.mxu3 }
 0x17b   :  { %1955 = vst.msk [vmem:[%s8270_s7 + $0x158] sm:$0xff] %vm1911_vm4, %v1890_v8  ;;  %v2770_v59 = vor.u32 1.1754944e-38, %v2769_v37  ;;  %4144 = vrcp.f32 %v6265_v21  ;;  %v3231_v42 = vsel %vm3230_vm14, %v4133_v61, %v3227_v50  ;;  %v2760_v49 = vsub.f32 1.0, %v2759_v10  ;;  %vm1074_vm10 = vmor %vm1072_vm5, %vm1073_vm3 }
 0x17c   :  { %vm2764_vm6 = vweird.f32 %v4141_v45  ;;  %v1548_v38 = vmul.f32 %v6276_v17, %v6226_v9  ;;  %vm6288_vm2 = vcmp.eq.f32.partialorder %v1556_v30, 8.507059e+37  ;;  %v3236_v41 = vsel %vm6244_vm15, %v3235_v11, %v3231_v42 }
 0x17d   :  { %v1071_v1 = vadd.f32 %v4137_v34, %v1070_v46  ;;  %v3249_v63 = vand.u32 2147483648, %v6265_v21  ;;  %v3879_v55 = vmul.f32 -1.442695, %v6237_v54  ;;  %v3581_v28 = vmul.f32 %v3236_v41, %v6114_v51  ;;  %vm2765_vm11 = vmor %vm2763_vm9, %vm2764_vm6 }
 0x17e   :  { %v2761_v62 = vmul.f32 %v4141_v45, %v2760_v49  ;;  %v1549_v0 = vsub.f32 1.0, %v1548_v38  ;;  %4146 = vrcp.f32 %v6274_v3  ;;  %vm1553_vm7 = vweird.f32 %v6276_v17 }
 0x17f   :  { %v1075_v53 = vsel %vm1074_vm10, %v4137_v34, %v1071_v1  ;;  %v1559_v35 = vor.u32 1.1754944e-38, %v1558_v36  ;;  %v3247_v61 = vand.u32 2147483647, %v6265_v21  ;;  %3645 = vst.msk [vmem:[%s8271_s8 + $0x158] sm:$0xff] %vm1911_vm4, %v3581_v28  ;;  %vm3243_vm15 = vweird.f32 %v6265_v21 }
 0x180   :  { %v1080_v51 = vsel %vm6255_vm13, %v1079_v31, %v1075_v53  ;;  %v2762_v15 = vadd.f32 %v4141_v45, %v2761_v62  ;;  %v1550_v32 = vmul.f32 %v6276_v17, %v1549_v0  ;;  %v3250_v5 = vor.u32 1.1754944e-38, %v3249_v63  ;;  %vm6330_vm13 = vmor %vm1552_vm12, %vm1553_vm7  ;;  %v348_v28 = vpop.f32.mrf.mxu0 }
 0x181   :  { %v4145_v2 = vpop.eup %4144  ;;  %v1859_v57 = vmul.f32 %v1080_v51, %v6139_v20  ;;  %vm1087_vm5 = vweird.f32 %v6274_v3  ;;  %v1091_v7 = vand.u32 2147483647, %v6274_v3  ;;  %4148 = vpow2.f32 %v3879_v55 }
 0x182   :  { %v544_v44 = vmul.f32 %v6119_v43, %v438_v48  ;;  %v2766_v25 = vsel %vm2765_vm11, %v4141_v45, %v2762_v15  ;;  %v1551_v26 = vadd.f32 %v6276_v17, %v1550_v32  ;;  %v3239_v34 = vmul.f32 %v4145_v2, %v6265_v21 }
 0x183   :  { %v1093_v12 = vand.u32 2147483648, %v6274_v3  ;;  %1924 = vst.msk [vmem:[%s8270_s7 + $0x60] sm:$0xff] %vm1911_vm4, %v1859_v57  ;;  %v2771_v20 = vsel %vm6268_vm1, %v2770_v59, %v2766_v25  ;;  %vm3244_vm8 = vweird.f32 %v4145_v2  ;;  %v2235_v47 = vmul.f32 %v6084_v29, %v2129_v60 }
 0x184   :  { %v6335_v11 = vadd.f32 %v6054_v4, %v544_v44  ;;  %v4147_v58 = vpop.eup %4146  ;;  %v3550_v9 = vmul.f32 %v2771_v20, %v6155_v27  ;;  %v1555_v31 = vsel %vm6330_vm13, %v6276_v17, %v1551_v26  ;;  %v3240_v37 = vsub.f32 1.0, %v3239_v34  ;;  %vm3245_vm0 = vmor %vm3243_vm15, %vm3244_vm8 }
 0x185   :  { %v513_v14 = vmul.f32 %v6119_v43, %v345_v6  ;;  %v1560_v30 = vsel %vm6288_vm2, %v1559_v35, %v1555_v31  ;;  %v1083_v45 = vmul.f32 %v4147_v58, %v6274_v3  ;;  %vm1088_vm9 = vweird.f32 %v4147_v58  ;;  %v444_v31 = vpop.f32.mrf.mxu2 }
 0x186   :  { %v3783_v27 = vmul.f32 -1.442695, %v6335_v11  ;;  %3614 = vst.msk [vmem:[%s8271_s8 + $0x60] sm:$0xff] %vm1911_vm4, %v3550_v9  ;;  %v1891_v8 = vmul.f32 %v1560_v30, %v6158_v52  ;;  %v3241_v23 = vmul.f32 %v4145_v2, %v3240_v37  ;;  %v6363_v50 = vadd.f32 %v6111_v56, %v2235_v47  ;;  %vm1089_vm12 = vmor %vm1087_vm5, %vm1088_vm9 }
 0x187   :  { %v6366_v10 = vadd.f32 %v6054_v4, %v513_v14  ;;  %v4149_v36 = vpop.eup %4148  ;;  %v1084_v48 = vsub.f32 1.0, %v1083_v45  ;;  %v2204_v17 = vmul.f32 %v6084_v29, %v2036_v13  ;;  %v545_v46 = vmul.f32 %v6119_v43, %v441_v16 }
 0x188   :  { %4150 = vpow2.f32 %v3783_v27  ;;  %1956 = vst.msk [vmem:[%s8270_s7 + $0x160] sm:$0xff] %vm1911_vm4, %v1891_v8  ;;  %v3242_v52 = vadd.f32 %v4145_v2, %v3241_v23  ;;  %v6374_v59 = vadd.f32 1.0, %v4149_v36  ;;  %v3911_v42 = vmul.f32 -1.442695, %v6363_v50 }
 0x189   :  { %v3752_v49 = vmul.f32 -1.442695, %v6366_v10  ;;  %v1085_v38 = vmul.f32 %v4147_v58, %v1084_v48  ;;  %v6382_v24 = vadd.f32 %v6111_v56, %v2204_v17  ;;  %v6385_v60 = vadd.f32 %v6054_v4, %v545_v46 }
 0x18a   :  { %v2236_v41 = vmul.f32 %v6084_v29, %v2132_v39  ;;  %v3246_v1 = vsel %vm3245_vm0, %v4145_v2, %v3242_v52  ;;  %vm3248_vm1 = vcmp.eq.f32.partialorder %v3247_v61, 8.507059e+37  ;;  %4152 = vrcp.f32 %v6374_v59  ;;  %v2039_v2 = vpop.f32.mrf.mxu1 }
 0x18b   :  { %v3251_v63 = vsel %vm3248_vm1, %v3250_v5, %v3246_v1  ;;  %v1086_v55 = vadd.f32 %v4147_v58, %v1085_v38  ;;  %4154 = vpow2.f32 %v3911_v42  ;;  %v1094_v0 = vor.u32 1.1754944e-38, %v1093_v12 }
 0x18c   :  { %v3582_v62 = vmul.f32 %v3251_v63, %v6178_v19  ;;  %4156 = vpow2.f32 %v3752_v49  ;;  %v3880_v53 = vmul.f32 -1.442695, %v6382_v24  ;;  %vm1092_vm14 = vcmp.eq.f32.partialorder %v1091_v7, 8.507059e+37 }
 0x18d   :  { %v1090_v51 = vsel %vm1089_vm12, %v4147_v58, %v1086_v55  ;;  %v3784_v21 = vmul.f32 -1.442695, %v6385_v60  ;;  %v6400_v61 = vadd.f32 %v6111_v56, %v2236_v41  ;;  %v514_v32 = vmul.f32 %v6119_v43, %v348_v28 }
 0x18e   :  { %v4151_v35 = vpop.eup %4150  ;;  %3646 = vst.msk [vmem:[%s8271_s8 + $0x160] sm:$0xff] %vm1911_vm4, %v3582_v62  ;;  %v1095_v19 = vsel %vm1092_vm14, %v1094_v0, %v1090_v51  ;;  %4158 = vpow2.f32 %v3880_v53  ;;  %v2782_v7 = vand.u32 2147483647, %v6374_v59  ;;  %v2784_v44 = vand.u32 2147483648, %v6374_v59 }
 0x18f   :  { %v6406_v15 = vadd.f32 1.0, %v4151_v35  ;;  %v1860_v5 = vmul.f32 %v1095_v19, %v6198_v22  ;;  %4160 = vpow2.f32 %v3784_v21  ;;  %v3912_v3 = vmul.f32 -1.442695, %v6400_v61 }
 0x190   :  { %v4153_v57 = vpop.eup %4152  ;;  %v6423_v12 = vadd.f32 %v6054_v4, %v514_v32  ;;  %v2205_v20 = vmul.f32 %v6084_v29, %v2039_v2  ;;  %vm2778_vm3 = vweird.f32 %v6374_v59  ;;  %vm6430_vm6 = vcmp.eq.f32.partialorder %v2782_v7, 8.507059e+37 }
 0x191   :  { %4162 = vrcp.f32 %v6406_v15  ;;  %v4155_v6 = vpop.eup %4154  ;;  %1925 = vst.msk [vmem:[%s8270_s7 + $0x68] sm:$0xff] %vm1911_vm4, %v1860_v5  ;;  %v2774_v25 = vmul.f32 %v4153_v57, %v6374_v59  ;;  %v1573_v26 = vand.u32 2147483648, %v6406_v15  ;;  %v1571_v47 = vand.u32 2147483647, %v6406_v15 }
 0x192   :  { %4164 = vpow2.f32 %v3912_v3  ;;  %v4157_v22 = vpop.eup %4156  ;;  %v6420_v34 = vadd.f32 1.0, %v4155_v6  ;;  %v2785_v9 = vor.u32 1.1754944e-38, %v2784_v44  ;;  %vm2779_vm2 = vweird.f32 %v4153_v57  ;;  %v2042_v53 = vpop.f32.mrf.mxu1 }
 0x193   :  { %v2775_v18 = vsub.f32 1.0, %v2774_v25  ;;  %v6427_v33 = vadd.f32 1.0, %v4157_v22  ;;  %vm1567_vm10 = vweird.f32 %v6406_v15  ;;  %v1574_v16 = vor.u32 1.1754944e-38, %v1573_v26  ;;  %vm2780_vm15 = vmor %vm2778_vm3, %vm2779_vm2 }
 0x194   :  { %v4159_v40 = vpop.eup %4158  ;;  %4166 = vrcp.f32 %v6420_v34  ;;  %v3753_v45 = vmul.f32 -1.442695, %v6423_v12  ;;  %v6441_v27 = vadd.f32 %v6111_v56, %v2205_v20  ;;  %vm6444_vm7 = vcmp.eq.f32.partialorder %v1571_v47, 8.507059e+37 }
 0x195   :  { %v4161_v37 = vpop.eup %4160  ;;  %v2776_v14 = vmul.f32 %v4153_v57, %v2775_v18  ;;  %4168 = vrcp.f32 %v6427_v33  ;;  %v6437_v30 = vadd.f32 1.0, %v4159_v40  ;;  %v3262_v48 = vand.u32 2147483647, %v6420_v34 }
 0x196   :  { %v6450_v17 = vmul.f32 %v6119_v43, %v444_v31  ;;  %v3264_v46 = vand.u32 2147483648, %v6420_v34  ;;  %vm1102_vm11 = vweird.f32 %v6427_v33  ;;  %v1106_v52 = vand.u32 2147483647, %v6427_v33 }
 0x197   :  { %v4163_v13 = vpop.eup %4162  ;;  %v2777_v23 = vadd.f32 %v4153_v57, %v2776_v14  ;;  %4170 = vrcp.f32 %v6437_v30  ;;  %vm3258_vm5 = vweird.f32 %v6420_v34  ;;  %v1108_v38 = vand.u32 2147483648, %v6427_v33 }
 0x198   :  { %v4165_v8 = vpop.eup %4164  ;;  %v1563_v39 = vmul.f32 %v4163_v13, %v6406_v15  ;;  %v6460_v41 = vadd.f32 1.0, %v4161_v37  ;;  %vm1568_vm13 = vweird.f32 %v4163_v13  ;;  %4172 = vpow2.f32 %v3753_v45 }
 0x199   :  { %v2781_v42 = vsel %vm2780_vm15, %v4153_v57, %v2777_v23  ;;  %v6464_v63 = vadd.f32 1.0, %v4165_v8  ;;  %vm6468_vm8 = vcmp.eq.f32.partialorder %v3262_v48, 8.507059e+37  ;;  %v2797_v35 = vand.u32 2147483647, %v6437_v30  ;;  %vm1569_vm0 = vmor %vm1567_vm10, %vm1568_vm13  ;;  %v2135_v8 = vpop.f32.mrf.mxu3 }
 0x19a   :  { %v1564_v49 = vsub.f32 1.0, %v1563_v39  ;;  %v4167_v1 = vpop.eup %4166  ;;  %v2786_v59 = vsel %vm6430_vm6, %v2785_v9, %v2781_v42  ;;  %v3265_v51 = vor.u32 1.1754944e-38, %v3264_v46  ;;  %v2799_v19 = vand.u32 2147483648, %v6437_v30 }
 0x19b   :  { %v4169_v55 = vpop.eup %4168  ;;  %v3551_v28 = vmul.f32 %v2786_v59, %v6237_v54  ;;  %v3254_v0 = vmul.f32 %v4167_v1, %v6420_v34  ;;  %4174 = vrcp.f32 %v6460_v41  ;;  %vm6480_vm9 = vcmp.eq.f32.partialorder %v1106_v52, 8.507059e+37 }
 0x19c   :  { %v1565_v62 = vmul.f32 %v4163_v13, %v1564_v49  ;;  %v1098_v21 = vmul.f32 %v4169_v55, %v6427_v33  ;;  %v1109_v3 = vor.u32 1.1754944e-38, %v1108_v38  ;;  %vm3259_vm1 = vweird.f32 %v4167_v1 }
 0x19d   :  { %3615 = vst.msk [vmem:[%s8271_s8 + $0x68] sm:$0xff] %vm1911_vm4, %v3551_v28  ;;  %v3255_v32 = vsub.f32 1.0, %v3254_v0  ;;  %v4171_v2 = vpop.eup %4170  ;;  %vm2793_vm12 = vweird.f32 %v6437_v30  ;;  %4176 = vrcp.f32 %v6464_v63  ;;  %vm6490_vm14 = vcmp.eq.f32.partialorder %v2797_v35, 8.507059e+37  ;;  %vm3260_vm2 = vmor %vm3258_vm5, %vm3259_vm1  ;;  %v447_v35 = vpop.f32.mrf.mxu2 }
 0x19e   :  { %v1566_v54 = vadd.f32 %v4163_v13, %v1565_v62  ;;  %v1099_v57 = vsub.f32 1.0, %v1098_v21  ;;  %v2789_v6 = vmul.f32 %v4171_v2, %v6437_v30  ;;  %v1586_v22 = vand.u32 2147483647, %v6460_v41  ;;  %v4173_v26 = vpop.eup %4172 }
 0x19f   :  { %v3256_v44 = vmul.f32 %v4167_v1, %v3255_v32  ;;  %vm1103_vm3 = vweird.f32 %v4169_v55  ;;  %v2800_v18 = vor.u32 1.1754944e-38, %v2799_v19  ;;  %vm1582_vm6 = vweird.f32 %v6460_v41 }
 0x1a0   :  { %v1570_v7 = vsel %vm1569_vm0, %v4163_v13, %v1566_v54  ;;  %v1100_v20 = vmul.f32 %v4169_v55, %v1099_v57  ;;  %v2790_v58 = vsub.f32 1.0, %v2789_v6  ;;  %vm2794_vm10 = vweird.f32 %v4171_v2 }
 0x1a1   :  { %v1575_v15 = vsel %vm6444_vm7, %v1574_v16, %v1570_v7  ;;  %v3257_v40 = vadd.f32 %v4167_v1, %v3256_v44  ;;  %v4175_v9 = vpop.eup %4174  ;;  %v1588_v37 = vand.u32 2147483648, %v6460_v41  ;;  %v6503_v14 = vadd.f32 1.0, %v4173_v26  ;;  %vm1104_vm7 = vmor %vm1102_vm11, %vm1103_vm3 }
 0x1a2   :  { %v1892_v47 = vmul.f32 %v1575_v15, %v6335_v11  ;;  %v1101_v31 = vadd.f32 %v4169_v55, %v1100_v20  ;;  %v2791_v13 = vmul.f32 %v4171_v2, %v2790_v58  ;;  %v1578_v16 = vmul.f32 %v4175_v9, %v6460_v41  ;;  %vm2795_vm11 = vmor %vm2793_vm12, %vm2794_vm10  ;;  %v2138_v15 = vpop.f32.mrf.mxu3 }
 0x1a3   :  { %v3261_v11 = vsel %vm3260_vm2, %v4167_v1, %v3257_v40  ;;  %vm6512_vm15 = vcmp.eq.f32.partialorder %v1586_v22, 8.507059e+37  ;;  %v3277_v45 = vand.u32 2147483647, %v6464_v63  ;;  %v4177_v23 = vpop.eup %4176  ;;  %vm3273_vm5 = vweird.f32 %v6464_v63 }
 0x1a4   :  { %1957 = vst.msk [vmem:[%s8270_s7 + $0x168] sm:$0xff] %vm1911_vm4, %v1892_v47  ;;  %v3266_v39 = vsel %vm6468_vm8, %v3265_v51, %v3261_v11  ;;  %v1105_v36 = vsel %vm1104_vm7, %v4169_v55, %v1101_v31  ;;  %v3279_v33 = vand.u32 2147483648, %v6464_v63  ;;  %v3881_v48 = vmul.f32 -1.442695, %v6441_v27  ;;  %v351_v55 = vpop.f32.mrf.mxu0 }
 0x1a5   :  { %v3583_v46 = vmul.f32 %v3266_v39, %v6363_v50  ;;  %v1110_v52 = vsel %vm6480_vm9, %v1109_v3, %v1105_v36  ;;  %v2792_v42 = vadd.f32 %v4171_v2, %v2791_v13  ;;  %v1579_v49 = vsub.f32 1.0, %v1578_v16 }
 0x1a6   :  { %v1861_v38 = vmul.f32 %v1110_v52, %v6366_v10  ;;  %v1589_v1 = vor.u32 1.1754944e-38, %v1588_v37  ;;  %v3269_v59 = vmul.f32 %v4177_v23, %v6464_v63  ;;  %4178 = vrcp.f32 %v6503_v14 }
 0x1a7   :  { %3647 = vst.msk [vmem:[%s8271_s8 + $0x168] sm:$0xff] %vm1911_vm4, %v3583_v46  ;;  %v2796_v50 = vsel %vm2795_vm11, %v4171_v2, %v2792_v42  ;;  %v1580_v28 = vmul.f32 %v4175_v9, %v1579_v49  ;;  %vm1583_vm13 = vweird.f32 %v4175_v9  ;;  %vm6535_vm8 = vcmp.eq.f32.partialorder %v3277_v45, 8.507059e+37 }
 0x1a8   :  { %1926 = vst.msk [vmem:[%s8270_s7 + $0x70] sm:$0xff] %vm1911_vm4, %v1861_v38  ;;  %v2801_v30 = vsel %vm6490_vm14, %v2800_v18, %v2796_v50  ;;  %v3270_v62 = vsub.f32 1.0, %v3269_v59  ;;  %v3280_v0 = vor.u32 1.1754944e-38, %v3279_v33  ;;  %4180 = vpow2.f32 %v3881_v48  ;;  %vm1584_vm0 = vmor %vm1582_vm6, %vm1583_vm13 }
 0x1a9   :  { %v3552_v51 = vmul.f32 %v2801_v30, %v6382_v24  ;;  %v1581_v21 = vadd.f32 %v4175_v9, %v1580_v28  ;;  %vm3274_vm9 = vweird.f32 %v4177_v23  ;;  %v6548_v19 = vadd.f32 %v6054_v4, %v6450_v17  ;;  %v2045_v28 = vpop.f32.mrf.mxu1 }
 0x1aa   :  { %v3271_v54 = vmul.f32 %v4177_v23, %v3270_v62  ;;  %vm1117_vm1 = vweird.f32 %v6503_v14  ;;  %v2237_v32 = vmul.f32 %v6084_v29, %v2135_v8  ;;  %v515_v5 = vmul.f32 %v6119_v43, %v351_v55  ;;  %vm3275_vm12 = vmor %vm3273_vm5, %vm3274_vm9 }
 0x1ab   :  { %3616 = vst.msk [vmem:[%s8271_s8 + $0x70] sm:$0xff] %vm1911_vm4, %v3552_v51  ;;  %v1585_v24 = vsel %vm1584_vm0, %v4175_v9, %v1581_v21  ;;  %v3785_v3 = vmul.f32 -1.442695, %v6548_v19  ;;  %v2206_v17 = vmul.f32 %v6084_v29, %v2042_v53  ;;  %v547_v41 = vmul.f32 %v6119_v43, %v447_v35 }
 0x1ac   :  { %v4179_v2 = vpop.eup %4178  ;;  %v1590_v57 = vsel %vm6512_vm15, %v1589_v1, %v1585_v24  ;;  %v3272_v7 = vadd.f32 %v4177_v23, %v3271_v54  ;;  %v6565_v44 = vadd.f32 %v6111_v56, %v2237_v32  ;;  %v6568_v6 = vadd.f32 %v6054_v4, %v515_v5  ;;  %v354_v16 = vpop.f32.mrf.mxu0 }
 0x1ad   :  { %v1893_v25 = vmul.f32 %v1590_v57, %v6385_v60  ;;  %v1113_v22 = vmul.f32 %v4179_v2, %v6503_v14  ;;  %v1123_v26 = vand.u32 2147483648, %v6503_v14  ;;  %4182 = vpow2.f32 %v3785_v3 }
 0x1ae   :  { %v4181_v20 = vpop.eup %4180  ;;  %v3276_v18 = vsel %vm3275_vm12, %v4177_v23, %v3272_v7  ;;  %v3913_v47 = vmul.f32 -1.442695, %v6565_v44  ;;  %v3754_v40 = vmul.f32 -1.442695, %v6568_v6  ;;  %v6579_v58 = vadd.f32 %v6111_v56, %v2206_v17 }
 0x1af   :  { %1958 = vst.msk [vmem:[%s8270_s7 + $0x170] sm:$0xff] %vm1911_vm4, %v1893_v25  ;;  %v3281_v60 = vsel %vm6535_vm8, %v3280_v0, %v3276_v18  ;;  %v1114_v63 = vsub.f32 1.0, %v1113_v22  ;;  %v6587_v9 = vadd.f32 1.0, %v4181_v20  ;;  %v6590_v31 = vadd.f32 %v6054_v4, %v547_v41  ;;  %v450_v0 = vpop.f32.mrf.mxu2 }
 0x1b0   :  { %v3584_v37 = vmul.f32 %v3281_v60, %v6400_v61  ;;  %4184 = vpow2.f32 %v3913_v47  ;;  %v3882_v11 = vmul.f32 -1.442695, %v6579_v58  ;;  %v2238_v13 = vmul.f32 %v6084_v29, %v2138_v15 }
 0x1b1   :  { %v1115_v34 = vmul.f32 %v4179_v2, %v1114_v63  ;;  %vm1118_vm14 = vweird.f32 %v4179_v2  ;;  %v1121_v45 = vand.u32 2147483647, %v6503_v14  ;;  %4186 = vrcp.f32 %v6587_v9 }
 0x1b2   :  { %3648 = vst.msk [vmem:[%s8271_s8 + $0x170] sm:$0xff] %vm1911_vm4, %v3584_v37  ;;  %v1124_v8 = vor.u32 1.1754944e-38, %v1123_v26  ;;  %4188 = vpow2.f32 %v3754_v40  ;;  %v3786_v61 = vmul.f32 -1.442695, %v6590_v31  ;;  %v6603_v36 = vadd.f32 %v6111_v56, %v2238_v13  ;;  %vm1119_vm3 = vmor %vm1117_vm1, %vm1118_vm14 }
 0x1b3   :  { %v4183_v23 = vpop.eup %4182  ;;  %v1116_v39 = vadd.f32 %v4179_v2, %v1115_v34  ;;  %4190 = vpow2.f32 %v3882_v11  ;;  %v516_v33 = vmul.f32 %v6119_v43, %v354_v16  ;;  %v2812_v48 = vand.u32 2147483647, %v6587_v9 }
 0x1b4   :  { %v2814_v46 = vand.u32 2147483648, %v6587_v9  ;;  %v6610_v52 = vadd.f32 1.0, %v4183_v23  ;;  %4192 = vpow2.f32 %v3786_v61  ;;  %vm1122_vm6 = vcmp.eq.f32.partialorder %v1121_v45, 8.507059e+37 }
 0x1b5   :  { %v1120_v42 = vsel %vm1119_vm3, %v4179_v2, %v1116_v39  ;;  %v6613_v49 = vadd.f32 %v6054_v4, %v516_v33  ;;  %v3914_v50 = vmul.f32 -1.442695, %v6603_v36  ;;  %vm2808_vm2 = vweird.f32 %v6587_v9 }
 0x1b6   :  { %v4185_v38 = vpop.eup %4184  ;;  %v1125_v1 = vsel %vm1122_vm6, %v1124_v8, %v1120_v42  ;;  %4194 = vrcp.f32 %v6610_v52  ;;  %vm6622_vm10 = vcmp.eq.f32.partialorder %v2812_v48, 8.507059e+37  ;;  %v2815_v62 = vor.u32 1.1754944e-38, %v2814_v46 }
 0x1b7   :  { %v4187_v59 = vpop.eup %4186  ;;  %v1862_v14 = vmul.f32 %v1125_v1, %v6423_v12  ;;  %v6617_v55 = vadd.f32 1.0, %v4185_v38  ;;  %v1601_v12 = vand.u32 2147483647, %v6610_v52  ;;  %v1603_v35 = vand.u32 2147483648, %v6610_v52 }
 0x1b8   :  { %v4189_v10 = vpop.eup %4188  ;;  %v2804_v30 = vmul.f32 %v4187_v59, %v6587_v9  ;;  %v3755_v51 = vmul.f32 -1.442695, %v6613_v49  ;;  %v2207_v24 = vmul.f32 %v6084_v29, %v2045_v28  ;;  %vm1597_vm7 = vweird.f32 %v6610_v52 }
 0x1b9   :  { %v4191_v53 = vpop.eup %4190  ;;  %1927 = vst.msk [vmem:[%s8270_s7 + $0x78] sm:$0xff] %vm1911_vm4, %v1862_v14  ;;  %4196 = vrcp.f32 %v6617_v55  ;;  %v6634_v32 = vadd.f32 1.0, %v4189_v10  ;;  %v3294_v3 = vand.u32 2147483648, %v6617_v55  ;;  %v6642_v17 = vmul.f32 %v6119_v43, %v450_v0 }
 0x1ba   :  { %v4193_v21 = vpop.eup %4192  ;;  %v2805_v54 = vsub.f32 1.0, %v2804_v30  ;;  %v6636_v5 = vadd.f32 1.0, %v4191_v53  ;;  %4198 = vpow2.f32 %v3914_v50  ;;  %vm2809_vm15 = vweird.f32 %v4187_v59 }
 0x1bb   :  { %v3292_v57 = vand.u32 2147483647, %v6617_v55  ;;  %4200 = vrcp.f32 %v6634_v32  ;;  %vm6647_vm5 = vcmp.eq.f32.partialorder %v1601_v12, 8.507059e+37  ;;  %v1604_v29 = vor.u32 1.1754944e-38, %v1603_v35  ;;  %vm2810_vm13 = vmor %vm2808_vm2, %vm2809_vm15  ;;  %v2141_v35 = vpop.f32.mrf.mxu3 }
 0x1bc   :  { %v4195_v41 = vpop.eup %4194  ;;  %v2806_v2 = vmul.f32 %v4187_v59, %v2805_v54  ;;  %v6651_v22 = vadd.f32 1.0, %v4193_v21  ;;  %4202 = vpow2.f32 %v3755_v51  ;;  %vm3288_vm11 = vweird.f32 %v6617_v55 }
 0x1bd   :  { %v1593_v7 = vmul.f32 %v4195_v41, %v6610_v52  ;;  %4204 = vrcp.f32 %v6636_v5  ;;  %v6656_v43 = vadd.f32 %v6111_v56, %v2207_v24  ;;  %v3295_v18 = vor.u32 1.1754944e-38, %v3294_v3 }
 0x1be   :  { %v2807_v26 = vadd.f32 %v4187_v59, %v2806_v2  ;;  %v1136_v47 = vand.u32 2147483647, %v6634_v32  ;;  %v1138_v40 = vand.u32 2147483648, %v6634_v32  ;;  %vm1598_vm8 = vweird.f32 %v4195_v41 }
 0x1bf   :  { %v4197_v15 = vpop.eup %4196  ;;  %v1594_v20 = vsub.f32 1.0, %v1593_v7  ;;  %vm6663_vm9 = vcmp.eq.f32.partialorder %v3292_v57, 8.507059e+37  ;;  %v2829_v56 = vand.u32 2147483648, %v6636_v5  ;;  %v2827_v16 = vand.u32 2147483647, %v6636_v5  ;;  %vm1599_vm3 = vmor %vm1597_vm7, %vm1598_vm8 }
 0x1c0   :  { %v2811_v60 = vsel %vm2810_vm13, %v4187_v59, %v2807_v26  ;;  %v3284_v63 = vmul.f32 %v4197_v15, %v6617_v55  ;;  %v4199_v11 = vpop.eup %4198  ;;  %4206 = vrcp.f32 %v6651_v22  ;;  %vm1132_vm0 = vweird.f32 %v6634_v32  ;;  %v357_v26 = vpop.f32.mrf.mxu0 }
 0x1c1   :  { %v2816_v9 = vsel %vm6622_vm10, %v2815_v62, %v2811_v60  ;;  %v1595_v13 = vmul.f32 %v4195_v41, %v1594_v20  ;;  %v4201_v34 = vpop.eup %4200  ;;  %vm2823_vm1 = vweird.f32 %v6636_v5  ;;  %vm3289_vm12 = vweird.f32 %v4197_v15 }
 0x1c2   :  { %v3553_v45 = vmul.f32 %v2816_v9, %v6441_v27  ;;  %v3285_v8 = vsub.f32 1.0, %v3284_v63  ;;  %v4203_v61 = vpop.eup %4202  ;;  %v1128_v39 = vmul.f32 %v4201_v34, %v6634_v32  ;;  %vm6676_vm14 = vcmp.eq.f32.partialorder %v1136_v47, 8.507059e+37  ;;  %vm3290_vm7 = vmor %vm3288_vm11, %vm3289_vm12 }
 0x1c3   :  { %v1596_v23 = vadd.f32 %v4195_v41, %v1595_v13  ;;  %v1139_v48 = vor.u32 1.1754944e-38, %v1138_v40  ;;  %v4205_v46 = vpop.eup %4204  ;;  %v2830_v42 = vor.u32 1.1754944e-38, %v2829_v56  ;;  %v1616_v38 = vand.u32 2147483647, %v6651_v22 }
 0x1c4   :  { %3617 = vst.msk [vmem:[%s8271_s8 + $0x78] sm:$0xff] %vm1911_vm4, %v3553_v45  ;;  %v3286_v27 = vmul.f32 %v4197_v15, %v3285_v8  ;;  %v6688_v1 = vadd.f32 1.0, %v4199_v11  ;;  %v1129_v14 = vsub.f32 1.0, %v1128_v39  ;;  %vm1133_vm6 = vweird.f32 %v4201_v34 }
 0x1c5   :  { %v1600_v59 = vsel %vm1599_vm3, %v4195_v41, %v1596_v23  ;;  %v2819_v50 = vmul.f32 %v4205_v46, %v6636_v5  ;;  %vm6691_vm2 = vcmp.eq.f32.partialorder %v2827_v16, 8.507059e+37  ;;  %vm1612_vm10 = vweird.f32 %v6651_v22  ;;  %v6757_v16 = vld [vmem:[%s8267_s3] ss:$0 sm:$0xff] }
 0x1c6   :  { %v1605_v10 = vsel %vm6647_vm5, %v1604_v29, %v1600_v59  ;;  %v3287_v52 = vadd.f32 %v4197_v15, %v3286_v27  ;;  %4208 = vrcp.f32 %v6688_v1  ;;  %v6699_v30 = vadd.f32 1.0, %v4203_v61  ;;  %v4207_v4 = vpop.eup %4206  ;;  %vm1134_vm5 = vmor %vm1132_vm0, %vm1133_vm6  ;;  %v6772_v61 = vld [vmem:[%s8266_s2] ss:$0 sm:$0xff]  ;;  %v2144_v27 = vpop.f32.mrf.mxu3 }
 0x1c7   :  { %v1894_v62 = vmul.f32 %v1605_v10, %v6548_v19  ;;  %v1130_v0 = vmul.f32 %v4201_v34, %v1129_v14  ;;  %v2820_v53 = vsub.f32 1.0, %v2819_v50  ;;  %v1618_v12 = vand.u32 2147483648, %v6651_v22  ;;  %v6788_v59 = vld [vmem:[%s8269_s6] ss:$0 sm:$0xff] }
 0x1c8   :  { %v3291_v51 = vsel %vm3290_vm7, %v4197_v15, %v3287_v52  ;;  %vm2824_vm15 = vweird.f32 %v4205_v46  ;;  %v1608_v21 = vmul.f32 %v4207_v4, %v6651_v22  ;;  %v3307_v54 = vand.u32 2147483647, %v6688_v1 }
 0x1c9   :  { %1959 = vst.msk [vmem:[%s8270_s7 + $0x178] sm:$0xff] %vm1911_vm4, %v1894_v62  ;;  %v3296_v19 = vsel %vm6663_vm9, %v3295_v18, %v3291_v51  ;;  %v1131_v55 = vadd.f32 %v4201_v34, %v1130_v0  ;;  %v2821_v24 = vmul.f32 %v4205_v46, %v2820_v53  ;;  %v3309_v3 = vand.u32 2147483648, %v6688_v1  ;;  %vm2825_vm8 = vmor %vm2823_vm1, %vm2824_vm15  ;;  %v2048_v18 = vpop.f32.mrf.mxu1  ;;  %v360_v51 = vpop.f32.mrf.mxu0 }
 0x1ca   :  { %v3585_v41 = vmul.f32 %v3296_v19, %v6565_v44  ;;  %v1609_v2 = vsub.f32 1.0, %v1608_v21  ;;  %vm6719_vm11 = vcmp.eq.f32.partialorder %v1616_v38, 8.507059e+37  ;;  %4210 = vrcp.f32 %v6699_v30 }
 0x1cb   :  { %v1135_v7 = vsel %vm1134_vm5, %v4201_v34, %v1131_v55  ;;  %v2822_v25 = vadd.f32 %v4205_v46, %v2821_v24  ;;  %v1619_v29 = vor.u32 1.1754944e-38, %v1618_v12  ;;  %vm3303_vm13 = vweird.f32 %v6688_v1 }
 0x1cc   :  { %v4209_v15 = vpop.eup %4208  ;;  %3649 = vst.msk [vmem:[%s8271_s8 + $0x178] sm:$0xff] %vm1911_vm4, %v3585_v41  ;;  %v1140_v44 = vsel %vm6676_vm14, %v1139_v48, %v1135_v7  ;;  %v1610_v32 = vmul.f32 %v4207_v4, %v1609_v2  ;;  %vm1613_vm9 = vweird.f32 %v4207_v4  ;;  %v3310_v20 = vor.u32 1.1754944e-38, %v3309_v3 }
 0x1cd   :  { %v1863_v47 = vmul.f32 %v1140_v44, %v6568_v6  ;;  %v2826_v40 = vsel %vm2825_vm8, %v4205_v46, %v2822_v25  ;;  %v3299_v60 = vmul.f32 %v4209_v15, %v6688_v1  ;;  %vm6736_vm0 = vcmp.eq.f32.partialorder %v3307_v54, 8.507059e+37  ;;  %vm1614_vm14 = vmor %vm1612_vm10, %vm1613_vm9  ;;  %v453_v46 = vpop.f32.mrf.mxu2 }
 0x1ce   :  { %vm1147_vm12 = vweird.f32 %v6699_v30  ;;  %v1151_v37 = vand.u32 2147483647, %v6699_v30  ;;  %v2831_v5 = vsel %vm6691_vm2, %v2830_v42, %v2826_v40  ;;  %v1611_v56 = vadd.f32 %v4207_v4, %v1610_v32 }
 0x1cf   :  { %vm3304_vm1 = vweird.f32 %v4209_v15  ;;  %v1153_v11 = vand.u32 2147483648, %v6699_v30  ;;  %1928 = vst.msk [vmem:[%s8270_s7 + $0x80] sm:$0xff] %vm1911_vm4, %v1863_v47  ;;  %v3554_v6 = vmul.f32 %v2831_v5, %v6579_v58  ;;  %v3300_v9 = vsub.f32 1.0, %v3299_v60  ;;  %v6766_v58 = vld [vmem:[%s8268_s5] ss:$0 sm:$0xff]  ;;  %v2147_v47 = vpop.f32.mrf.mxu3 }
 0x1d0   :  { %v3883_v13 = vmul.f32 -1.442695, %v6656_v43  ;;  %v6761_v34 = vadd.f32 %v6757_v16, %v6642_v17  ;;  %v4211_v45 = vpop.eup %4210  ;;  %v1615_v8 = vsel %vm1614_vm14, %v4207_v4, %v1611_v56  ;;  %v2239_v22 = vmul.f32 %v6766_v58, %v2141_v35  ;;  %vm3305_vm6 = vmor %vm3303_vm13, %vm3304_vm1 }
 0x1d1   :  { %v517_v23 = vmul.f32 %v6772_v61, %v357_v26  ;;  %v2208_v39 = vmul.f32 %v6766_v58, %v2048_v18  ;;  %3618 = vst.msk [vmem:[%s8271_s8 + $0x80] sm:$0xff] %vm1911_vm4, %v3554_v6  ;;  %v1620_v17 = vsel %vm6719_vm11, %v1619_v29, %v1615_v8  ;;  %v3301_v33 = vmul.f32 %v4209_v15, %v3300_v9  ;;  %v2051_v19 = vpop.f32.mrf.mxu1 }
 0x1d2   :  { %v1143_v48 = vmul.f32 %v4211_v45, %v6699_v30  ;;  %vm1148_vm3 = vweird.f32 %v4211_v45  ;;  %v1895_v42 = vmul.f32 %v1620_v17, %v6590_v31  ;;  %4212 = vpow2.f32 %v3883_v13 }
 0x1d3   :  { %v3787_v38 = vmul.f32 -1.442695, %v6761_v34  ;;  %v6791_v14 = vadd.f32 %v6788_v59, %v2239_v22  ;;  %v3302_v50 = vadd.f32 %v4209_v15, %v3301_v33  ;;  %v6794_v10 = vadd.f32 %v6757_v16, %v517_v23  ;;  %vm1149_vm10 = vmor %vm1147_vm12, %vm1148_vm3 }
 0x1d4   :  { %v1144_v28 = vsub.f32 1.0, %v1143_v48  ;;  %v6797_v52 = vadd.f32 %v6788_v59, %v2208_v39  ;;  %1960 = vst.msk [vmem:[%s8270_s7 + $0x180] sm:$0xff] %vm1911_vm4, %v1895_v42  ;;  %v549_v4 = vmul.f32 %v6772_v61, %v453_v46  ;;  %v2240_v62 = vmul.f32 %v6766_v58, %v2144_v27 }
 0x1d5   :  { %4214 = vpow2.f32 %v3787_v38  ;;  %v3915_v31 = vmul.f32 -1.442695, %v6791_v14  ;;  %v3306_v0 = vsel %vm3305_vm6, %v4209_v15, %v3302_v50  ;;  %v3756_v12 = vmul.f32 -1.442695, %v6794_v10  ;;  %v456_v44 = vpop.f32.mrf.mxu2 }
 0x1d6   :  { %v1145_v53 = vmul.f32 %v4211_v45, %v1144_v28  ;;  %v3884_v35 = vmul.f32 -1.442695, %v6797_v52  ;;  %v3311_v21 = vsel %vm6736_vm0, %v3310_v20, %v3306_v0  ;;  %v6814_v1 = vadd.f32 %v6757_v16, %v549_v4 }
 0x1d7   :  { %4216 = vpow2.f32 %v3915_v31  ;;  %v6817_v54 = vadd.f32 %v6788_v59, %v2240_v62  ;;  %v3586_v55 = vmul.f32 %v3311_v21, %v6603_v36  ;;  %vm1152_vm2 = vcmp.eq.f32.partialorder %v1151_v37, 8.507059e+37 }
 0x1d8   :  { %v1146_v24 = vadd.f32 %v4211_v45, %v1145_v53  ;;  %4218 = vpow2.f32 %v3756_v12  ;;  %v4213_v3 = vpop.eup %4212  ;;  %v1154_v41 = vor.u32 1.1754944e-38, %v1153_v11  ;;  %v3788_v2 = vmul.f32 -1.442695, %v6814_v1 }
 0x1d9   :  { %4220 = vpow2.f32 %v3884_v35  ;;  %v518_v57 = vmul.f32 %v6772_v61, %v360_v51  ;;  %3650 = vst.msk [vmem:[%s8271_s8 + $0x180] sm:$0xff] %vm1911_vm4, %v3586_v55  ;;  %v6829_v7 = vadd.f32 1.0, %v4213_v3  ;;  %v3916_v25 = vmul.f32 -1.442695, %v6817_v54 }
 0x1da   :  { %v1150_v36 = vsel %vm1149_vm10, %v4211_v45, %v1146_v24  ;;  %v2209_v29 = vmul.f32 %v6766_v58, %v2051_v19  ;;  %4222 = vpow2.f32 %v3788_v2  ;;  %v550_v5 = vmul.f32 %v6772_v61, %v456_v44 }
 0x1db   :  { %v4215_v30 = vpop.eup %4214  ;;  %v1155_v26 = vsel %vm1152_vm2, %v1154_v41, %v1150_v36  ;;  %4224 = vrcp.f32 %v6829_v7  ;;  %v6838_v18 = vadd.f32 %v6757_v16, %v518_v57  ;;  %v2842_v37 = vand.u32 2147483647, %v6829_v7 }
 0x1dc   :  { %v1864_v15 = vmul.f32 %v1155_v26, %v6613_v49  ;;  %v6835_v20 = vadd.f32 1.0, %v4215_v30  ;;  %4226 = vpow2.f32 %v3916_v25  ;;  %v6847_v49 = vadd.f32 %v6788_v59, %v2209_v29 }
 0x1dd   :  { %v4217_v32 = vpop.eup %4216  ;;  %v2844_v56 = vand.u32 2147483648, %v6829_v7  ;;  %v6855_v11 = vmul.f32 %v6766_v58, %v2147_v47  ;;  %v3757_v8 = vmul.f32 -1.442695, %v6838_v18  ;;  %vm2838_vm7 = vweird.f32 %v6829_v7 }
 0x1de   :  { %v4219_v40 = vpop.eup %4218  ;;  %1929 = vst.msk [vmem:[%s8270_s7 + $0x88] sm:$0xff] %vm1911_vm4, %v1864_v15  ;;  %v6844_v60 = vadd.f32 1.0, %v4217_v32  ;;  %4228 = vrcp.f32 %v6835_v20  ;;  %v1633_v9 = vand.u32 2147483648, %v6835_v20  ;;  %v1631_v23 = vand.u32 2147483647, %v6835_v20 }
 0x1df   :  { %v4221_v63 = vpop.eup %4220  ;;  %v6858_v13 = vadd.f32 1.0, %v4219_v40  ;;  %v6867_v17 = vmul.f32 -1.442695, %v6847_v49  ;;  %vm6870_vm15 = vcmp.eq.f32.partialorder %v2842_v37, 8.507059e+37  ;;  %v6877_v27 = vadd.f32 %v6757_v16, %v550_v5 }
 0x1e0   :  { %4230 = vrcp.f32 %v6844_v60  ;;  %v4223_v6 = vpop.eup %4222  ;;  %v6860_v45 = vadd.f32 1.0, %v4221_v63  ;;  %v3324_v39 = vand.u32 2147483648, %v6844_v60  ;;  %v3322_v46 = vand.u32 2147483647, %v6844_v60 }
 0x1e1   :  { %v4225_v22 = vpop.eup %4224  ;;  %4232 = vrcp.f32 %v6858_v13  ;;  %v2845_v38 = vor.u32 1.1754944e-38, %v2844_v56  ;;  %vm1627_vm5 = vweird.f32 %v6835_v20  ;;  %v6881_v50 = vadd.f32 1.0, %v4223_v6 }
 0x1e2   :  { %v2834_v33 = vmul.f32 %v4225_v22, %v6829_v7  ;;  %v4227_v42 = vpop.eup %4226  ;;  %4234 = vrcp.f32 %v6860_v45  ;;  %v1634_v4 = vor.u32 1.1754944e-38, %v1633_v9  ;;  %vm3318_vm11 = vweird.f32 %v6844_v60 }
 0x1e3   :  { %v1168_v62 = vand.u32 2147483648, %v6858_v13  ;;  %4236 = vpow2.f32 %v3757_v8  ;;  %vm2839_vm13 = vweird.f32 %v4225_v22  ;;  %vm6886_vm8 = vcmp.eq.f32.partialorder %v1631_v23, 8.507059e+37 }
 0x1e4   :  { %v4229_v28 = vpop.eup %4228  ;;  %v2835_v31 = vsub.f32 1.0, %v2834_v33  ;;  %v3325_v35 = vor.u32 1.1754944e-38, %v3324_v39  ;;  %v1166_v51 = vand.u32 2147483647, %v6858_v13  ;;  %vm6892_vm9 = vcmp.eq.f32.partialorder %v3322_v46, 8.507059e+37  ;;  %vm2840_vm14 = vmor %vm2838_vm7, %vm2839_vm13 }
 0x1e5   :  { %v1623_v53 = vmul.f32 %v4229_v28, %v6835_v20  ;;  %vm1162_vm0 = vweird.f32 %v6858_v13  ;;  %v2857_v24 = vand.u32 2147483647, %v6860_v45  ;;  %vm2853_vm12 = vweird.f32 %v6860_v45 }
 0x1e6   :  { %v4231_v0 = vpop.eup %4230  ;;  %v2836_v21 = vmul.f32 %v4225_v22, %v2835_v31  ;;  %v2859_v41 = vand.u32 2147483648, %v6860_v45  ;;  %4238 = vrcp.f32 %v6881_v50  ;;  %vm1628_vm1 = vweird.f32 %v4229_v28 }
 0x1e7   :  { %v3314_v19 = vmul.f32 %v4231_v0, %v6844_v60  ;;  %v1624_v3 = vsub.f32 1.0, %v1623_v53  ;;  %v4233_v2 = vpop.eup %4232  ;;  %v1169_v25 = vor.u32 1.1754944e-38, %v1168_v62  ;;  %vm3319_vm3 = vweird.f32 %v4231_v0  ;;  %vm1629_vm10 = vmor %vm1627_vm5, %vm1628_vm1 }
 0x1e8   :  { %v2837_v57 = vadd.f32 %v4225_v22, %v2836_v21  ;;  %v4235_v29 = vpop.eup %4234  ;;  %v1158_v26 = vmul.f32 %v4233_v2, %v6858_v13  ;;  %vm6905_vm6 = vcmp.eq.f32.partialorder %v1166_v51, 8.507059e+37  ;;  %v6909_v44 = vadd.f32 1.0, %v4227_v42  ;;  %vm3320_vm13 = vmor %vm3318_vm11, %vm3319_vm3 }
 0x1e9   :  { %v3315_v36 = vsub.f32 1.0, %v3314_v19  ;;  %v1625_v30 = vmul.f32 %v4229_v28, %v1624_v3  ;;  %v4237_v32 = vpop.eup %4236  ;;  %v2849_v63 = vmul.f32 %v4235_v29, %v6860_v45  ;;  %vm6912_vm2 = vcmp.eq.f32.partialorder %v2857_v24, 8.507059e+37 }
 0x1ea   :  { %v2841_v47 = vsel %vm2840_vm14, %v4225_v22, %v2837_v57  ;;  %v1159_v56 = vsub.f32 1.0, %v1158_v26  ;;  %v2860_v6 = vor.u32 1.1754944e-38, %v2859_v41  ;;  %vm1163_vm7 = vweird.f32 %v4233_v2 }
 0x1eb   :  { %v3316_v40 = vmul.f32 %v4231_v0, %v3315_v36  ;;  %v2846_v7 = vsel %vm6870_vm15, %v2845_v38, %v2841_v47  ;;  %v1626_v5 = vadd.f32 %v4229_v28, %v1625_v30  ;;  %v2850_v22 = vsub.f32 1.0, %v2849_v63  ;;  %vm1164_vm5 = vmor %vm1162_vm0, %vm1163_vm7 }
 0x1ec   :  { %v3555_v9 = vmul.f32 %v2846_v7, %v6656_v43  ;;  %v4239_v23 = vpop.eup %4238  ;;  %v1160_v33 = vmul.f32 %v4233_v2, %v1159_v56  ;;  %vm2854_vm15 = vweird.f32 %v4235_v29  ;;  %4240 = vrcp.f32 %v6909_v44 }
 0x1ed   :  { %v3317_v8 = vadd.f32 %v4231_v0, %v3316_v40  ;;  %v1630_v39 = vsel %vm1629_vm10, %v4229_v28, %v1626_v5  ;;  %v2851_v48 = vmul.f32 %v4235_v29, %v2850_v22  ;;  %v1638_v46 = vmul.f32 %v4239_v23, %v6881_v50  ;;  %vm2855_vm11 = vmor %vm2853_vm12, %vm2854_vm15  ;;  %v2150_v40 = vpop.f32.mrf.mxu3 }
 0x1ee   :  { %3619 = vst.msk [vmem:[%s8271_s8 + $0x88] sm:$0xff] %vm1911_vm4, %v3555_v9  ;;  %v1635_v43 = vsel %vm6886_vm8, %v1634_v4, %v1630_v39  ;;  %v1161_v38 = vadd.f32 %v4233_v2, %v1160_v33  ;;  %v1646_v28 = vand.u32 2147483647, %v6881_v50  ;;  %vm1642_vm8 = vweird.f32 %v6881_v50 }
 0x1ef   :  { %v3321_v20 = vsel %vm3320_vm13, %v4231_v0, %v3317_v8  ;;  %v1896_v42 = vmul.f32 %v1635_v43, %v6761_v34  ;;  %v2852_v62 = vadd.f32 %v4235_v29, %v2851_v48  ;;  %v1639_v4 = vsub.f32 1.0, %v1638_v46 }
 0x1f0   :  { %v3326_v60 = vsel %vm6892_vm9, %v3325_v35, %v3321_v20  ;;  %v1648_v0 = vand.u32 2147483648, %v6881_v50  ;;  %v1165_v34 = vsel %vm1164_vm5, %v4233_v2, %v1161_v38  ;;  %4242 = vpow2.f32 %v6867_v17  ;;  %v363_v17 = vpop.f32.mrf.mxu0 }
 0x1f1   :  { %v3587_v31 = vmul.f32 %v3326_v60, %v6791_v14  ;;  %1961 = vst.msk [vmem:[%s8270_s7 + $0x188] sm:$0xff] %vm1911_vm4, %v1896_v42  ;;  %v6950_v14 = vadd.f32 1.0, %v4237_v32  ;;  %v1170_v13 = vsel %vm6905_vm6, %v1169_v25, %v1165_v34  ;;  %v2856_v53 = vsel %vm2855_vm11, %v4235_v29, %v2852_v62  ;;  %v2054_v25 = vpop.f32.mrf.mxu1  ;;  %v459_v29 = vpop.f32.mrf.mxu2 }
 0x1f2   :  { %v1640_v12 = vmul.f32 %v4239_v23, %v1639_v4  ;;  %vm1643_vm9 = vweird.f32 %v4239_v23  ;;  %v4241_v35 = vpop.eup %4240  ;;  %v1865_v45 = vmul.f32 %v1170_v13, %v6794_v10  ;;  %v2861_v51 = vsel %vm6912_vm2, %v2860_v6, %v2856_v53 }
 0x1f3   :  { %3651 = vst.msk [vmem:[%s8271_s8 + $0x188] sm:$0xff] %vm1911_vm4, %v3587_v31  ;;  %vm6962_vm0 = vcmp.eq.f32.partialorder %v1646_v28, 8.507059e+37  ;;  %4244 = vrcp.f32 %v6950_v14  ;;  %v3556_v19 = vmul.f32 %v2861_v51, %v6797_v52  ;;  %v1649_v24 = vor.u32 1.1754944e-38, %v1648_v0  ;;  %vm1644_vm12 = vmor %vm1642_vm8, %vm1643_vm9 }
 0x1f4   :  { %v1641_v55 = vadd.f32 %v4239_v23, %v1640_v12  ;;  %v3329_v3 = vmul.f32 %v4241_v35, %v6909_v44  ;;  %1930 = vst.msk [vmem:[%s8270_s7 + $0x90] sm:$0xff] %vm1911_vm4, %v1865_v45  ;;  %v3337_v10 = vand.u32 2147483647, %v6909_v44  ;;  %v3339_v41 = vand.u32 2147483648, %v6909_v44 }
 0x1f5   :  { %v3789_v2 = vmul.f32 -1.442695, %v6877_v27  ;;  %3620 = vst.msk [vmem:[%s8271_s8 + $0x90] sm:$0xff] %vm1911_vm4, %v3556_v19  ;;  %v6984_v36 = vadd.f32 %v6788_v59, %v6855_v11  ;;  %v519_v50 = vmul.f32 %v6772_v61, %v363_v17  ;;  %vm3333_vm1 = vweird.f32 %v6909_v44 }
 0x1f6   :  { %v1645_v52 = vsel %vm1644_vm12, %v4239_v23, %v1641_v55  ;;  %v3330_v57 = vsub.f32 1.0, %v3329_v3  ;;  %v4243_v30 = vpop.eup %4242  ;;  %vm3334_vm14 = vweird.f32 %v4241_v35  ;;  %vm6994_vm3 = vcmp.eq.f32.partialorder %v3337_v10, 8.507059e+37 }
 0x1f7   :  { %v1650_v26 = vsel %vm6962_vm0, %v1649_v24, %v1645_v52  ;;  %4246 = vpow2.f32 %v3789_v2  ;;  %v6991_v47 = vadd.f32 1.0, %v4243_v30  ;;  %v3917_v11 = vmul.f32 -1.442695, %v6984_v36  ;;  %vm3335_vm6 = vmor %vm3333_vm1, %vm3334_vm14 }
 0x1f8   :  { %v1897_v15 = vmul.f32 %v1650_v26, %v6814_v1  ;;  %v3331_v32 = vmul.f32 %v4241_v35, %v3330_v57  ;;  %v6999_v7 = vadd.f32 %v6757_v16, %v519_v50  ;;  %v2210_v5 = vmul.f32 %v6766_v58, %v2054_v25  ;;  %v366_v12 = vpop.f32.mrf.mxu0 }
 0x1f9   :  { %v4245_v63 = vpop.eup %4244  ;;  %v551_v56 = vmul.f32 %v6772_v61, %v459_v29  ;;  %v3340_v6 = vor.u32 1.1754944e-38, %v3339_v41  ;;  %4248 = vrcp.f32 %v6991_v47  ;;  %vm1177_vm2 = vweird.f32 %v6950_v14 }
 0x1fa   :  { %1962 = vst.msk [vmem:[%s8270_s7 + $0x190] sm:$0xff] %vm1911_vm4, %v1897_v15  ;;  %v3332_v1 = vadd.f32 %v4241_v35, %v3331_v32  ;;  %v1173_v9 = vmul.f32 %v4245_v63, %v6950_v14  ;;  %v1181_v8 = vand.u32 2147483647, %v6950_v14  ;;  %4250 = vpow2.f32 %v3917_v11 }
 0x1fb   :  { %v2242_v22 = vmul.f32 %v6766_v58, %v2150_v40  ;;  %v3758_v33 = vmul.f32 -1.442695, %v6999_v7  ;;  %v7017_v43 = vadd.f32 %v6788_v59, %v2210_v5  ;;  %vm1178_vm10 = vweird.f32 %v4245_v63 }
 0x1fc   :  { %v3336_v23 = vsel %vm3335_vm6, %v4241_v35, %v3332_v1  ;;  %v1174_v39 = vsub.f32 1.0, %v1173_v9  ;;  %v1183_v44 = vand.u32 2147483648, %v6950_v14  ;;  %v7023_v46 = vadd.f32 %v6757_v16, %v551_v56  ;;  %vm1179_vm13 = vmor %vm1177_vm2, %vm1178_vm10  ;;  %v2057_v1 = vpop.f32.mrf.mxu1 }
 0x1fd   :  { %v4247_v20 = vpop.eup %4246  ;;  %v3341_v48 = vsel %vm6994_vm3, %v3340_v6, %v3336_v23  ;;  %4252 = vpow2.f32 %v3758_v33  ;;  %v3886_v28 = vmul.f32 -1.442695, %v7017_v43  ;;  %v7031_v62 = vadd.f32 %v6788_v59, %v2242_v22  ;;  %v462_v6 = vpop.f32.mrf.mxu2 }
 0x1fe   :  { %v3588_v42 = vmul.f32 %v3341_v48, %v6817_v54  ;;  %v1175_v60 = vmul.f32 %v4245_v63, %v1174_v39  ;;  %v7026_v38 = vadd.f32 1.0, %v4247_v20  ;;  %v3790_v31 = vmul.f32 -1.442695, %v7023_v46 }
 0x1ff   :  { %v4249_v4 = vpop.eup %4248  ;;  %vm1182_vm7 = vcmp.eq.f32.partialorder %v1181_v8, 8.507059e+37  ;;  %v1184_v34 = vor.u32 1.1754944e-38, %v1183_v44  ;;  %v2872_v53 = vand.u32 2147483647, %v6991_v47  ;;  %v2874_v45 = vand.u32 2147483648, %v6991_v47 }
 0x200   :  { %3652 = vst.msk [vmem:[%s8271_s8 + $0x190] sm:$0xff] %vm1911_vm4, %v3588_v42  ;;  %v1176_v0 = vadd.f32 %v4245_v63, %v1175_v60  ;;  %4254 = vrcp.f32 %v7026_v38  ;;  %v4251_v54 = vpop.eup %4250  ;;  %v2864_v13 = vmul.f32 %v4249_v4, %v6991_v47  ;;  %v1661_v19 = vand.u32 2147483647, %v7026_v38 }
 0x201   :  { %4256 = vpow2.f32 %v3886_v28  ;;  %v7044_v51 = vadd.f32 1.0, %v4251_v54  ;;  %v3918_v14 = vmul.f32 -1.442695, %v7031_v62  ;;  %v1663_v3 = vand.u32 2147483648, %v7026_v38 }
 0x202   :  { %v1180_v35 = vsel %vm1179_vm13, %v4245_v63, %v1176_v0  ;;  %4258 = vpow2.f32 %v3790_v31  ;;  %v2865_v17 = vsub.f32 1.0, %v2864_v13  ;;  %v520_v10 = vmul.f32 %v6772_v61, %v366_v12 }
 0x203   :  { %v1185_v21 = vsel %vm1182_vm7, %v1184_v34, %v1180_v35  ;;  %v4253_v55 = vpop.eup %4252  ;;  %4260 = vrcp.f32 %v7044_v51  ;;  %vm2868_vm15 = vweird.f32 %v6991_v47  ;;  %vm2869_vm5 = vweird.f32 %v4249_v4 }
 0x204   :  { %v1866_v24 = vmul.f32 %v1185_v21, %v6838_v18  ;;  %v2866_v41 = vmul.f32 %v4249_v4, %v2865_v17  ;;  %v7053_v2 = vadd.f32 1.0, %v4253_v55  ;;  %vm7059_vm11 = vcmp.eq.f32.partialorder %v2872_v53, 8.507059e+37  ;;  %vm2870_vm0 = vmor %vm2868_vm15, %vm2869_vm5  ;;  %v2060_v33 = vpop.f32.mrf.mxu1 }
 0x205   :  { %v2875_v57 = vor.u32 1.1754944e-38, %v2874_v45  ;;  %vm1657_vm8 = vweird.f32 %v7026_v38  ;;  %vm7065_vm9 = vcmp.eq.f32.partialorder %v1661_v19, 8.507059e+37  ;;  %v3352_v26 = vand.u32 2147483647, %v7044_v51 }
 0x206   :  { %v4255_v52 = vpop.eup %4254  ;;  %1931 = vst.msk [vmem:[%s8270_s7 + $0x98] sm:$0xff] %vm1911_vm4, %v1866_v24  ;;  %v2867_v25 = vadd.f32 %v4249_v4, %v2866_v41  ;;  %4262 = vpow2.f32 %v3918_v14  ;;  %v1664_v32 = vor.u32 1.1754944e-38, %v1663_v3  ;;  %v3354_v11 = vand.u32 2147483648, %v7044_v51 }
 0x207   :  { %v4257_v50 = vpop.eup %4256  ;;  %v1653_v29 = vmul.f32 %v4255_v52, %v7026_v38  ;;  %4264 = vrcp.f32 %v7053_v2  ;;  %v7075_v40 = vadd.f32 %v6757_v16, %v520_v10  ;;  %vm1658_vm12 = vweird.f32 %v4255_v52  ;;  %v2153_v10 = vpop.f32.mrf.mxu3 }
 0x208   :  { %v4259_v15 = vpop.eup %4258  ;;  %v2871_v63 = vsel %vm2870_vm0, %v4249_v4, %v2867_v25  ;;  %v7077_v5 = vadd.f32 1.0, %v4257_v50  ;;  %vm3348_vm1 = vweird.f32 %v7044_v51  ;;  %v1198_v8 = vand.u32 2147483648, %v7053_v2  ;;  %vm1659_vm3 = vmor %vm1657_vm8, %vm1658_vm12 }
 0x209   :  { %v1654_v37 = vsub.f32 1.0, %v1653_v29  ;;  %v7079_v56 = vadd.f32 1.0, %v4259_v15  ;;  %v4261_v9 = vpop.eup %4260  ;;  %v2876_v47 = vsel %vm7059_vm11, %v2875_v57, %v2871_v63  ;;  %vm7087_vm14 = vcmp.eq.f32.partialorder %v3352_v26, 8.507059e+37 }
 0x20a   :  { %v3557_v22 = vmul.f32 %v2876_v47, %v6847_v49  ;;  %v3344_v39 = vmul.f32 %v4261_v9, %v7044_v51  ;;  %v1196_v20 = vand.u32 2147483647, %v7053_v2  ;;  %v3355_v48 = vor.u32 1.1754944e-38, %v3354_v11 }
 0x20b   :  { %v1655_v23 = vmul.f32 %v4255_v52, %v1654_v37  ;;  %4266 = vrcp.f32 %v7077_v5  ;;  %v2211_v44 = vmul.f32 %v6766_v58, %v2057_v1  ;;  %v552_v42 = vmul.f32 %v6772_v61, %v462_v6 }
 0x20c   :  { %v4263_v60 = vpop.eup %4262  ;;  %3621 = vst.msk [vmem:[%s8271_s8 + $0x98] sm:$0xff] %vm1911_vm4, %v3557_v22  ;;  %v3345_v28 = vsub.f32 1.0, %v3344_v39  ;;  %4268 = vrcp.f32 %v7079_v56  ;;  %v3759_v31 = vmul.f32 -1.442695, %v7075_v40  ;;  %vm3349_vm6 = vweird.f32 %v4261_v9 }
 0x20d   :  { %v1656_v49 = vadd.f32 %v4255_v52, %v1655_v23  ;;  %v4265_v4 = vpop.eup %4264  ;;  %vm1192_vm2 = vweird.f32 %v7053_v2  ;;  %v1199_v0 = vor.u32 1.1754944e-38, %v1198_v8  ;;  %v2889_v54 = vand.u32 2147483648, %v7077_v5  ;;  %vm3350_vm7 = vmor %vm3348_vm1, %vm3349_vm6 }
 0x20e   :  { %v3346_v13 = vmul.f32 %v4261_v9, %v3345_v28  ;;  %v1188_v53 = vmul.f32 %v4265_v4, %v7053_v2  ;;  %vm7107_vm10 = vcmp.eq.f32.partialorder %v1196_v20, 8.507059e+37  ;;  %v2887_v35 = vand.u32 2147483647, %v7077_v5 }
 0x20f   :  { %v1660_v34 = vsel %vm1659_vm3, %v4255_v52, %v1656_v49  ;;  %v1676_v45 = vand.u32 2147483647, %v7079_v56  ;;  %v1678_v21 = vand.u32 2147483648, %v7079_v56  ;;  %v7116_v17 = vadd.f32 1.0, %v4263_v60 }
 0x210   :  { %v1665_v38 = vsel %vm7065_vm9, %v1664_v32, %v1660_v34  ;;  %v3347_v14 = vadd.f32 %v4261_v9, %v3346_v13  ;;  %v1189_v55 = vsub.f32 1.0, %v1188_v53  ;;  %4270 = vpow2.f32 %v3759_v31  ;;  %v465_v34 = vpop.f32.mrf.mxu2  ;;  %v2156_v13 = vpop.f32.mrf.mxu3 }
 0x211   :  { %v1898_v19 = vmul.f32 %v1665_v38, %v6877_v27  ;;  %v4267_v24 = vpop.eup %4266  ;;  %vm2883_vm13 = vweird.f32 %v7077_v5  ;;  %v2890_v3 = vor.u32 1.1754944e-38, %v2889_v54  ;;  %vm1672_vm15 = vweird.f32 %v7079_v56 }
 0x212   :  { %4272 = vrcp.f32 %v7116_v17  ;;  %v4269_v41 = vpop.eup %4268  ;;  %v3351_v27 = vsel %vm3350_vm7, %v4261_v9, %v3347_v14  ;;  %v1190_v52 = vmul.f32 %v4265_v4, %v1189_v55  ;;  %vm1193_vm5 = vweird.f32 %v4265_v4  ;;  %v369_v9 = vpop.f32.mrf.mxu0 }
 0x213   :  { %1963 = vst.msk [vmem:[%s8270_s7 + $0x198] sm:$0xff] %vm1911_vm4, %v1898_v19  ;;  %v2879_v51 = vmul.f32 %v4267_v24, %v7077_v5  ;;  %vm7130_vm11 = vcmp.eq.f32.partialorder %v2887_v35, 8.507059e+37  ;;  %v3356_v57 = vsel %vm7087_vm14, %v3355_v48, %v3351_v27  ;;  %v1668_v50 = vmul.f32 %v4269_v41, %v7079_v56  ;;  %vm1194_vm9 = vmor %vm1192_vm2, %vm1193_vm5 }
 0x214   :  { %vm7137_vm8 = vcmp.eq.f32.partialorder %v1676_v45, 8.507059e+37  ;;  %v1679_v29 = vor.u32 1.1754944e-38, %v1678_v21  ;;  %v3589_v30 = vmul.f32 %v3356_v57, %v6984_v36  ;;  %v1191_v26 = vadd.f32 %v4265_v4, %v1190_v52 }
 0x215   :  { %v2880_v15 = vsub.f32 1.0, %v2879_v51  ;;  %v3367_v32 = vand.u32 2147483647, %v7116_v17  ;;  %vm2884_vm0 = vweird.f32 %v4267_v24  ;;  %v1669_v11 = vsub.f32 1.0, %v1668_v50 }
 0x216   :  { %v3369_v63 = vand.u32 2147483648, %v7116_v17  ;;  %v7147_v37 = vadd.f32 %v6788_v59, %v2211_v44  ;;  %v4271_v1 = vpop.eup %4270  ;;  %3653 = vst.msk [vmem:[%s8271_s8 + $0x198] sm:$0xff] %vm1911_vm4, %v3589_v30  ;;  %v1195_v36 = vsel %vm1194_vm9, %v4265_v4, %v1191_v26  ;;  %vm1673_vm12 = vweird.f32 %v4269_v41  ;;  %vm2885_vm3 = vmor %vm2883_vm13, %vm2884_vm0 }
 0x217   :  { %v2881_v6 = vmul.f32 %v4267_v24, %v2880_v15  ;;  %vm3363_vm1 = vweird.f32 %v7116_v17  ;;  %v7155_v2 = vadd.f32 %v6757_v16, %v552_v42  ;;  %v1200_v8 = vsel %vm7107_vm10, %v1199_v0, %v1195_v36  ;;  %vm1674_vm6 = vmor %vm1672_vm15, %vm1673_vm12  ;;  %v2063_v36 = vpop.f32.mrf.mxu1 }
 0x218   :  { %v4273_v47 = vpop.eup %4272  ;;  %v1670_v22 = vmul.f32 %v4269_v41, %v1669_v11  ;;  %v7159_v23 = vadd.f32 1.0, %v4271_v1  ;;  %v3887_v39 = vmul.f32 -1.442695, %v7147_v37  ;;  %v1867_v20 = vmul.f32 %v1200_v8, %v6999_v7 }
 0x219   :  { %v2882_v48 = vadd.f32 %v4267_v24, %v2881_v6  ;;  %v3359_v44 = vmul.f32 %v4273_v47, %v7116_v17  ;;  %vm7164_vm14 = vcmp.eq.f32.partialorder %v3367_v32, 8.507059e+37  ;;  %v2243_v49 = vmul.f32 %v6766_v58, %v2153_v10 }
 0x21a   :  { %v1671_v42 = vadd.f32 %v4269_v41, %v1670_v22  ;;  %4274 = vrcp.f32 %v7159_v23  ;;  %v521_v28 = vmul.f32 %v6772_v61, %v369_v9  ;;  %1932 = vst.msk [vmem:[%s8270_s7 + $0xa0] sm:$0xff] %vm1911_vm4, %v1867_v20  ;;  %v2212_v5 = vmul.f32 %v6766_v58, %v2060_v33  ;;  %v372_v57 = vpop.f32.mrf.mxu0 }
 0x21b   :  { %v2886_v7 = vsel %vm2885_vm3, %v4267_v24, %v2882_v48  ;;  %v3360_v31 = vsub.f32 1.0, %v3359_v44  ;;  %4276 = vpow2.f32 %v3887_v39  ;;  %vm3364_vm2 = vweird.f32 %v4273_v47 }
 0x21c   :  { %v2891_v4 = vsel %vm7130_vm11, %v2890_v3, %v2886_v7  ;;  %v1675_v0 = vsel %vm1674_vm6, %v4269_v41, %v1671_v42  ;;  %v3791_v54 = vmul.f32 -1.442695, %v7155_v2  ;;  %v1211_v35 = vand.u32 2147483647, %v7159_v23  ;;  %vm3365_vm10 = vmor %vm3363_vm1, %vm3364_vm2 }
 0x21d   :  { %v3558_v53 = vmul.f32 %v2891_v4, %v7017_v43  ;;  %v1680_v12 = vsel %vm7137_vm8, %v1679_v29, %v1675_v0  ;;  %v3361_v56 = vmul.f32 %v4273_v47, %v3360_v31  ;;  %v7191_v45 = vadd.f32 %v6788_v59, %v2243_v49 }
 0x21e   :  { %v1899_v38 = vmul.f32 %v1680_v12, %v7023_v46  ;;  %4278 = vpow2.f32 %v3791_v54  ;;  %v7194_v21 = vadd.f32 %v6757_v16, %v521_v28  ;;  %v7201_v19 = vadd.f32 %v6788_v59, %v2212_v5 }
 0x21f   :  { %3622 = vst.msk [vmem:[%s8271_s8 + $0xa0] sm:$0xff] %vm1911_vm4, %v3558_v53  ;;  %v3362_v43 = vadd.f32 %v4273_v47, %v3361_v56  ;;  %v553_v14 = vmul.f32 %v6772_v61, %v465_v34  ;;  %v2244_v46 = vmul.f32 %v6766_v58, %v2156_v13  ;;  %v3370_v24 = vor.u32 1.1754944e-38, %v3369_v63 }
 0x220   :  { %v4275_v55 = vpop.eup %4274  ;;  %1964 = vst.msk [vmem:[%s8270_s7 + $0x1a0] sm:$0xff] %vm1911_vm4, %v1899_v38  ;;  %v3919_v3 = vmul.f32 -1.442695, %v7191_v45  ;;  %v3760_v10 = vmul.f32 -1.442695, %v7194_v21  ;;  %v1213_v51 = vand.u32 2147483648, %v7159_v23  ;;  %vm1207_vm7 = vweird.f32 %v7159_v23 }
 0x221   :  { %v4277_v41 = vpop.eup %4276  ;;  %v3366_v27 = vsel %vm3365_vm10, %v4273_v47, %v3362_v43  ;;  %v1203_v52 = vmul.f32 %v4275_v55, %v7159_v23  ;;  %v3888_v18 = vmul.f32 -1.442695, %v7201_v19  ;;  %v7222_v17 = vadd.f32 %v6757_v16, %v553_v14 }
 0x222   :  { %v3371_v50 = vsel %vm7164_vm14, %v3370_v24, %v3366_v27  ;;  %v7219_v25 = vadd.f32 1.0, %v4277_v41  ;;  %4280 = vpow2.f32 %v3919_v3  ;;  %v7226_v26 = vadd.f32 %v6788_v59, %v2244_v46 }
 0x223   :  { %v3590_v29 = vmul.f32 %v3371_v50, %v7031_v62  ;;  %v1204_v30 = vsub.f32 1.0, %v1203_v52  ;;  %4282 = vpow2.f32 %v3760_v10  ;;  %v522_v32 = vmul.f32 %v6772_v61, %v372_v57 }
 0x224   :  { %v4279_v15 = vpop.eup %4278  ;;  %4284 = vrcp.f32 %v7219_v25  ;;  %vm1208_vm13 = vweird.f32 %v4275_v55  ;;  %v3792_v63 = vmul.f32 -1.442695, %v7222_v17  ;;  %v3920_v1 = vmul.f32 -1.442695, %v7226_v26 }
 0x225   :  { %3654 = vst.msk [vmem:[%s8271_s8 + $0x1a0] sm:$0xff] %vm1911_vm4, %v3590_v29  ;;  %v1205_v11 = vmul.f32 %v4275_v55, %v1204_v30  ;;  %v7235_v62 = vadd.f32 1.0, %v4279_v15  ;;  %4286 = vpow2.f32 %v3888_v18  ;;  %vm1212_vm15 = vcmp.eq.f32.partialorder %v1211_v35, 8.507059e+37  ;;  %vm1209_vm5 = vmor %vm1207_vm7, %vm1208_vm13  ;;  %v7388_v29 = vld [vmem:[%s8267_s3] ss:$0 sm:$0xff] }
 0x226   :  { %v1214_v9 = vor.u32 1.1754944e-38, %v1213_v51  ;;  %v2902_v47 = vand.u32 2147483647, %v7219_v25  ;;  %v2904_v8 = vand.u32 2147483648, %v7219_v25  ;;  %v7245_v22 = vadd.f32 %v6757_v16, %v522_v32 }
 0x227   :  { %v1206_v6 = vadd.f32 %v4275_v55, %v1205_v11  ;;  %4288 = vrcp.f32 %v7235_v62  ;;  %v1693_v20 = vand.u32 2147483648, %v7235_v62  ;;  %v2213_v44 = vmul.f32 %v6766_v58, %v2063_v36 }
 0x228   :  { %v4281_v61 = vpop.eup %4280  ;;  %4290 = vpow2.f32 %v3792_v63  ;;  %v1691_v23 = vand.u32 2147483647, %v7235_v62  ;;  %vm2898_vm11 = vweird.f32 %v7219_v25  ;;  %vm7258_vm8 = vcmp.eq.f32.partialorder %v2902_v47, 8.507059e+37 }
 0x229   :  { %v4283_v39 = vpop.eup %4282  ;;  %v1210_v33 = vsel %vm1209_vm5, %v4275_v55, %v1206_v6  ;;  %v7248_v48 = vadd.f32 1.0, %v4281_v61  ;;  %4292 = vpow2.f32 %v3920_v1  ;;  %v2905_v58 = vor.u32 1.1754944e-38, %v2904_v8 }
 0x22a   :  { %v4285_v60 = vpop.eup %4284  ;;  %v1215_v42 = vsel %vm1212_vm15, %v1214_v9, %v1210_v33  ;;  %v7252_v49 = vadd.f32 1.0, %v4283_v39  ;;  %v3761_v5 = vmul.f32 -1.442695, %v7245_v22  ;;  %vm1687_vm9 = vweird.f32 %v7235_v62 }
 0x22b   :  { %v1868_v28 = vmul.f32 %v1215_v42, %v7075_v40  ;;  %v2894_v16 = vmul.f32 %v4285_v60, %v7219_v25  ;;  %4294 = vrcp.f32 %v7248_v48  ;;  %v4287_v7 = vpop.eup %4286  ;;  %v1694_v0 = vor.u32 1.1754944e-38, %v1693_v20 }
 0x22c   :  { %4296 = vrcp.f32 %v7252_v49  ;;  %v7270_v54 = vadd.f32 %v6788_v59, %v2213_v44  ;;  %vm7273_vm0 = vcmp.eq.f32.partialorder %v1691_v23, 8.507059e+37  ;;  %v3382_v12 = vand.u32 2147483647, %v7248_v48 }
 0x22d   :  { %v4289_v4 = vpop.eup %4288  ;;  %1933 = vst.msk [vmem:[%s8270_s7 + $0xa8] sm:$0xff] %vm1911_vm4, %v1868_v28  ;;  %v2895_v40 = vsub.f32 1.0, %v2894_v16  ;;  %v3384_v56 = vand.u32 2147483648, %v7248_v48  ;;  %v1228_v35 = vand.u32 2147483648, %v7252_v49  ;;  %vm2899_vm12 = vweird.f32 %v4285_v60 }
 0x22e   :  { %v4291_v34 = vpop.eup %4290  ;;  %v1683_v13 = vmul.f32 %v4289_v4, %v7235_v62  ;;  %v1226_v43 = vand.u32 2147483647, %v7252_v49  ;;  %v7281_v14 = vadd.f32 1.0, %v4287_v7  ;;  %vm3378_vm1 = vweird.f32 %v7248_v48  ;;  %vm2900_vm6 = vmor %vm2898_vm11, %vm2899_vm12 }
 0x22f   :  { %v2896_v38 = vmul.f32 %v4285_v60, %v2895_v40  ;;  %v4293_v59 = vpop.eup %4292  ;;  %vm1222_vm14 = vweird.f32 %v7252_v49  ;;  %4298 = vpow2.f32 %v3761_v5  ;;  %vm1688_vm3 = vweird.f32 %v4289_v4 }
 0x230   :  { %v1684_v46 = vsub.f32 1.0, %v1683_v13  ;;  %4300 = vrcp.f32 %v7281_v14  ;;  %v7286_v3 = vadd.f32 1.0, %v4291_v34  ;;  %vm7291_vm2 = vcmp.eq.f32.partialorder %v3382_v12, 8.507059e+37  ;;  %vm1689_vm7 = vmor %vm1687_vm9, %vm1688_vm3  ;;  %v2159_v13 = vpop.f32.mrf.mxu3 }
 0x231   :  { %v4295_v55 = vpop.eup %4294  ;;  %v2897_v24 = vadd.f32 %v4285_v60, %v2896_v38  ;;  %v3385_v51 = vor.u32 1.1754944e-38, %v3384_v56  ;;  %v1229_v18 = vor.u32 1.1754944e-38, %v1228_v35  ;;  %vm7296_vm10 = vcmp.eq.f32.partialorder %v1226_v43, 8.507059e+37  ;;  %v375_v35 = vpop.f32.mrf.mxu0 }
 0x232   :  { %v4297_v10 = vpop.eup %4296  ;;  %v1685_v41 = vmul.f32 %v4289_v4, %v1684_v46  ;;  %v3374_v27 = vmul.f32 %v4295_v55, %v7248_v48  ;;  %v7300_v30 = vadd.f32 1.0, %v4293_v59  ;;  %v3889_v25 = vmul.f32 -1.442695, %v7270_v54 }
 0x233   :  { %v2901_v57 = vsel %vm2900_vm6, %v4285_v60, %v2897_v24  ;;  %v1218_v50 = vmul.f32 %v4297_v10, %v7252_v49  ;;  %v2917_v63 = vand.u32 2147483647, %v7281_v14  ;;  %v2919_v6 = vand.u32 2147483648, %v7281_v14  ;;  %v468_v60 = vpop.f32.mrf.mxu2 }
 0x234   :  { %v2906_v15 = vsel %vm7258_vm8, %v2905_v58, %v2901_v57  ;;  %v1686_v32 = vadd.f32 %v4289_v4, %v1685_v41  ;;  %v3375_v11 = vsub.f32 1.0, %v3374_v27  ;;  %4302 = vrcp.f32 %v7286_v3 }
 0x235   :  { %v3559_v1 = vmul.f32 %v2906_v15, %v7147_v37  ;;  %v1219_v36 = vsub.f32 1.0, %v1218_v50  ;;  %v4299_v9 = vpop.eup %4298  ;;  %vm3379_vm13 = vweird.f32 %v4295_v55  ;;  %vm2913_vm15 = vweird.f32 %v7281_v14 }
 0x236   :  { %v1690_v61 = vsel %vm1689_vm7, %v4289_v4, %v1686_v32  ;;  %v3376_v47 = vmul.f32 %v4295_v55, %v3375_v11  ;;  %v4301_v8 = vpop.eup %4300  ;;  %vm1223_vm5 = vweird.f32 %v4297_v10  ;;  %4304 = vrcp.f32 %v7300_v30  ;;  %vm3380_vm8 = vmor %vm3378_vm1, %vm3379_vm13 }
 0x237   :  { %3623 = vst.msk [vmem:[%s8271_s8 + $0xa8] sm:$0xff] %vm1911_vm4, %v3559_v1  ;;  %v1695_v37 = vsel %vm7273_vm0, %v1694_v0, %v1690_v61  ;;  %v1220_v62 = vmul.f32 %v4297_v10, %v1219_v36  ;;  %v2909_v20 = vmul.f32 %v4301_v8, %v7281_v14  ;;  %vm7322_vm11 = vcmp.eq.f32.partialorder %v2917_v63, 8.507059e+37  ;;  %vm1224_vm9 = vmor %vm1222_vm14, %vm1223_vm5  ;;  %v7379_v14 = vld [vmem:[%s8268_s5] ss:$0 sm:$0xff] }
 0x238   :  { %v1900_v39 = vmul.f32 %v1695_v37, %v7155_v2  ;;  %v3377_v33 = vadd.f32 %v4295_v55, %v3376_v47  ;;  %v2920_v23 = vor.u32 1.1754944e-38, %v2919_v6  ;;  %v1706_v28 = vand.u32 2147483647, %v7286_v3  ;;  %v7404_v47 = vld [vmem:[%s8269_s6] ss:$0 sm:$0xff] }
 0x239   :  { %v1221_v42 = vadd.f32 %v4297_v10, %v1220_v62  ;;  %v1708_v16 = vand.u32 2147483648, %v7286_v3  ;;  %v2910_v7 = vsub.f32 1.0, %v2909_v20  ;;  %vm2914_vm0 = vweird.f32 %v4301_v8 }
 0x23a   :  { %1965 = vst.msk [vmem:[%s8270_s7 + $0x1a8] sm:$0xff] %vm1911_vm4, %v1900_v39  ;;  %v3381_v2 = vsel %vm3380_vm8, %v4295_v55, %v3377_v33  ;;  %vm1702_vm12 = vweird.f32 %v7286_v3  ;;  %v7337_v48 = vadd.f32 1.0, %v4299_v9  ;;  %v4303_v31 = vpop.eup %4302  ;;  %v3397_v4 = vand.u32 2147483647, %v7300_v30  ;;  %vm2915_vm3 = vmor %vm2913_vm15, %vm2914_vm0  ;;  %v7373_v55 = vld [vmem:[%s8266_s2] ss:$0 sm:$0xff] }
 0x23b   :  { %v3386_v58 = vsel %vm7291_vm2, %v3385_v51, %v3381_v2  ;;  %v1225_v5 = vsel %vm1224_vm9, %v4297_v10, %v1221_v42  ;;  %4306 = vpow2.f32 %v3889_v25  ;;  %v2911_v0 = vmul.f32 %v4301_v8, %v2910_v7  ;;  %v2066_v10 = vpop.f32.mrf.mxu1  ;;  %v471_v1 = vpop.f32.mrf.mxu2 }
 0x23c   :  { %v3591_v40 = vmul.f32 %v3386_v58, %v7191_v45  ;;  %v1230_v49 = vsel %vm7296_vm10, %v1229_v18, %v1225_v5  ;;  %v1698_v34 = vmul.f32 %v4303_v31, %v7286_v3  ;;  %v4305_v53 = vpop.eup %4304  ;;  %vm7347_vm1 = vcmp.eq.f32.partialorder %v1706_v28, 8.507059e+37  ;;  %v378_v2 = vpop.f32.mrf.mxu0 }
 0x23d   :  { %v1869_v12 = vmul.f32 %v1230_v49, %v7194_v21  ;;  %vm3393_vm14 = vweird.f32 %v7300_v30  ;;  %4308 = vrcp.f32 %v7337_v48  ;;  %v2912_v45 = vadd.f32 %v4301_v8, %v2911_v0 }
 0x23e   :  { %3655 = vst.msk [vmem:[%s8271_s8 + $0x1a8] sm:$0xff] %vm1911_vm4, %v3591_v40  ;;  %v1699_v38 = vsub.f32 1.0, %v1698_v34  ;;  %v1709_v43 = vor.u32 1.1754944e-38, %v1708_v16  ;;  %v3389_v59 = vmul.f32 %v4305_v53, %v7300_v30  ;;  %vm1703_vm6 = vweird.f32 %v4303_v31 }
 0x23f   :  { %1934 = vst.msk [vmem:[%s8270_s7 + $0xb0] sm:$0xff] %vm1911_vm4, %v1869_v12  ;;  %vm7365_vm2 = vcmp.eq.f32.partialorder %v3397_v4, 8.507059e+37  ;;  %v3399_v46 = vand.u32 2147483648, %v7300_v30  ;;  %v554_v24 = vmul.f32 %v7373_v55, %v468_v60  ;;  %v2916_v41 = vsel %vm2915_vm3, %v4301_v8, %v2912_v45  ;;  %vm1704_vm7 = vmor %vm1702_vm12, %vm1703_vm6 }
 0x240   :  { %v1700_v27 = vmul.f32 %v4303_v31, %v1699_v38  ;;  %v3390_v52 = vsub.f32 1.0, %v3389_v59  ;;  %v2245_v51 = vmul.f32 %v7379_v14, %v2159_v13  ;;  %v2921_v57 = vsel %vm7322_vm11, %v2920_v23, %v2916_v41  ;;  %v2162_v23 = vpop.f32.mrf.mxu3 }
 0x241   :  { %v4307_v18 = vpop.eup %4306  ;;  %vm3394_vm10 = vweird.f32 %v4305_v53  ;;  %v1241_v50 = vand.u32 2147483647, %v7337_v48  ;;  %v7391_v25 = vadd.f32 %v7388_v29, %v554_v24  ;;  %v3560_v15 = vmul.f32 %v2921_v57, %v7201_v19 }
 0x242   :  { %v1701_v32 = vadd.f32 %v4303_v31, %v1700_v27  ;;  %v3391_v11 = vmul.f32 %v4305_v53, %v3390_v52  ;;  %v7394_v63 = vadd.f32 1.0, %v4307_v18  ;;  %v3400_v6 = vor.u32 1.1754944e-38, %v3399_v46  ;;  %vm3395_vm13 = vmor %vm3393_vm14, %vm3394_vm10 }
 0x243   :  { %v4309_v36 = vpop.eup %4308  ;;  %v1243_v9 = vand.u32 2147483648, %v7337_v48  ;;  %v3793_v61 = vmul.f32 -1.442695, %v7391_v25  ;;  %v7407_v19 = vadd.f32 %v7404_v47, %v2245_v51  ;;  %3624 = vst.msk [vmem:[%s8271_s8 + $0xb0] sm:$0xff] %vm1911_vm4, %v3560_v15  ;;  %v523_v62 = vmul.f32 %v7373_v55, %v375_v35  ;;  %v2069_v40 = vpop.f32.mrf.mxu1 }
 0x244   :  { %v1705_v3 = vsel %vm1704_vm7, %v4303_v31, %v1701_v32  ;;  %v3392_v8 = vadd.f32 %v4305_v53, %v3391_v11  ;;  %v1233_v37 = vmul.f32 %v4309_v36, %v7337_v48  ;;  %vm1237_vm15 = vweird.f32 %v7337_v48  ;;  %v474_v59 = vpop.f32.mrf.mxu2 }
 0x245   :  { %v1710_v39 = vsel %vm7347_vm1, %v1709_v43, %v1705_v3  ;;  %4310 = vrcp.f32 %v7394_v63  ;;  %v2214_v33 = vmul.f32 %v7379_v14, %v2066_v10  ;;  %vm7424_vm5 = vcmp.eq.f32.partialorder %v1241_v50, 8.507059e+37 }
 0x246   :  { %v1901_v20 = vmul.f32 %v1710_v39, %v7222_v17  ;;  %v3396_v44 = vsel %vm3395_vm13, %v4305_v53, %v3392_v8  ;;  %v1234_v60 = vsub.f32 1.0, %v1233_v37  ;;  %v1244_v30 = vor.u32 1.1754944e-38, %v1243_v9 }
 0x247   :  { %v3401_v28 = vsel %vm7365_vm2, %v3400_v6, %v3396_v44  ;;  %4312 = vpow2.f32 %v3793_v61  ;;  %v3921_v16 = vmul.f32 -1.442695, %v7407_v19  ;;  %vm1238_vm11 = vweird.f32 %v4309_v36 }
 0x248   :  { %1966 = vst.msk [vmem:[%s8270_s7 + $0x1b0] sm:$0xff] %vm1911_vm4, %v1901_v20  ;;  %v3592_v17 = vmul.f32 %v3401_v28, %v7226_v26  ;;  %v1235_v7 = vmul.f32 %v4309_v36, %v1234_v60  ;;  %v7437_v31 = vadd.f32 %v7388_v29, %v523_v62  ;;  %v7440_v58 = vadd.f32 %v7404_v47, %v2214_v33  ;;  %vm1239_vm8 = vmor %vm1237_vm15, %vm1238_vm11  ;;  %v2165_v32 = vpop.f32.mrf.mxu3 }
 0x249   :  { %4314 = vpow2.f32 %v3921_v16  ;;  %v555_v5 = vmul.f32 %v7373_v55, %v471_v1  ;;  %v2246_v4 = vmul.f32 %v7379_v14, %v2162_v23  ;;  %v2932_v49 = vand.u32 2147483647, %v7394_v63 }
 0x24a   :  { %3656 = vst.msk [vmem:[%s8271_s8 + $0x1b0] sm:$0xff] %vm1911_vm4, %v3592_v17  ;;  %v1236_v26 = vadd.f32 %v4309_v36, %v1235_v7  ;;  %v3762_v0 = vmul.f32 -1.442695, %v7437_v31  ;;  %v524_v34 = vmul.f32 %v7373_v55, %v378_v2  ;;  %v2934_v53 = vand.u32 2147483648, %v7394_v63 }
 0x24b   :  { %v4311_v13 = vpop.eup %4310  ;;  %v3890_v12 = vmul.f32 -1.442695, %v7440_v58  ;;  %v7456_v56 = vadd.f32 %v7388_v29, %v555_v5  ;;  %v7459_v35 = vadd.f32 %v7404_v47, %v2246_v4  ;;  %v2215_v43 = vmul.f32 %v7379_v14, %v2069_v40 }
 0x24c   :  { %v1240_v45 = vsel %vm1239_vm8, %v4309_v36, %v1236_v26  ;;  %v2924_v38 = vmul.f32 %v4311_v13, %v7394_v63  ;;  %4316 = vpow2.f32 %v3762_v0  ;;  %v7471_v52 = vadd.f32 %v7388_v29, %v524_v34 }
 0x24d   :  { %v4313_v21 = vpop.eup %4312  ;;  %v1245_v48 = vsel %vm7424_vm5, %v1244_v30, %v1240_v45  ;;  %4318 = vpow2.f32 %v3890_v12  ;;  %v3794_v46 = vmul.f32 -1.442695, %v7456_v56  ;;  %v3922_v24 = vmul.f32 -1.442695, %v7459_v35 }
 0x24e   :  { %v1870_v10 = vmul.f32 %v1245_v48, %v7245_v22  ;;  %v2925_v41 = vsub.f32 1.0, %v2924_v38  ;;  %v7468_v27 = vadd.f32 1.0, %v4313_v21  ;;  %v556_v18 = vmul.f32 %v7373_v55, %v474_v59 }
 0x24f   :  { %v4315_v51 = vpop.eup %4314  ;;  %4320 = vpow2.f32 %v3794_v46  ;;  %vm2928_vm9 = vweird.f32 %v7394_v63  ;;  %vm2929_vm0 = vweird.f32 %v4311_v13  ;;  %vm7480_vm12 = vcmp.eq.f32.partialorder %v2932_v49, 8.507059e+37 }
 0x250   :  { %1935 = vst.msk [vmem:[%s8270_s7 + $0xb8] sm:$0xff] %vm1911_vm4, %v1870_v10  ;;  %v2926_v57 = vmul.f32 %v4311_v13, %v2925_v41  ;;  %4322 = vrcp.f32 %v7468_v27  ;;  %v7484_v50 = vadd.f32 1.0, %v4315_v51  ;;  %v3763_v15 = vmul.f32 -1.442695, %v7471_v52  ;;  %vm2930_vm1 = vmor %vm2928_vm9, %vm2929_vm0 }
 0x251   :  { %v2935_v36 = vor.u32 1.1754944e-38, %v2934_v53  ;;  %4324 = vpow2.f32 %v3922_v24  ;;  %v7488_v6 = vadd.f32 %v7404_v47, %v2215_v43  ;;  %v1721_v9 = vand.u32 2147483647, %v7468_v27 }
 0x252   :  { %v4317_v11 = vpop.eup %4316  ;;  %v2927_v1 = vadd.f32 %v4311_v13, %v2926_v57  ;;  %v1723_v61 = vand.u32 2147483648, %v7468_v27  ;;  %4326 = vrcp.f32 %v7484_v50  ;;  %v7494_v3 = vadd.f32 %v7388_v29, %v556_v18 }
 0x253   :  { %v4319_v63 = vpop.eup %4318  ;;  %v7496_v37 = vadd.f32 1.0, %v4317_v11  ;;  %v2247_v39 = vmul.f32 %v7379_v14, %v2165_v32  ;;  %vm1717_vm14 = vweird.f32 %v7468_v27  ;;  %4328 = vpow2.f32 %v3763_v15 }
 0x254   :  { %v2931_v8 = vsel %vm2930_vm1, %v4311_v13, %v2927_v1  ;;  %v7498_v62 = vadd.f32 1.0, %v4319_v63  ;;  %v3412_v42 = vand.u32 2147483647, %v7484_v50  ;;  %v3414_v23 = vand.u32 2147483648, %v7484_v50 }
 0x255   :  { %v4321_v33 = vpop.eup %4320  ;;  %v2936_v20 = vsel %vm7480_vm12, %v2935_v36, %v2931_v8  ;;  %4330 = vrcp.f32 %v7496_v37  ;;  %vm7509_vm3 = vcmp.eq.f32.partialorder %v1721_v9, 8.507059e+37  ;;  %v1724_v16 = vor.u32 1.1754944e-38, %v1723_v61 }
 0x256   :  { %v4323_v44 = vpop.eup %4322  ;;  %v3561_v60 = vmul.f32 %v2936_v20, %v7270_v54  ;;  %v7514_v2 = vmul.f32 -1.442695, %v7488_v6  ;;  %v7517_v17 = vmul.f32 -1.442695, %v7494_v3  ;;  %vm3408_vm6 = vweird.f32 %v7484_v50 }
 0x257   :  { %v1713_v28 = vmul.f32 %v4323_v44, %v7468_v27  ;;  %v4325_v54 = vpop.eup %4324  ;;  %v1258_v7 = vand.u32 2147483648, %v7496_v37  ;;  %4332 = vrcp.f32 %v7498_v62  ;;  %v7527_v5 = vadd.f32 %v7404_v47, %v2247_v39 }
 0x258   :  { %3625 = vst.msk [vmem:[%s8271_s8 + $0xb8] sm:$0xff] %vm1911_vm4, %v3561_v60  ;;  %v4327_v4 = vpop.eup %4326  ;;  %v1256_v26 = vand.u32 2147483647, %v7496_v37  ;;  %v2949_v49 = vand.u32 2147483648, %v7498_v62  ;;  %v7531_v0 = vadd.f32 1.0, %v4321_v33  ;;  %vm1718_vm2 = vweird.f32 %v4323_v44 }
 0x259   :  { %v1714_v40 = vsub.f32 1.0, %v1713_v28  ;;  %v3404_v34 = vmul.f32 %v4327_v4, %v7484_v50  ;;  %vm7534_vm10 = vcmp.eq.f32.partialorder %v3412_v42, 8.507059e+37  ;;  %v3415_v53 = vor.u32 1.1754944e-38, %v3414_v23  ;;  %v4329_v12 = vpop.eup %4328  ;;  %vm1719_vm11 = vmor %vm1717_vm14, %vm1718_vm2 }
 0x25a   :  { %vm1252_vm7 = vweird.f32 %v7496_v37  ;;  %vm2943_vm13 = vweird.f32 %v7498_v62  ;;  %v2947_v38 = vand.u32 2147483647, %v7498_v62  ;;  %4334 = vrcp.f32 %v7531_v0 }
 0x25b   :  { %v1715_v45 = vmul.f32 %v4323_v44, %v1714_v40  ;;  %v4331_v43 = vpop.eup %4330  ;;  %v3405_v59 = vsub.f32 1.0, %v3404_v34  ;;  %vm3409_vm15 = vweird.f32 %v4327_v4  ;;  %v1259_v21 = vor.u32 1.1754944e-38, %v1258_v7 }
 0x25c   :  { %v7542_v48 = vadd.f32 1.0, %v4325_v54  ;;  %v1248_v24 = vmul.f32 %v4331_v43, %v7496_v37  ;;  %vm7545_vm5 = vcmp.eq.f32.partialorder %v1256_v26, 8.507059e+37  ;;  %v2950_v41 = vor.u32 1.1754944e-38, %v2949_v49  ;;  %vm3410_vm12 = vmor %vm3408_vm6, %vm3409_vm15 }
 0x25d   :  { %v1716_v46 = vadd.f32 %v4323_v44, %v1715_v45  ;;  %v7549_v51 = vadd.f32 1.0, %v4329_v12  ;;  %v4333_v18 = vpop.eup %4332  ;;  %v3406_v57 = vmul.f32 %v4327_v4, %v3405_v59  ;;  %v1736_v22 = vand.u32 2147483647, %v7531_v0 }
 0x25e   :  { %v1738_v15 = vand.u32 2147483648, %v7531_v0  ;;  %4336 = vrcp.f32 %v7542_v48  ;;  %v1249_v11 = vsub.f32 1.0, %v1248_v24  ;;  %vm1253_vm8 = vweird.f32 %v4331_v43  ;;  %v477_v24 = vpop.f32.mrf.mxu2 }
 0x25f   :  { %v1720_v32 = vsel %vm1719_vm11, %v4323_v44, %v1716_v46  ;;  %v2939_v1 = vmul.f32 %v4333_v18, %v7498_v62  ;;  %vm7558_vm9 = vcmp.eq.f32.partialorder %v2947_v38, 8.507059e+37  ;;  %v3407_v63 = vadd.f32 %v4327_v4, %v3406_v57  ;;  %vm1254_vm6 = vmor %vm1252_vm7, %vm1253_vm8  ;;  %v381_v38 = vpop.f32.mrf.mxu0  ;;  %v2072_v46 = vpop.f32.mrf.mxu1 }
 0x260   :  { %v1725_v27 = vsel %vm7509_vm3, %v1724_v16, %v1720_v32  ;;  %vm1732_vm0 = vweird.f32 %v7531_v0  ;;  %v3427_v9 = vand.u32 2147483647, %v7542_v48  ;;  %v3429_v61 = vand.u32 2147483648, %v7542_v48  ;;  %v4335_v8 = vpop.eup %4334 }
 0x261   :  { %v1902_v39 = vmul.f32 %v1725_v27, %v7391_v25  ;;  %v1250_v33 = vmul.f32 %v4331_v43, %v1249_v11  ;;  %v2940_v20 = vsub.f32 1.0, %v2939_v1  ;;  %4338 = vrcp.f32 %v7549_v51 }
 0x262   :  { %v3411_v44 = vsel %vm3410_vm12, %v4327_v4, %v3407_v63  ;;  %v1728_v60 = vmul.f32 %v4335_v8, %v7531_v0  ;;  %vm7573_vm1 = vcmp.eq.f32.partialorder %v1736_v22, 8.507059e+37  ;;  %v1739_v23 = vor.u32 1.1754944e-38, %v1738_v15  ;;  %v2168_v22 = vpop.f32.mrf.mxu3 }
 0x263   :  { %1967 = vst.msk [vmem:[%s8270_s7 + $0x1b8] sm:$0xff] %vm1911_vm4, %v1902_v39  ;;  %v3416_v25 = vsel %vm7534_vm10, %v3415_v53, %v3411_v44  ;;  %v1251_v50 = vadd.f32 %v4331_v43, %v1250_v33  ;;  %v2941_v28 = vmul.f32 %v4333_v18, %v2940_v20  ;;  %vm2944_vm14 = vweird.f32 %v4333_v18 }
 0x264   :  { %vm3423_vm3 = vweird.f32 %v7542_v48  ;;  %v4337_v30 = vpop.eup %4336  ;;  %v3593_v16 = vmul.f32 %v3416_v25, %v7407_v19  ;;  %v1729_v54 = vsub.f32 1.0, %v1728_v60  ;;  %vm1733_vm2 = vweird.f32 %v4335_v8  ;;  %vm2945_vm7 = vmor %vm2943_vm13, %vm2944_vm14 }
 0x265   :  { %v3430_v7 = vor.u32 1.1754944e-38, %v3429_v61  ;;  %v1255_v4 = vsel %vm1254_vm6, %v4331_v43, %v1251_v50  ;;  %v2942_v40 = vadd.f32 %v4333_v18, %v2941_v28  ;;  %v3419_v26 = vmul.f32 %v4337_v30, %v7542_v48  ;;  %vm1734_vm13 = vmor %vm1732_vm0, %vm1733_vm2 }
 0x266   :  { %vm7589_vm10 = vcmp.eq.f32.partialorder %v3427_v9, 8.507059e+37  ;;  %vm1267_vm15 = vweird.f32 %v7549_v51  ;;  %3657 = vst.msk [vmem:[%s8271_s8 + $0x1b8] sm:$0xff] %vm1911_vm4, %v3593_v16  ;;  %v1260_v19 = vsel %vm7545_vm5, %v1259_v21, %v1255_v4  ;;  %v1730_v37 = vmul.f32 %v4335_v8, %v1729_v54 }
 0x267   :  { %vm3424_vm11 = vweird.f32 %v4337_v30  ;;  %v1271_v34 = vand.u32 2147483647, %v7549_v51  ;;  %v4339_v13 = vpop.eup %4338  ;;  %v1871_v53 = vmul.f32 %v1260_v19, %v7437_v31  ;;  %v2946_v12 = vsel %vm2945_vm7, %v4333_v18, %v2942_v40  ;;  %v384_v50 = vpop.f32.mrf.mxu0 }
 0x268   :  { %v3420_v45 = vsub.f32 1.0, %v3419_v26  ;;  %4340 = vpow2.f32 %v7514_v2  ;;  %v2951_v43 = vsel %vm7558_vm9, %v2950_v41, %v2946_v12  ;;  %v1731_v59 = vadd.f32 %v4335_v8, %v1730_v37  ;;  %vm3425_vm8 = vmor %vm3423_vm3, %vm3424_vm11  ;;  %v2075_v26 = vpop.f32.mrf.mxu1 }
 0x269   :  { %v1263_v21 = vmul.f32 %v4339_v13, %v7549_v51  ;;  %v1273_v62 = vand.u32 2147483648, %v7549_v51  ;;  %1936 = vst.msk [vmem:[%s8270_s7 + $0xc0] sm:$0xff] %vm1911_vm4, %v1871_v53  ;;  %v3562_v31 = vmul.f32 %v2951_v43, %v7440_v58  ;;  %vm1268_vm5 = vweird.f32 %v4339_v13 }
 0x26a   :  { %v3421_v2 = vmul.f32 %v4337_v30, %v3420_v45  ;;  %4342 = vpow2.f32 %v7517_v17  ;;  %v1735_v10 = vsel %vm1734_vm13, %v4335_v8, %v1731_v59  ;;  %v3923_v18 = vmul.f32 -1.442695, %v7527_v5  ;;  %vm1269_vm9 = vmor %vm1267_vm15, %vm1268_vm5 }
 0x26b   :  { %v1264_v41 = vsub.f32 1.0, %v1263_v21  ;;  %v525_v57 = vmul.f32 %v7373_v55, %v381_v38  ;;  %3626 = vst.msk [vmem:[%s8271_s8 + $0xc0] sm:$0xff] %vm1911_vm4, %v3562_v31  ;;  %v1740_v58 = vsel %vm7573_vm1, %v1739_v23, %v1735_v10  ;;  %v2216_v15 = vmul.f32 %v7379_v14, %v2072_v46 }
 0x26c   :  { %v3422_v0 = vadd.f32 %v4337_v30, %v3421_v2  ;;  %v557_v17 = vmul.f32 %v7373_v55, %v477_v24  ;;  %v1903_v32 = vmul.f32 %v1740_v58, %v7456_v56  ;;  %4344 = vpow2.f32 %v3923_v18 }
 0x26d   :  { %v1265_v11 = vmul.f32 %v4339_v13, %v1264_v41  ;;  %v7634_v1 = vadd.f32 %v7388_v29, %v525_v57  ;;  %v7637_v63 = vadd.f32 %v7404_v47, %v2216_v15  ;;  %v2248_v61 = vmul.f32 %v7379_v14, %v2168_v22 }
 0x26e   :  { %v4341_v36 = vpop.eup %4340  ;;  %v3426_v27 = vsel %vm3425_vm8, %v4337_v30, %v3422_v0  ;;  %v7640_v9 = vadd.f32 %v7388_v29, %v557_v17  ;;  %1968 = vst.msk [vmem:[%s8270_s7 + $0x1c0] sm:$0xff] %vm1911_vm4, %v1903_v32  ;;  %v1274_v44 = vor.u32 1.1754944e-38, %v1273_v62  ;;  %vm1272_vm0 = vcmp.eq.f32.partialorder %v1271_v34, 8.507059e+37 }
 0x26f   :  { %v3431_v56 = vsel %vm7589_vm10, %v3430_v7, %v3426_v27  ;;  %v1266_v48 = vadd.f32 %v4339_v13, %v1265_v11  ;;  %v7649_v8 = vadd.f32 1.0, %v4341_v36  ;;  %v3764_v39 = vmul.f32 -1.442695, %v7634_v1 }
 0x270   :  { %v4343_v33 = vpop.eup %4342  ;;  %v3594_v20 = vmul.f32 %v3431_v56, %v7459_v35  ;;  %v3892_v60 = vmul.f32 -1.442695, %v7637_v63  ;;  %v7658_v42 = vadd.f32 %v7404_v47, %v2248_v61  ;;  %v3796_v51 = vmul.f32 -1.442695, %v7640_v9 }
 0x271   :  { %v1270_v23 = vsel %vm1269_vm9, %v4339_v13, %v1266_v48  ;;  %4346 = vrcp.f32 %v7649_v8  ;;  %v7665_v25 = vadd.f32 1.0, %v4343_v33  ;;  %v2962_v16 = vand.u32 2147483647, %v7649_v8 }
 0x272   :  { %3658 = vst.msk [vmem:[%s8271_s8 + $0x1c0] sm:$0xff] %vm1911_vm4, %v3594_v20  ;;  %v1275_v35 = vsel %vm1272_vm0, %v1274_v44, %v1270_v23  ;;  %4348 = vpow2.f32 %v3764_v39  ;;  %v4345_v28 = vpop.eup %4344  ;;  %v2964_v54 = vand.u32 2147483648, %v7649_v8  ;;  %v3924_v7 = vmul.f32 -1.442695, %v7658_v42 }
 0x273   :  { %v1872_v30 = vmul.f32 %v1275_v35, %v7471_v52  ;;  %4350 = vpow2.f32 %v3892_v60  ;;  %v7677_v4 = vadd.f32 1.0, %v4345_v28  ;;  %v526_v40 = vmul.f32 %v7373_v55, %v384_v50  ;;  %v480_v52 = vpop.f32.mrf.mxu2 }
 0x274   :  { %4352 = vrcp.f32 %v7665_v25  ;;  %vm2958_vm12 = vweird.f32 %v7649_v8  ;;  %v1751_v19 = vand.u32 2147483647, %v7665_v25  ;;  %v1753_v37 = vand.u32 2147483648, %v7665_v25 }
 0x275   :  { %1937 = vst.msk [vmem:[%s8270_s7 + $0xc8] sm:$0xff] %vm1911_vm4, %v1872_v30  ;;  %4354 = vpow2.f32 %v3796_v51  ;;  %vm7685_vm1 = vcmp.eq.f32.partialorder %v2962_v16, 8.507059e+37  ;;  %v2965_v12 = vor.u32 1.1754944e-38, %v2964_v54  ;;  %v2217_v45 = vmul.f32 %v7379_v14, %v2075_v26 }
 0x276   :  { %4356 = vrcp.f32 %v7677_v4  ;;  %v3444_v43 = vand.u32 2147483648, %v7677_v4  ;;  %v7694_v21 = vadd.f32 %v7388_v29, %v526_v40  ;;  %v558_v62 = vmul.f32 %v7373_v55, %v480_v52 }
 0x277   :  { %v4347_v49 = vpop.eup %4346  ;;  %4358 = vpow2.f32 %v3924_v7  ;;  %vm1747_vm14 = vweird.f32 %v7665_v25  ;;  %v3442_v31 = vand.u32 2147483647, %v7677_v4  ;;  %vm7702_vm3 = vcmp.eq.f32.partialorder %v1751_v19, 8.507059e+37 }
 0x278   :  { %v4349_v34 = vpop.eup %4348  ;;  %v2954_v13 = vmul.f32 %v4347_v49, %v7649_v8  ;;  %v1754_v18 = vor.u32 1.1754944e-38, %v1753_v37  ;;  %vm2959_vm6 = vweird.f32 %v4347_v49  ;;  %vm3438_vm2 = vweird.f32 %v7677_v4 }
 0x279   :  { %v4351_v38 = vpop.eup %4350  ;;  %v7691_v59 = vadd.f32 1.0, %v4349_v34  ;;  %v7710_v58 = vadd.f32 %v7404_v47, %v2217_v45  ;;  %v3445_v17 = vor.u32 1.1754944e-38, %v3444_v43  ;;  %v3765_v32 = vmul.f32 -1.442695, %v7694_v21  ;;  %vm2960_vm11 = vmor %vm2958_vm12, %vm2959_vm6 }
 0x27a   :  { %v4353_v46 = vpop.eup %4352  ;;  %v2955_v24 = vsub.f32 1.0, %v2954_v13  ;;  %v7699_v2 = vadd.f32 1.0, %v4351_v38  ;;  %v7714_v11 = vadd.f32 %v7388_v29, %v558_v62  ;;  %vm7717_vm15 = vcmp.eq.f32.partialorder %v3442_v31, 8.507059e+37 }
 0x27b   :  { %v1743_v10 = vmul.f32 %v4353_v46, %v7665_v25  ;;  %4360 = vrcp.f32 %v7691_v59  ;;  %v4355_v57 = vpop.eup %4354  ;;  %vm1748_vm10 = vweird.f32 %v4353_v46  ;;  %vm1282_vm7 = vweird.f32 %v7691_v59 }
 0x27c   :  { %v2956_v22 = vmul.f32 %v4347_v49, %v2955_v24  ;;  %4362 = vrcp.f32 %v7699_v2  ;;  %v4357_v0 = vpop.eup %4356  ;;  %v1286_v39 = vand.u32 2147483647, %v7691_v59  ;;  %v1288_v33 = vand.u32 2147483648, %v7691_v59  ;;  %vm1749_vm8 = vmor %vm1747_vm14, %vm1748_vm10 }
 0x27d   :  { %v1744_v15 = vsub.f32 1.0, %v1743_v10  ;;  %v4359_v36 = vpop.eup %4358  ;;  %v3434_v61 = vmul.f32 %v4357_v0, %v7677_v4  ;;  %vm2973_vm13 = vweird.f32 %v7699_v2  ;;  %v2977_v60 = vand.u32 2147483647, %v7699_v2 }
 0x27e   :  { %v2957_v27 = vadd.f32 %v4347_v49, %v2956_v22  ;;  %v7729_v23 = vadd.f32 1.0, %v4355_v57  ;;  %vm3439_vm5 = vweird.f32 %v4357_v0  ;;  %4364 = vpow2.f32 %v3765_v32 }
 0x27f   :  { %v1745_v48 = vmul.f32 %v4353_v46, %v1744_v15  ;;  %v3435_v44 = vsub.f32 1.0, %v3434_v61  ;;  %v7738_v54 = vadd.f32 1.0, %v4359_v36  ;;  %v2979_v26 = vand.u32 2147483648, %v7699_v2  ;;  %vm3440_vm0 = vmor %vm3438_vm2, %vm3439_vm5  ;;  %v387_v61 = vpop.f32.mrf.mxu0 }
 0x280   :  { %v2961_v20 = vsel %vm2960_vm11, %v4347_v49, %v2957_v27  ;;  %4366 = vrcp.f32 %v7729_v23  ;;  %vm7749_vm9 = vcmp.eq.f32.partialorder %v1286_v39, 8.507059e+37  ;;  %v1289_v37 = vor.u32 1.1754944e-38, %v1288_v33  ;;  %v483_v49 = vpop.f32.mrf.mxu2 }
 0x281   :  { %v4361_v35 = vpop.eup %4360  ;;  %v2966_v51 = vsel %vm7685_vm1, %v2965_v12, %v2961_v20  ;;  %v1746_v50 = vadd.f32 %v4353_v46, %v1745_v48  ;;  %v3436_v30 = vmul.f32 %v4357_v0, %v3435_v44  ;;  %v3893_v13 = vmul.f32 -1.442695, %v7710_v58  ;;  %v2078_v20 = vpop.f32.mrf.mxu1 }
 0x282   :  { %v4363_v8 = vpop.eup %4362  ;;  %v3563_v28 = vmul.f32 %v2966_v51, %v7488_v6  ;;  %v1278_v16 = vmul.f32 %v4361_v35, %v7691_v59  ;;  %vm1283_vm12 = vweird.f32 %v4361_v35  ;;  %4368 = vrcp.f32 %v7738_v54 }
 0x283   :  { %v1750_v7 = vsel %vm1749_vm8, %v4353_v46, %v1746_v50  ;;  %v2969_v40 = vmul.f32 %v4363_v8, %v7699_v2  ;;  %v3437_v25 = vadd.f32 %v4357_v0, %v3436_v30  ;;  %vm2974_vm1 = vweird.f32 %v4363_v8  ;;  %vm1284_vm6 = vmor %vm1282_vm7, %vm1283_vm12 }
 0x284   :  { %3627 = vst.msk [vmem:[%s8271_s8 + $0xc8] sm:$0xff] %vm1911_vm4, %v3563_v28  ;;  %v1755_v6 = vsel %vm7702_vm3, %v1754_v18, %v1750_v7  ;;  %v1279_v52 = vsub.f32 1.0, %v1278_v16  ;;  %v4365_v45 = vpop.eup %4364  ;;  %vm7765_vm14 = vcmp.eq.f32.partialorder %v2977_v60, 8.507059e+37  ;;  %v2980_v46 = vor.u32 1.1754944e-38, %v2979_v26  ;;  %vm2975_vm2 = vmor %vm2973_vm13, %vm2974_vm1 }
 0x285   :  { %v1904_v19 = vmul.f32 %v1755_v6, %v7494_v3  ;;  %v2970_v34 = vsub.f32 1.0, %v2969_v40  ;;  %v3441_v53 = vsel %vm3440_vm0, %v4357_v0, %v3437_v25  ;;  %vm1762_vm3 = vweird.f32 %v7729_v23 }
 0x286   :  { %v1280_v12 = vmul.f32 %v4361_v35, %v1279_v52  ;;  %v3446_v3 = vsel %vm7717_vm15, %v3445_v17, %v3441_v53  ;;  %v4367_v24 = vpop.eup %4366  ;;  %v1766_v10 = vand.u32 2147483647, %v7729_v23  ;;  %v7774_v41 = vadd.f32 1.0, %v4365_v45  ;;  %v2171_v17 = vpop.f32.mrf.mxu3 }
 0x287   :  { %1969 = vst.msk [vmem:[%s8270_s7 + $0x1c8] sm:$0xff] %vm1911_vm4, %v1904_v19  ;;  %v2971_v4 = vmul.f32 %v4363_v8, %v2970_v34  ;;  %v3595_v43 = vmul.f32 %v3446_v3, %v7527_v5  ;;  %4370 = vpow2.f32 %v3893_v13  ;;  %v1758_v18 = vmul.f32 %v4367_v24, %v7729_v23 }
 0x288   :  { %v1281_v62 = vadd.f32 %v4361_v35, %v1280_v12  ;;  %v1768_v59 = vand.u32 2147483648, %v7729_v23  ;;  %v3797_v57 = vmul.f32 -1.442695, %v7714_v11  ;;  %v3457_v15 = vand.u32 2147483647, %v7738_v54  ;;  %v4369_v32 = vpop.eup %4368 }
 0x289   :  { %v2972_v31 = vadd.f32 %v4363_v8, %v2971_v4  ;;  %3659 = vst.msk [vmem:[%s8271_s8 + $0x1c8] sm:$0xff] %vm1911_vm4, %v3595_v43  ;;  %4372 = vrcp.f32 %v7774_v41  ;;  %v1759_v27 = vsub.f32 1.0, %v1758_v18  ;;  %vm3453_vm10 = vweird.f32 %v7738_v54 }
 0x28a   :  { %v1285_v5 = vsel %vm1284_vm6, %v4361_v35, %v1281_v62  ;;  %vm7794_vm15 = vcmp.eq.f32.partialorder %v1766_v10, 8.507059e+37  ;;  %v3449_v39 = vmul.f32 %v4369_v32, %v7738_v54  ;;  %v3459_v33 = vand.u32 2147483648, %v7738_v54 }
 0x28b   :  { %v1290_v22 = vsel %vm7749_vm9, %v1289_v37, %v1285_v5  ;;  %v2976_v0 = vsel %vm2975_vm2, %v4363_v8, %v2972_v31  ;;  %vm1763_vm7 = vweird.f32 %v4367_v24  ;;  %4374 = vpow2.f32 %v3797_v57 }
 0x28c   :  { %v1873_v36 = vmul.f32 %v1290_v22, %v7634_v1  ;;  %v2981_v2 = vsel %vm7765_vm14, %v2980_v46, %v2976_v0  ;;  %v1760_v1 = vmul.f32 %v4367_v24, %v1759_v27  ;;  %v2249_v44 = vmul.f32 %v7379_v14, %v2171_v17  ;;  %vm1764_vm13 = vmor %vm1762_vm3, %vm1763_vm7  ;;  %v390_v0 = vpop.f32.mrf.mxu0 }
 0x28d   :  { %v3564_v56 = vmul.f32 %v2981_v2, %v7637_v63  ;;  %v4371_v63 = vpop.eup %4370  ;;  %v1769_v60 = vor.u32 1.1754944e-38, %v1768_v59  ;;  %v3450_v35 = vsub.f32 1.0, %v3449_v39  ;;  %vm7809_vm11 = vcmp.eq.f32.partialorder %v3457_v15, 8.507059e+37 }
 0x28e   :  { %1938 = vst.msk [vmem:[%s8270_s7 + $0xd0] sm:$0xff] %vm1911_vm4, %v1873_v36  ;;  %v527_v50 = vmul.f32 %v7373_v55, %v387_v61  ;;  %v1761_v8 = vadd.f32 %v4367_v24, %v1760_v1  ;;  %v7814_v28 = vadd.f32 1.0, %v4371_v63  ;;  %v7817_v30 = vadd.f32 %v7404_v47, %v2249_v44  ;;  %v2174_v31 = vpop.f32.mrf.mxu3 }
 0x28f   :  { %3628 = vst.msk [vmem:[%s8271_s8 + $0xd0] sm:$0xff] %vm1911_vm4, %v3564_v56  ;;  %v2218_v16 = vmul.f32 %v7379_v14, %v2078_v20  ;;  %v4373_v7 = vpop.eup %4372  ;;  %v3451_v40 = vmul.f32 %v4369_v32, %v3450_v35  ;;  %vm3454_vm5 = vweird.f32 %v4369_v32  ;;  %v3460_v26 = vor.u32 1.1754944e-38, %v3459_v33  ;;  %v2081_v33 = vpop.f32.mrf.mxu1 }
 0x290   :  { %v7823_v6 = vadd.f32 %v7388_v29, %v527_v50  ;;  %v1765_v25 = vsel %vm1764_vm13, %v4367_v24, %v1761_v8  ;;  %v1293_v52 = vmul.f32 %v4373_v7, %v7774_v41  ;;  %vm1297_vm8 = vweird.f32 %v7774_v41  ;;  %vm3455_vm9 = vmor %vm3453_vm10, %vm3454_vm5 }
 0x291   :  { %4376 = vrcp.f32 %v7814_v28  ;;  %v1770_v19 = vsel %vm7794_vm15, %v1769_v60, %v1765_v25  ;;  %v3452_v37 = vadd.f32 %v4369_v32, %v3451_v40  ;;  %v1301_v23 = vand.u32 2147483647, %v7774_v41  ;;  %v4375_v13 = vpop.eup %4374  ;;  %v486_v25 = vpop.f32.mrf.mxu2 }
 0x292   :  { %v1303_v34 = vand.u32 2147483648, %v7774_v41  ;;  %v1905_v53 = vmul.f32 %v1770_v19, %v7640_v9  ;;  %v1294_v12 = vsub.f32 1.0, %v1293_v52  ;;  %v3925_v45 = vmul.f32 -1.442695, %v7817_v30 }
 0x293   :  { %v7837_v3 = vadd.f32 %v7404_v47, %v2218_v16  ;;  %v3456_v4 = vsel %vm3455_vm9, %v4369_v32, %v3452_v37  ;;  %v7839_v38 = vadd.f32 1.0, %v4375_v13  ;;  %v3766_v43 = vmul.f32 -1.442695, %v7823_v6 }
 0x294   :  { %v559_v62 = vmul.f32 %v7373_v55, %v483_v49  ;;  %1970 = vst.msk [vmem:[%s8270_s7 + $0x1d0] sm:$0xff] %vm1911_vm4, %v1905_v53  ;;  %v3461_v9 = vsel %vm7809_vm11, %v3460_v26, %v3456_v4  ;;  %v1295_v54 = vmul.f32 %v4373_v7, %v1294_v12  ;;  %vm1298_vm0 = vweird.f32 %v4373_v7 }
 0x295   :  { %4378 = vpow2.f32 %v3925_v45  ;;  %v3596_v46 = vmul.f32 %v3461_v9, %v7658_v42  ;;  %v2992_v24 = vand.u32 2147483647, %v7814_v28  ;;  %v2994_v18 = vand.u32 2147483648, %v7814_v28  ;;  %vm1299_vm12 = vmor %vm1297_vm8, %vm1298_vm0 }
 0x296   :  { %4380 = vrcp.f32 %v7839_v38  ;;  %v1296_v5 = vadd.f32 %v4373_v7, %v1295_v54  ;;  %v3894_v59 = vmul.f32 -1.442695, %v7837_v3  ;;  %vm1302_vm1 = vcmp.eq.f32.partialorder %v1301_v23, 8.507059e+37 }
 0x297   :  { %v4377_v10 = vpop.eup %4376  ;;  %4382 = vpow2.f32 %v3766_v43  ;;  %3660 = vst.msk [vmem:[%s8271_s8 + $0x1d0] sm:$0xff] %vm1911_vm4, %v3596_v46  ;;  %v1304_v42 = vor.u32 1.1754944e-38, %v1303_v34  ;;  %v7862_v22 = vadd.f32 %v7388_v29, %v559_v62  ;;  %vm2988_vm14 = vweird.f32 %v7814_v28 }
 0x298   :  { %v2984_v57 = vmul.f32 %v4377_v10, %v7814_v28  ;;  %v1300_v15 = vsel %vm1299_vm12, %v4373_v7, %v1296_v5  ;;  %4384 = vpow2.f32 %v3894_v59  ;;  %v2250_v17 = vmul.f32 %v7379_v14, %v2174_v31 }
 0x299   :  { %v1305_v32 = vsel %vm1302_vm1, %v1304_v42, %v1300_v15  ;;  %vm7866_vm3 = vcmp.eq.f32.partialorder %v2992_v24, 8.507059e+37  ;;  %v3798_v41 = vmul.f32 -1.442695, %v7862_v22  ;;  %v2995_v56 = vor.u32 1.1754944e-38, %v2994_v18 }
 0x29a   :  { %v2985_v36 = vsub.f32 1.0, %v2984_v57  ;;  %v1874_v61 = vmul.f32 %v1305_v32, %v7694_v21  ;;  %v7873_v48 = vadd.f32 %v7404_v47, %v2250_v17  ;;  %v528_v39 = vmul.f32 %v7373_v55, %v390_v0 }
 0x29b   :  { %v4379_v27 = vpop.eup %4378  ;;  %vm2989_vm6 = vweird.f32 %v4377_v10  ;;  %4386 = vpow2.f32 %v3798_v41  ;;  %vm1777_vm2 = vweird.f32 %v7839_v38  ;;  %v1781_v60 = vand.u32 2147483647, %v7839_v38 }
 0x29c   :  { %v4381_v20 = vpop.eup %4380  ;;  %v2986_v1 = vmul.f32 %v4377_v10, %v2985_v36  ;;  %v7876_v44 = vadd.f32 1.0, %v4379_v27  ;;  %1939 = vst.msk [vmem:[%s8270_s7 + $0xd8] sm:$0xff] %vm1911_vm4, %v1874_v61  ;;  %v3926_v35 = vmul.f32 -1.442695, %v7873_v48  ;;  %v1783_v50 = vand.u32 2147483648, %v7839_v38  ;;  %vm2990_vm10 = vmor %vm2988_vm14, %vm2989_vm6 }
 0x29d   :  { %v4383_v63 = vpop.eup %4382  ;;  %v1773_v21 = vmul.f32 %v4381_v20, %v7839_v38  ;;  %v2219_v8 = vmul.f32 %v7379_v14, %v2081_v33  ;;  %v7894_v26 = vadd.f32 %v7388_v29, %v528_v39  ;;  %vm1778_vm15 = vweird.f32 %v4381_v20 }
 0x29e   :  { %v2987_v51 = vadd.f32 %v4377_v10, %v2986_v1  ;;  %4388 = vrcp.f32 %v7876_v44  ;;  %v4385_v16 = vpop.eup %4384  ;;  %v7891_v40 = vadd.f32 1.0, %v4383_v63  ;;  %v3472_v49 = vand.u32 2147483647, %v7876_v44  ;;  %vm1779_vm11 = vmor %vm1777_vm2, %vm1778_vm15  ;;  %v7964_v63 = vld [vmem:[%s8267_s3] ss:$0 sm:$0xff] }
 0x29f   :  { %v1774_v7 = vsub.f32 1.0, %v1773_v21  ;;  %4390 = vpow2.f32 %v3926_v35  ;;  %v7897_v19 = vadd.f32 1.0, %v4385_v16  ;;  %v3474_v28 = vand.u32 2147483648, %v7876_v44 }
 0x2a0   :  { %v2991_v52 = vsel %vm2990_vm10, %v4377_v10, %v2987_v51  ;;  %4392 = vrcp.f32 %v7891_v40  ;;  %vm7904_vm7 = vcmp.eq.f32.partialorder %v1781_v60, 8.507059e+37  ;;  %v1784_v13 = vor.u32 1.1754944e-38, %v1783_v50 }
 0x2a1   :  { %v2996_v14 = vsel %vm7866_vm3, %v2995_v56, %v2991_v52  ;;  %v1775_v37 = vmul.f32 %v4381_v20, %v1774_v7  ;;  %v4387_v23 = vpop.eup %4386  ;;  %v560_v53 = vmul.f32 %v7373_v55, %v486_v25  ;;  %4394 = vrcp.f32 %v7897_v19  ;;  %v2177_v7 = vpop.f32.mrf.mxu3 }
 0x2a2   :  { %v3565_v34 = vmul.f32 %v2996_v14, %v7710_v58  ;;  %v3767_v45 = vmul.f32 -1.442695, %v7894_v26  ;;  %v7912_v4 = vadd.f32 %v7404_v47, %v2219_v8  ;;  %vm3468_vm13 = vweird.f32 %v7876_v44 }
 0x2a3   :  { %v1776_v12 = vadd.f32 %v4381_v20, %v1775_v37  ;;  %v1316_v55 = vand.u32 2147483647, %v7891_v40  ;;  %v1318_v58 = vand.u32 2147483648, %v7891_v40  ;;  %v7924_v62 = vadd.f32 1.0, %v4387_v23  ;;  %v393_v37 = vpop.f32.mrf.mxu0 }
 0x2a4   :  { %v4389_v43 = vpop.eup %4388  ;;  %3629 = vst.msk [vmem:[%s8271_s8 + $0xd8] sm:$0xff] %vm1911_vm4, %v3565_v34  ;;  %vm7927_vm5 = vcmp.eq.f32.partialorder %v3472_v49, 8.507059e+37  ;;  %v3475_v24 = vor.u32 1.1754944e-38, %v3474_v28  ;;  %vm1312_vm8 = vweird.f32 %v7891_v40  ;;  %v3007_v31 = vand.u32 2147483647, %v7897_v19 }
 0x2a5   :  { %v4391_v47 = vpop.eup %4390  ;;  %v1780_v9 = vsel %vm1779_vm11, %v4381_v20, %v1776_v12  ;;  %v3464_v54 = vmul.f32 %v4389_v43, %v7876_v44  ;;  %4396 = vrcp.f32 %v7924_v62  ;;  %vm3003_vm9 = vweird.f32 %v7897_v19 }
 0x2a6   :  { %v1785_v38 = vsel %vm7904_vm7, %v1784_v13, %v1780_v9  ;;  %v4393_v10 = vpop.eup %4392  ;;  %v3009_v59 = vand.u32 2147483648, %v7897_v19  ;;  %vm7940_vm0 = vcmp.eq.f32.partialorder %v1316_v55, 8.507059e+37  ;;  %v1319_v0 = vor.u32 1.1754944e-38, %v1318_v58 }
 0x2a7   :  { %v1906_v5 = vmul.f32 %v1785_v38, %v7714_v11  ;;  %v3465_v18 = vsub.f32 1.0, %v3464_v54  ;;  %v1308_v42 = vmul.f32 %v4393_v10, %v7891_v40  ;;  %v7944_v15 = vadd.f32 1.0, %v4391_v47  ;;  %v4395_v17 = vpop.eup %4394 }
 0x2a8   :  { %4398 = vpow2.f32 %v3767_v45  ;;  %vm3469_vm12 = vweird.f32 %v4389_v43  ;;  %v1796_v32 = vand.u32 2147483647, %v7924_v62  ;;  %v3895_v36 = vmul.f32 -1.442695, %v7912_v4 }
 0x2a9   :  { %1971 = vst.msk [vmem:[%s8270_s7 + $0x1d8] sm:$0xff] %vm1911_vm4, %v1906_v5  ;;  %v3466_v11 = vmul.f32 %v4389_v43, %v3465_v18  ;;  %v1309_v2 = vsub.f32 1.0, %v1308_v42  ;;  %v2999_v41 = vmul.f32 %v4395_v17, %v7897_v19  ;;  %vm7953_vm1 = vcmp.eq.f32.partialorder %v3007_v31, 8.507059e+37  ;;  %vm3470_vm3 = vmor %vm3468_vm13, %vm3469_vm12  ;;  %v2084_v5 = vpop.f32.mrf.mxu1  ;;  %v489_v18 = vpop.f32.mrf.mxu2 }
 0x2aa   :  { %4400 = vrcp.f32 %v7944_v15  ;;  %vm1313_vm14 = vweird.f32 %v4393_v10  ;;  %v3010_v56 = vor.u32 1.1754944e-38, %v3009_v59  ;;  %v1798_v39 = vand.u32 2147483648, %v7924_v62 }
 0x2ab   :  { %v3467_v61 = vadd.f32 %v4389_v43, %v3466_v11  ;;  %v4397_v33 = vpop.eup %4396  ;;  %v1310_v20 = vmul.f32 %v4393_v10, %v1309_v2  ;;  %v3000_v1 = vsub.f32 1.0, %v2999_v41  ;;  %4402 = vpow2.f32 %v3895_v36  ;;  %vm1314_vm15 = vmor %vm1312_vm8, %vm1313_vm14 }
 0x2ac   :  { %v7967_v21 = vadd.f32 %v7964_v63, %v560_v53  ;;  %v1788_v35 = vmul.f32 %v4397_v33, %v7924_v62  ;;  %vm1792_vm6 = vweird.f32 %v7924_v62  ;;  %vm7971_vm2 = vcmp.eq.f32.partialorder %v1796_v32, 8.507059e+37  ;;  %v7997_v53 = vld [vmem:[%s8268_s5] ss:$0 sm:$0xff] }
 0x2ad   :  { %v3471_v60 = vsel %vm3470_vm3, %v4389_v43, %v3467_v61  ;;  %v1311_v8 = vadd.f32 %v4393_v10, %v1310_v20  ;;  %v3001_v16 = vmul.f32 %v4395_v17, %v3000_v1  ;;  %vm3004_vm10 = vweird.f32 %v4395_v17 }
 0x2ae   :  { %v4399_v44 = vpop.eup %4398  ;;  %v3476_v50 = vsel %vm7927_vm5, %v3475_v24, %v3471_v60  ;;  %v1789_v52 = vsub.f32 1.0, %v1788_v35  ;;  %v1799_v49 = vor.u32 1.1754944e-38, %v1798_v39  ;;  %vm1793_vm7 = vweird.f32 %v4397_v33  ;;  %vm3005_vm11 = vmor %vm3003_vm9, %vm3004_vm10  ;;  %v8019_v24 = vld [vmem:[%s8266_s2] ss:$0 sm:$0xff]  ;;  %v396_v39 = vpop.f32.mrf.mxu0 }
 0x2af   :  { %v3597_v25 = vmul.f32 %v3476_v50, %v7817_v30  ;;  %v7981_v14 = vadd.f32 1.0, %v4399_v44  ;;  %v1315_v23 = vsel %vm1314_vm15, %v4393_v10, %v1311_v8  ;;  %v3002_v34 = vadd.f32 %v4395_v17, %v3001_v16  ;;  %vm1794_vm13 = vmor %vm1792_vm6, %vm1793_vm7 }
 0x2b0   :  { %v4401_v28 = vpop.eup %4400  ;;  %v3799_v29 = vmul.f32 -1.442695, %v7967_v21  ;;  %v1320_v30 = vsel %vm7940_vm0, %v1319_v0, %v1315_v23  ;;  %v1790_v40 = vmul.f32 %v4397_v33, %v1789_v52  ;;  %v2251_v12 = vmul.f32 %v7997_v53, %v2177_v7 }
 0x2b1   :  { %3661 = vst.msk [vmem:[%s8271_s8 + $0x1d8] sm:$0xff] %vm1911_vm4, %v3597_v25  ;;  %v3479_v13 = vmul.f32 %v4401_v28, %v7944_v15  ;;  %v4403_v45 = vpop.eup %4402  ;;  %v1875_v43 = vmul.f32 %v1320_v30, %v7823_v6  ;;  %v3006_v55 = vsel %vm3005_vm11, %v4395_v17, %v3002_v34  ;;  %v3487_v58 = vand.u32 2147483647, %v7944_v15 }
 0x2b2   :  { %4404 = vrcp.f32 %v7981_v14  ;;  %v3011_v19 = vsel %vm7953_vm1, %v3010_v56, %v3006_v55  ;;  %v1791_v47 = vadd.f32 %v4397_v33, %v1790_v40  ;;  %v3489_v54 = vand.u32 2147483648, %v7944_v15  ;;  %v2180_v56 = vpop.f32.mrf.mxu3 }
 0x2b3   :  { %v3480_v9 = vsub.f32 1.0, %v3479_v13  ;;  %1940 = vst.msk [vmem:[%s8270_s7 + $0xe0] sm:$0xff] %vm1911_vm4, %v1875_v43  ;;  %v3566_v46 = vmul.f32 %v3011_v19, %v7837_v3  ;;  %v8014_v6 = vadd.f32 1.0, %v4403_v45  ;;  %4406 = vpow2.f32 %v3799_v29  ;;  %v8025_v3 = vld [vmem:[%s8269_s6] ss:$0 sm:$0xff]  ;;  %v2087_v45 = vpop.f32.mrf.mxu1 }
 0x2b4   :  { %v529_v38 = vmul.f32 %v8019_v24, %v393_v37  ;;  %v1795_v31 = vsel %vm1794_vm13, %v4397_v33, %v1791_v47  ;;  %vm3484_vm5 = vweird.f32 %v4401_v28  ;;  %v8028_v62 = vadd.f32 %v8025_v3, %v2251_v12 }
 0x2b5   :  { %v3481_v10 = vmul.f32 %v4401_v28, %v3480_v9  ;;  %3630 = vst.msk [vmem:[%s8271_s8 + $0xe0] sm:$0xff] %vm1911_vm4, %v3566_v46  ;;  %v1800_v59 = vsel %vm7971_vm2, %v1799_v49, %v1795_v31  ;;  %vm3483_vm8 = vweird.f32 %v7944_v15  ;;  %v1331_v42 = vand.u32 2147483647, %v7981_v14 }
 0x2b6   :  { %4408 = vrcp.f32 %v8014_v6  ;;  %v1907_v57 = vmul.f32 %v1800_v59, %v7862_v22  ;;  %vm8040_vm9 = vcmp.eq.f32.partialorder %v3487_v58, 8.507059e+37  ;;  %v3490_v11 = vor.u32 1.1754944e-38, %v3489_v54  ;;  %vm3485_vm0 = vmor %vm3483_vm8, %vm3484_vm5 }
 0x2b7   :  { %v3482_v0 = vadd.f32 %v4401_v28, %v3481_v10  ;;  %v3927_v36 = vmul.f32 -1.442695, %v8028_v62  ;;  %v8047_v2 = vadd.f32 %v7964_v63, %v529_v38  ;;  %v2220_v15 = vmul.f32 %v7997_v53, %v2084_v5 }
 0x2b8   :  { %v4405_v32 = vpop.eup %4404  ;;  %v561_v41 = vmul.f32 %v8019_v24, %v489_v18  ;;  %1972 = vst.msk [vmem:[%s8270_s7 + $0x1e0] sm:$0xff] %vm1911_vm4, %v1907_v57  ;;  %vm1327_vm12 = vweird.f32 %v7981_v14  ;;  %v1333_v61 = vand.u32 2147483648, %v7981_v14  ;;  %vm8060_vm1 = vcmp.eq.f32.partialorder %v1331_v42, 8.507059e+37 }
 0x2b9   :  { %v3486_v22 = vsel %vm3485_vm0, %v4401_v28, %v3482_v0  ;;  %v1323_v27 = vmul.f32 %v4405_v32, %v7981_v14  ;;  %v4407_v33 = vpop.eup %4406  ;;  %4410 = vpow2.f32 %v3927_v36  ;;  %v3768_v60 = vmul.f32 -1.442695, %v8047_v2 }
 0x2ba   :  { %v3491_v20 = vsel %vm8040_vm9, %v3490_v11, %v3486_v22  ;;  %v8066_v44 = vadd.f32 1.0, %v4407_v33  ;;  %v8069_v50 = vadd.f32 %v8025_v3, %v2220_v15  ;;  %v8072_v16 = vadd.f32 %v7964_v63, %v561_v41 }
 0x2bb   :  { %v3598_v35 = vmul.f32 %v3491_v20, %v7873_v48  ;;  %v1324_v51 = vsub.f32 1.0, %v1323_v27  ;;  %4412 = vpow2.f32 %v3768_v60  ;;  %v2252_v7 = vmul.f32 %v7997_v53, %v2180_v56 }
 0x2bc   :  { %v4409_v8 = vpop.eup %4408  ;;  %v530_v25 = vmul.f32 %v8019_v24, %v396_v39  ;;  %vm1328_vm14 = vweird.f32 %v4405_v32  ;;  %4414 = vrcp.f32 %v8066_v44  ;;  %v1334_v49 = vor.u32 1.1754944e-38, %v1333_v61 }
 0x2bd   :  { %3662 = vst.msk [vmem:[%s8271_s8 + $0x1e0] sm:$0xff] %vm1911_vm4, %v3598_v35  ;;  %v1325_v48 = vmul.f32 %v4405_v32, %v1324_v51  ;;  %v3014_v52 = vmul.f32 %v4409_v8, %v8014_v6  ;;  %vm3018_vm3 = vweird.f32 %v8014_v6  ;;  %v3022_v37 = vand.u32 2147483647, %v8014_v6  ;;  %vm1329_vm6 = vmor %vm1327_vm12, %vm1328_vm14 }
 0x2be   :  { %v3896_v28 = vmul.f32 -1.442695, %v8069_v50  ;;  %v3800_v29 = vmul.f32 -1.442695, %v8072_v16  ;;  %v8087_v30 = vadd.f32 %v8025_v3, %v2252_v7  ;;  %vm3019_vm2 = vweird.f32 %v4409_v8 }
 0x2bf   :  { %v1326_v23 = vadd.f32 %v4405_v32, %v1325_v48  ;;  %v3015_v34 = vsub.f32 1.0, %v3014_v52  ;;  %v4411_v40 = vpop.eup %4410  ;;  %v3024_v13 = vand.u32 2147483648, %v8014_v6  ;;  %v8093_v12 = vadd.f32 %v7964_v63, %v530_v25  ;;  %vm3020_vm10 = vmor %vm3018_vm3, %vm3019_vm2  ;;  %v492_v48 = vpop.f32.mrf.mxu2 }
 0x2c0   :  { %4416 = vpow2.f32 %v3896_v28  ;;  %v8095_v58 = vadd.f32 1.0, %v4411_v40  ;;  %v3928_v14 = vmul.f32 -1.442695, %v8087_v30  ;;  %v2221_v38 = vmul.f32 %v7997_v53, %v2087_v45 }
 0x2c1   :  { %v1330_v43 = vsel %vm1329_vm6, %v4405_v32, %v1326_v23  ;;  %v3016_v55 = vmul.f32 %v4409_v8, %v3015_v34  ;;  %4418 = vpow2.f32 %v3800_v29  ;;  %v4413_v19 = vpop.eup %4412  ;;  %vm3023_vm15 = vcmp.eq.f32.partialorder %v3022_v37, 8.507059e+37 }
 0x2c2   :  { %v1335_v47 = vsel %vm8060_vm1, %v1334_v49, %v1330_v43  ;;  %v4415_v9 = vpop.eup %4414  ;;  %4420 = vrcp.f32 %v8095_v58  ;;  %v3025_v31 = vor.u32 1.1754944e-38, %v3024_v13  ;;  %v8112_v18 = vadd.f32 1.0, %v4413_v19 }
 0x2c3   :  { %v1876_v54 = vmul.f32 %v1335_v47, %v7894_v26  ;;  %v3017_v46 = vadd.f32 %v4409_v8, %v3016_v55  ;;  %v1803_v10 = vmul.f32 %v4415_v9, %v8066_v44  ;;  %v1811_v26 = vand.u32 2147483647, %v8066_v44 }
 0x2c4   :  { %v3769_v59 = vmul.f32 -1.442695, %v8093_v12  ;;  %v1813_v0 = vand.u32 2147483648, %v8066_v44  ;;  %4422 = vpow2.f32 %v3928_v14  ;;  %v8119_v32 = vadd.f32 %v8025_v3, %v2221_v38 }
 0x2c5   :  { %1941 = vst.msk [vmem:[%s8270_s7 + $0xe8] sm:$0xff] %vm1911_vm4, %v1876_v54  ;;  %v3021_v5 = vsel %vm3020_vm10, %v4409_v8, %v3017_v46  ;;  %v1804_v6 = vsub.f32 1.0, %v1803_v10  ;;  %4424 = vrcp.f32 %v8112_v18  ;;  %vm1808_vm7 = vweird.f32 %v4415_v9 }
 0x2c6   :  { %v4417_v42 = vpop.eup %4416  ;;  %v3026_v57 = vsel %vm3023_vm15, %v3025_v31, %v3021_v5  ;;  %vm1807_vm11 = vweird.f32 %v8066_v44  ;;  %v3504_v27 = vand.u32 2147483648, %v8095_v58  ;;  %4426 = vpow2.f32 %v3769_v59 }
 0x2c7   :  { %v4419_v17 = vpop.eup %4418  ;;  %v3567_v11 = vmul.f32 %v3026_v57, %v7912_v4  ;;  %v1805_v36 = vmul.f32 %v4415_v9, %v1804_v6  ;;  %v8121_v15 = vadd.f32 1.0, %v4417_v42  ;;  %v3502_v4 = vand.u32 2147483647, %v8095_v58  ;;  %vm1809_vm5 = vmor %vm1807_vm11, %vm1808_vm7 }
 0x2c8   :  { %v8123_v41 = vadd.f32 1.0, %v4419_v17  ;;  %v4421_v22 = vpop.eup %4420  ;;  %vm1812_vm13 = vcmp.eq.f32.partialorder %v1811_v26, 8.507059e+37  ;;  %v1814_v56 = vor.u32 1.1754944e-38, %v1813_v0  ;;  %vm3498_vm8 = vweird.f32 %v8095_v58 }
 0x2c9   :  { %3631 = vst.msk [vmem:[%s8271_s8 + $0xe8] sm:$0xff] %vm1911_vm4, %v3567_v11  ;;  %v1806_v61 = vadd.f32 %v4415_v9, %v1805_v36  ;;  %v3494_v39 = vmul.f32 %v4421_v22, %v8095_v58  ;;  %v1346_v33 = vand.u32 2147483647, %v8112_v18  ;;  %4428 = vrcp.f32 %v8121_v15 }
 0x2ca   :  { %v3897_v20 = vmul.f32 -1.442695, %v8119_v32  ;;  %v4423_v1 = vpop.eup %4422  ;;  %v1348_v51 = vand.u32 2147483648, %v8112_v18  ;;  %4430 = vrcp.f32 %v8123_v41  ;;  %vm8139_vm9 = vcmp.eq.f32.partialorder %v3502_v4, 8.507059e+37 }
 0x2cb   :  { %v1810_v60 = vsel %vm1809_vm5, %v4415_v9, %v1806_v61  ;;  %v3495_v35 = vsub.f32 1.0, %v3494_v39  ;;  %v4425_v44 = vpop.eup %4424  ;;  %v3505_v25 = vor.u32 1.1754944e-38, %v3504_v27  ;;  %vm1342_vm0 = vweird.f32 %v8112_v18 }
 0x2cc   :  { %v1815_v8 = vsel %vm1812_vm13, %v1814_v56, %v1810_v60  ;;  %vm3499_vm12 = vweird.f32 %v4421_v22  ;;  %v1338_v37 = vmul.f32 %v4425_v44, %v8112_v18  ;;  %v4427_v28 = vpop.eup %4426  ;;  %vm8146_vm1 = vcmp.eq.f32.partialorder %v1346_v33, 8.507059e+37  ;;  %v2183_v56 = vpop.f32.mrf.mxu3 }
 0x2cd   :  { %v1908_v52 = vmul.f32 %v1815_v8, %v7967_v21  ;;  %v3496_v49 = vmul.f32 %v4421_v22, %v3495_v35  ;;  %v3037_v34 = vand.u32 2147483647, %v8121_v15  ;;  %v8151_v29 = vadd.f32 1.0, %v4423_v1  ;;  %vm3500_vm14 = vmor %vm3498_vm8, %vm3499_vm12 }
 0x2ce   :  { %4432 = vpow2.f32 %v3897_v20  ;;  %v1339_v40 = vsub.f32 1.0, %v1338_v37  ;;  %v1349_v13 = vor.u32 1.1754944e-38, %v1348_v51  ;;  %v562_v45 = vmul.f32 %v8019_v24, %v492_v48 }
 0x2cf   :  { %1973 = vst.msk [vmem:[%s8270_s7 + $0x1e8] sm:$0xff] %vm1911_vm4, %v1908_v52  ;;  %v3497_v21 = vadd.f32 %v4421_v22, %v3496_v49  ;;  %v4429_v43 = vpop.eup %4428  ;;  %vm3033_vm3 = vweird.f32 %v8121_v15  ;;  %v3039_v55 = vand.u32 2147483648, %v8121_v15  ;;  %4434 = vrcp.f32 %v8151_v29 }
 0x2d0   :  { %v8163_v19 = vadd.f32 1.0, %v4427_v28  ;;  %v4431_v47 = vpop.eup %4430  ;;  %v1340_v9 = vmul.f32 %v4425_v44, %v1339_v40  ;;  %vm1343_vm6 = vweird.f32 %v4425_v44  ;;  %v3029_v54 = vmul.f32 %v4429_v43, %v8121_v15 }
 0x2d1   :  { %v3501_v14 = vsel %vm3500_vm14, %v4421_v22, %v3497_v21  ;;  %vm8168_vm2 = vcmp.eq.f32.partialorder %v3037_v34, 8.507059e+37  ;;  %v1818_v46 = vmul.f32 %v4431_v47, %v8123_v41  ;;  %vm1822_vm10 = vweird.f32 %v8123_v41  ;;  %vm1344_vm15 = vmor %vm1342_vm0, %vm1343_vm6 }
 0x2d2   :  { %v3506_v24 = vsel %vm8139_vm9, %v3505_v25, %v3501_v14  ;;  %v1341_v31 = vadd.f32 %v4425_v44, %v1340_v9  ;;  %v3030_v10 = vsub.f32 1.0, %v3029_v54  ;;  %v1826_v5 = vand.u32 2147483647, %v8123_v41 }
 0x2d3   :  { %v3599_v38 = vmul.f32 %v3506_v24, %v8028_v62  ;;  %v3040_v59 = vor.u32 1.1754944e-38, %v3039_v55  ;;  %v1819_v42 = vsub.f32 1.0, %v1818_v46  ;;  %v1828_v57 = vand.u32 2147483648, %v8123_v41 }
 0x2d4   :  { %v4433_v26 = vpop.eup %4432  ;;  %4436 = vrcp.f32 %v8163_v19  ;;  %v1345_v62 = vsel %vm1344_vm15, %v4425_v44, %v1341_v31  ;;  %v3031_v6 = vmul.f32 %v4429_v43, %v3030_v10  ;;  %vm3034_vm7 = vweird.f32 %v4429_v43 }
 0x2d5   :  { %3663 = vst.msk [vmem:[%s8271_s8 + $0x1e8] sm:$0xff] %vm1911_vm4, %v3599_v38  ;;  %v8185_v0 = vadd.f32 %v7964_v63, %v562_v45  ;;  %v4435_v17 = vpop.eup %4434  ;;  %v1350_v18 = vsel %vm8146_vm1, %v1349_v13, %v1345_v62  ;;  %v1820_v11 = vmul.f32 %v4431_v47, %v1819_v42  ;;  %vm1823_vm11 = vweird.f32 %v4431_v47  ;;  %vm3035_vm5 = vmor %vm3033_vm3, %vm3034_vm7 }
 0x2d6   :  { %v8189_v36 = vadd.f32 1.0, %v4433_v26  ;;  %v1877_v22 = vmul.f32 %v1350_v18, %v8047_v2  ;;  %v3032_v4 = vadd.f32 %v4429_v43, %v3031_v6  ;;  %vm8192_vm13 = vcmp.eq.f32.partialorder %v1826_v5, 8.507059e+37  ;;  %vm1824_vm8 = vmor %vm1822_vm10, %vm1823_vm11 }
 0x2d7   :  { %v3509_v61 = vmul.f32 %v4435_v17, %v8151_v29  ;;  %v1821_v63 = vadd.f32 %v4431_v47, %v1820_v11  ;;  %v1829_v39 = vor.u32 1.1754944e-38, %v1828_v57  ;;  %v3517_v33 = vand.u32 2147483647, %v8151_v29 }
 0x2d8   :  { %4438 = vrcp.f32 %v8189_v36  ;;  %1942 = vst.msk [vmem:[%s8270_s7 + $0xf0] sm:$0xff] %vm1911_vm4, %v1877_v22  ;;  %v3036_v2 = vsel %vm3035_vm5, %v4429_v43, %v3032_v4  ;;  %vm3514_vm9 = vweird.f32 %v4435_v17  ;;  %v3519_v15 = vand.u32 2147483648, %v8151_v29 }
 0x2d9   :  { %v3510_v20 = vsub.f32 1.0, %v3509_v61  ;;  %v3041_v60 = vsel %vm8168_vm2, %v3040_v59, %v3036_v2  ;;  %v1825_v35 = vsel %vm1824_vm8, %v4431_v47, %v1821_v63  ;;  %v3801_v51 = vmul.f32 -1.442695, %v8185_v0 }
 0x2da   :  { %v4437_v1 = vpop.eup %4436  ;;  %v2253_v44 = vmul.f32 %v7997_v53, %v2183_v56  ;;  %v3568_v8 = vmul.f32 %v3041_v60, %v8069_v50  ;;  %v1830_v7 = vsel %vm8192_vm13, %v1829_v39, %v1825_v35  ;;  %vm3513_vm0 = vweird.f32 %v8151_v29 }
 0x2db   :  { %v3511_v41 = vmul.f32 %v4435_v17, %v3510_v20  ;;  %v1353_v25 = vmul.f32 %v4437_v1, %v8163_v19  ;;  %v1909_v48 = vmul.f32 %v1830_v7, %v8072_v16  ;;  %v1361_v52 = vand.u32 2147483647, %v8163_v19  ;;  %vm3515_vm12 = vmor %vm3513_vm0, %vm3514_vm9 }
 0x2dc   :  { %3632 = vst.msk [vmem:[%s8271_s8 + $0xf0] sm:$0xff] %vm1911_vm4, %v3568_v8  ;;  %4440 = vpow2.f32 %v3801_v51  ;;  %v8224_v50 = vadd.f32 %v8025_v3, %v2253_v44  ;;  %vm3518_vm1 = vcmp.eq.f32.partialorder %v3517_v33, 8.507059e+37  ;;  %v3520_v16 = vor.u32 1.1754944e-38, %v3519_v15 }
 0x2dd   :  { %v3512_v53 = vadd.f32 %v4435_v17, %v3511_v41  ;;  %v1354_v49 = vsub.f32 1.0, %v1353_v25  ;;  %1974 = vst.msk [vmem:[%s8270_s7 + $0x1f0] sm:$0xff] %vm1911_vm4, %v1909_v48  ;;  %vm1357_vm14 = vweird.f32 %v8163_v19  ;;  %v1363_v28 = vand.u32 2147483648, %v8163_v19 }
 0x2de   :  { %v4439_v37 = vpop.eup %4438  ;;  %vm1358_vm3 = vweird.f32 %v4437_v1  ;;  %v3929_v21 = vmul.f32 -1.442695, %v8224_v50  ;;  %vm1362_vm6 = vcmp.eq.f32.partialorder %v1361_v52, 8.507059e+37  ;;  %vm3048_vm10 = vweird.f32 %v8189_v36 }
 0x2df   :  { %v3516_v23 = vsel %vm3515_vm12, %v4435_v17, %v3512_v53  ;;  %v1355_v34 = vmul.f32 %v4437_v1, %v1354_v49  ;;  %v3044_v3 = vmul.f32 %v4439_v37, %v8189_v36  ;;  %vm1359_vm2 = vmor %vm1357_vm14, %vm1358_vm3  ;;  %v1364_v43 = vor.u32 1.1754944e-38, %v1363_v28 }
 0x2e0   :  { %v3521_v29 = vsel %vm3518_vm1, %v3520_v16, %v3516_v23  ;;  %v3054_v55 = vand.u32 2147483648, %v8189_v36  ;;  %4442 = vpow2.f32 %v3929_v21  ;;  %vm3049_vm15 = vweird.f32 %v4439_v37 }
 0x2e1   :  { %v3600_v40 = vmul.f32 %v3521_v29, %v8087_v30  ;;  %v1356_v13 = vadd.f32 %v4437_v1, %v1355_v34  ;;  %v3045_v45 = vsub.f32 1.0, %v3044_v3  ;;  %v3052_v30 = vand.u32 2147483647, %v8189_v36  ;;  %vm3050_vm7 = vmor %vm3048_vm10, %vm3049_vm15 }
 0x2e2   :  { %v4441_v19 = vpop.eup %4440  ;;  %v3055_v46 = vor.u32 1.1754944e-38, %v3054_v55 }
 0x2e3   :  { %3664 = vst.msk [vmem:[%s8271_s8 + $0x1f0] sm:$0xff] %vm1911_vm4, %v3600_v40  ;;  %v1360_v47 = vsel %vm1359_vm2, %v4437_v1, %v1356_v13  ;;  %v3046_v14 = vmul.f32 %v4439_v37, %v3045_v45  ;;  %v886_v54 = vadd.f32 1.0, %v4441_v19  ;;  %vm3053_vm11 = vcmp.eq.f32.partialorder %v3052_v30, 8.507059e+37 }
 0x2e4   :  { %v1365_v9 = vsel %vm1362_vm6, %v1364_v43, %v1360_v47 }
 0x2e5   :  { %v1878_v24 = vmul.f32 %v1365_v9, %v8093_v12  ;;  %v3047_v58 = vadd.f32 %v4439_v37, %v3046_v14  ;;  %4444 = vrcp.f32 %v886_v54  ;;  %v1843_v57 = vand.u32 2147483648, %v886_v54 }
 0x2e6   :  { %v4443_v31 = vpop.eup %4442  ;;  %v1841_v17 = vand.u32 2147483647, %v886_v54  ;;  %vm1837_vm5 = vweird.f32 %v886_v54 }
 0x2e7   :  { %1943 = vst.msk [vmem:[%s8270_s7 + $0xf8] sm:$0xff] %vm1911_vm4, %v1878_v24  ;;  %v3051_v38 = vsel %vm3050_vm7, %v4439_v37, %v3047_v58  ;;  %v2577_v26 = vadd.f32 1.0, %v4443_v31 }
 0x2e8   :  { %v3056_v10 = vsel %vm3053_vm11, %v3055_v46, %v3051_v38  ;;  %vm1842_vm9 = vcmp.eq.f32.partialorder %v1841_v17, 8.507059e+37 }
 0x2e9   :  { %v3569_v5 = vmul.f32 %v3056_v10, %v8119_v32  ;;  %4446 = vrcp.f32 %v2577_v26  ;;  %v1844_v32 = vor.u32 1.1754944e-38, %v1843_v57  ;;  %v3534_v4 = vand.u32 2147483648, %v2577_v26 }
 0x2ea   :  { %v3532_v56 = vand.u32 2147483647, %v2577_v26  ;;  %vm3528_vm12 = vweird.f32 %v2577_v26 }
 0x2eb   :  { %3633 = vst.msk [vmem:[%s8271_s8 + $0xf8] sm:$0xff] %vm1911_vm4, %v3569_v5  ;;  %v4445_v12 = vpop.eup %4444  ;;  %v3535_v33 = vor.u32 1.1754944e-38, %v3534_v4 }
 0x2ec   :  { %v1833_v59 = vmul.f32 %v4445_v12, %v886_v54  ;;  %vm1838_vm13 = vweird.f32 %v4445_v12  ;;  %vm3533_vm14 = vcmp.eq.f32.partialorder %v3532_v56, 8.507059e+37 }
 0x2ed   :  { %vm1839_vm8 = vmor %vm1837_vm5, %vm1838_vm13 }
 0x2ee   :  { %v1834_v42 = vsub.f32 1.0, %v1833_v59 }
 0x2ef   :  { %v4447_v62 = vpop.eup %4446 }
 0x2f0   :  { %v1835_v6 = vmul.f32 %v4445_v12, %v1834_v42  ;;  %v3524_v18 = vmul.f32 %v4447_v62, %v2577_v26  ;;  %vm3529_vm0 = vweird.f32 %v4447_v62 }
 0x2f1   :  { %vm3530_vm1 = vmor %vm3528_vm12, %vm3529_vm0 }
 0x2f2   :  { %v1836_v11 = vadd.f32 %v4445_v12, %v1835_v6  ;;  %v3525_v36 = vsub.f32 1.0, %v3524_v18 }
 0x2f4   :  { %v1840_v22 = vsel %vm1839_vm8, %v4445_v12, %v1836_v11  ;;  %v3526_v61 = vmul.f32 %v4447_v62, %v3525_v36 }
 0x2f5   :  { %v1845_v27 = vsel %vm1842_vm9, %v1844_v32, %v1840_v22 }
 0x2f6   :  { %v1910_v63 = vmul.f32 %v1845_v27, %v8185_v0  ;;  %v3527_v39 = vadd.f32 %v4447_v62, %v3526_v61 }
 0x2f8   :  { %1975 = vst.msk [vmem:[%s8270_s7 + $0x1f8] sm:$0xff] %vm1911_vm4, %v1910_v63  ;;  %v3531_v2 = vsel %vm3530_vm1, %v4447_v62, %v3527_v39 }
 0x2f9   :  { %v3536_v20 = vsel %vm3533_vm14, %v3535_v33, %v3531_v2 }
 0x2fa   :  { %v3601_v15 = vmul.f32 %v3536_v20, %v8224_v50 }
 0x2fc   :  { %3665 = vst.msk [vmem:[%s8271_s8 + $0x1f8] sm:$0xff] %vm1911_vm4, %v3601_v15 }

</bundles_post_ra>
